<compile_context>
chip_gen: v7x
topology: tpu7x:2x2x1
jax: 0.10.0
libtpu: 0.0.40
codegen_flags: <defaults>
</compile_context>

<pallas_src>
import numpy as np

import jax
import jax.numpy as jnp
from jax.experimental import pallas as pl
from jax.experimental.pallas import tpu as pltpu  # noqa: F401  (kept for TPU builds)

# ----------------------------- configuration -------------------------------
B = 2          # batch
T = 16         # sequence length
CC = 32        # content_channels
CS = 48        # speaker_embedding_dim
C = 64         # internal_channels
K = 7          # kernel_size (depthwise)
L = 4          # num_layers
H = 3 * C      # ConvNeXt hidden channels
PAD = (K - 1) // 2
EPS = 1e-5

BT = B * T       # batch-folded row count
CIN = CC + CS    # fused input-projection width


# --------------------------- shared math (traced) ---------------------------
def _layer_norm(h, gamma, beta):
    mu = jnp.mean(h, axis=-1, keepdims=True)
    var = jnp.mean(jnp.square(h - mu), axis=-1, keepdims=True)
    return (h - mu) * jax.lax.rsqrt(var + EPS) * gamma + beta


def _gelu_tanh(x):
    c = 0.7978845608028654  # sqrt(2/pi)
    return 0.5 * x * (1.0 + jnp.tanh(c * (x + 0.044715 * x * x * x)))


# ------------------- constant shift matrix for the dw conv ------------------
def _build_shift_matrix():
    """(K*BT, BT) 0/1 matrix.  Row k*BT + t selects h[t + k - PAD] iff that
    index lies inside the SAME folded batch element; otherwise the row is all
    zero.  This implements Conv1d 'same' zero padding per batch element and
    prevents cross-batch leakage after folding B into the row axis."""
    smat = np.zeros((K * BT, BT), np.float32)
    for k in range(K):
        d = k - PAD
        for t in range(BT):
            s = t + d
            if 0 <= s < BT and (s // T) == (t // T):
                smat[k * BT + t, s] = 1.0
    return jnp.asarray(smat)


_SHIFT_MAT = _build_shift_matrix()


# ------------------------------- Pallas kernel ------------------------------
def dp_kernel(xg_ref, mcol_ref, smat_ref, pio_ref, w1s_ref, b1s_ref,
              w2s_ref, lvecs_ref, bo_ref, o_ref):
    xg = xg_ref[...]        # (BT, CIN)   [phoneme | broadcast speaker] features
    mcol = mcol_ref[...]    # (BT, 1)
    smat = smat_ref[...]    # (K*BT, BT)  constant shift/zero-pad matrix
    pio = pio_ref[...]      # (CIN+8, C)  fused input weights + head/tail vectors
    w1s = w1s_ref[...]      # (L, C, H)
    b1s = b1s_ref[...]      # (L, 1, H)
    w2s = w2s_ref[...]      # (L, H, C)
    lv = lvecs_ref[...]     # (L, K+5, C) per-layer taps/bias/norm/scale vectors

    w_in = pio[0:CIN, :]                  # fused [w_ph ; w_sp]
    b_in_tot = pio[CIN + 0:CIN + 1, :]    # b_ph + b_sp
    g_in = pio[CIN + 1:CIN + 2, :]
    b_in = pio[CIN + 2:CIN + 3, :]
    g_out = pio[CIN + 3:CIN + 4, :]
    b_out = pio[CIN + 4:CIN + 5, :]
    w_oT = pio[CIN + 5:CIN + 6, :]        # (1, C) output-projection weights

    # phoneme_input + speaker_input (fused pointwise convs) -> mask -> norm.
    h = jnp.dot(xg, w_in, preferred_element_type=jnp.float32) + b_in_tot
    h = h * mcol
    h = _layer_norm(h, g_in, b_in) * mcol

    for l in range(L):
        res = h
        lvl = lv[l]                       # (K+5, C) this layer's vectors
        # Depthwise conv: one MXU matmul builds all K shifted, per-batch
        # zero-padded copies of h; taps are then sublane-aligned row slices
        # (offsets are multiples of BT=32) + VPU multiply-adds.
        sh = jnp.dot(smat, h, preferred_element_type=jnp.float32)  # (K*BT, C)
        y = sh[0:BT, :] * lvl[0:1, :]
        for k in range(1, K):
            y = y + sh[k * BT:(k + 1) * BT, :] * lvl[k:k + 1, :]
        y = y + lvl[K:K + 1, :]                                    # dw bias
        y = _layer_norm(y, lvl[K + 1:K + 2, :], lvl[K + 2:K + 3, :])
        y = jnp.dot(y, w1s[l], preferred_element_type=jnp.float32) + b1s[l]
        y = _gelu_tanh(y)
        y = jnp.dot(y, w2s[l], preferred_element_type=jnp.float32)
        y = y + lvl[K + 3:K + 4, :]                                # pw2 bias
        y = y * lvl[K + 4:K + 5, :]                                # layer scale
        h = (res + y) * mcol

    h = _layer_norm(h, g_out, b_out) * mcol
    # output_layer: 1x1 conv C -> 1 as VPU multiply + cross-lane reduction
    # (avoids an N=1 MXU matmul and a lane-sparse intermediate).
    out = jnp.sum(h * w_oT, axis=-1, keepdims=True) + bo_ref[...]
    o_ref[...] = jnp.maximum(out * mcol, 0.0)


# --------------------------- parameter packing -------------------------------
def pack_params(params):
    """Pack the 19 small parameter arrays into a few stacked arrays.  Called
    ONCE per parameter set (hoisted out of the per-call path)."""
    (w_ph, b_ph, w_sp, b_sp, g_in, b_in,
     wdw, bdw, g_mid, b_mid, w1, b1, w2, b2, sc,
     g_out, b_out, w_o, b_o) = params

    pio = jnp.concatenate(
        [w_ph, w_sp,                                              # rows 0..CIN-1
         b_ph + b_sp, g_in, b_in, g_out, b_out, w_o.T,            # rows CIN..CIN+5
         jnp.zeros((2, C), jnp.float32)], axis=0)                 # pad -> CIN+8 rows
    lvecs = jnp.concatenate(
        [wdw, bdw[:, None, :], g_mid[:, None, :], b_mid[:, None, :],
         b2[:, None, :], sc[:, None, :]], axis=1)                 # (L, K+5, C)
    b1s = b1[:, None, :]                                          # (L, 1, H)
    return (pio, w1, b1s, w2, lvecs, b_o)


# --------------------------------- wrapper ----------------------------------
_FLOPS = (2 * BT * CIN * C
          + L * (2 * K * BT * BT * C + 4 * BT * C * H)
          + 2 * BT * C)
_BYTES = 4 * (BT * CIN + BT + K * BT * BT + (CIN + 8) * C
              + L * C * H + L * H + L * H * C
              + L * (K + 5) * C + 1 + BT)
_COST = pl.CostEstimate(flops=_FLOPS,
                        transcendentals=L * BT * H,
                        bytes_accessed=_BYTES)


@jax.jit
def duration_predictor(x, g, mask, packed):
    """x: (B, T, CC), g: (B, 1, CS), mask: (B, T, 1) -> (B, T, 1)."""
    pio, w1, b1s, w2, lvecs, b_o = packed

    # Fold batch into rows; broadcast the speaker embedding over time and
    # concatenate so both input 1x1 convs become one matmul (layout plumbing).
    xf = x.reshape(BT, CC)
    gf = jnp.broadcast_to(g, (B, T, CS)).reshape(BT, CS)
    xg = jnp.concatenate([xf, gf], axis=-1)                       # (BT, CIN)
    mcol = mask.reshape(BT, 1)

    out = pl.pallas_call(
        dp_kernel,
        out_shape=jax.ShapeDtypeStruct((BT, 1), jnp.float32),
        cost_estimate=_COST,
    )(xg, mcol, _SHIFT_MAT, pio, w1, b1s, w2, lvecs, b_o)
    return out.reshape(B, T, 1)


# ----------------------------- parameter init -------------------------------
def init_params(key):
    def nrm(k, shape, scale=0.05):
        return scale * jax.random.normal(k, shape, jnp.float32)

    ks = iter(jax.random.split(key, 32))
    w_ph = nrm(next(ks), (CC, C))          # Conv1d(CC, C, 1) weight, transposed
    b_ph = nrm(next(ks), (1, C))
    w_sp = nrm(next(ks), (CS, C))          # Conv1d(CS, C, 1) weight, transposed
    b_sp = nrm(next(ks), (1, C))
    g_in = jnp.ones((1, C), jnp.float32)
    b_in = jnp.zeros((1, C), jnp.float32)
    wdw = nrm(next(ks), (L, K, C))         # depthwise Conv1d weights (per-layer)
    bdw = nrm(next(ks), (L, C))
    g_mid = jnp.ones((L, C), jnp.float32)
    b_mid = jnp.zeros((L, C), jnp.float32)
    w1 = nrm(next(ks), (L, C, H))          # Conv1d(C, 3C, 1), transposed
    b1 = nrm(next(ks), (L, H))
    w2 = nrm(next(ks), (L, H, C))          # Conv1d(3C, C, 1), transposed
    b2 = nrm(next(ks), (L, C))
    sc = jnp.ones((L, C), jnp.float32)     # ConvNeXt per-channel layer scale
    g_out = jnp.ones((1, C), jnp.float32)
    b_out = jnp.zeros((1, C), jnp.float32)
    w_o = nrm(next(ks), (C, 1))            # Conv1d(C, 1, 1), transposed
    b_o = nrm(next(ks), (1, 1))
    return (w_ph, b_ph, w_sp, b_sp, g_in, b_in,
            wdw, bdw, g_mid, b_mid, w1, b1, w2, b2, sc,
            g_out, b_out, w_o, b_o)


# ------------------------------ plain-JAX reference --------------------------
def _forward_one(x, gvec, mask,
                 w_ph, b_ph, w_sp, b_sp, g_in, b_in,
                 wdw, bdw, g_mid, b_mid, w1, b1, w2, b2, sc,
                 g_out, b_out, w_o, b_o):
    """Per-batch reference, independent of the kernel's folded layout, packed
    parameters and shift-matrix conv (uses explicit per-sequence zero padding)."""
    h = jnp.dot(x, w_ph) + b_ph + jnp.dot(gvec, w_sp) + b_sp
    h = h * mask
    h = _layer_norm(h, g_in, b_in) * mask
    for l in range(L):
        res = h
        zp = jnp.zeros((PAD, C), jnp.float32)
        hp = jnp.concatenate([zp, h, zp], axis=0)           # (T + 2*PAD, C)
        y = jnp.zeros((T, C), jnp.float32)
        for k in range(K):                                  # depthwise conv
            y = y + hp[k:k + T, :] * wdw[l, k][None, :]
        y = y + bdw[l][None, :]
        y = _layer_norm(y, g_mid[l][None, :], b_mid[l][None, :])
        y = jnp.dot(y, w1[l]) + b1[l][None, :]
        y = _gelu_tanh(y)
        y = jnp.dot(y, w2[l]) + b2[l][None, :]
        y = y * sc[l][None, :]
        h = (res + y) * mask
    h = _layer_norm(h, g_out, b_out) * mask
    out = jnp.dot(h, w_o) + b_o
    return jnp.maximum(out * mask, 0.0)


def reference(x, g, mask, params):
    return jax.vmap(lambda xb, gb, mb: _forward_one(xb, gb, mb, *params))(
        x, g, mask)


# ----------------------------------- main ------------------------------------
if __name__ == "__main__":
    key = jax.random.PRNGKey(0)
    k_x, k_g, k_p = jax.random.split(key, 3)

    x = jax.random.normal(k_x, (B, T, CC), jnp.float32)
    g = jax.random.normal(k_g, (B, 1, CS), jnp.float32)
    lengths = jnp.array([T, T - 4], jnp.int32)
    mask = (jnp.arange(T)[None, :] < lengths[:, None]).astype(jnp.float32)
    mask = mask[:, :, None]                 # (B, T, 1)

    params = init_params(k_p)
    packed = jax.tree_util.tree_map(jax.block_until_ready, pack_params(params))

    out = jax.block_until_ready(duration_predictor(x, g, mask, packed))
    ref = jax.block_until_ready(reference(x, g, mask, params))

    assert out.shape == (B, T, 1)
    # Tolerance accounts for Mosaic-vs-XLA default f32 matmul precision and the
    # shift-matrix (MXU) vs elementwise (VPU) depthwise-conv formulations;
    # structural errors (wrong taps / packing / batch leakage) are >=1e-1 scale.
    assert jnp.allclose(out, ref, atol=1e-2, rtol=1e-2), (
        float(jnp.max(jnp.abs(out - ref))))

    print("KERNEL_OK")
</pallas_src>

<mosaic_0001>
module attributes {stable_mosaic.version = 11 : i64} {
  func.func @dp_kernel(%arg0: memref<32x80xf32, #tpu.memory_space<vmem>>, %arg1: memref<32x1xf32, #tpu.memory_space<vmem>>, %arg2: memref<224x32xf32, #tpu.memory_space<vmem>>, %arg3: memref<88x64xf32, #tpu.memory_space<vmem>>, %arg4: memref<4x64x192xf32, #tpu.memory_space<vmem>>, %arg5: memref<4x1x192xf32, #tpu.memory_space<vmem>>, %arg6: memref<4x192x64xf32, #tpu.memory_space<vmem>>, %arg7: memref<4x12x64xf32, #tpu.memory_space<vmem>>, %arg8: memref<1x1xf32, #tpu.memory_space<vmem>>, %arg9: memref<32x1xf32, #tpu.memory_space<vmem>>) attributes {dimension_semantics = [], scalar_prefetch = 0 : i64, scratch_operands = 0 : i64, tpu.core_type = #tpu.core_type<tc>} {
    %c0 = arith.constant 0 : index
    %c0_0 = arith.constant 0 : index
    %0 = vector.load %arg0[%c0, %c0_0] : memref<32x80xf32, #tpu.memory_space<vmem>>, vector<32x80xf32>
    %c0_1 = arith.constant 0 : index
    %c0_2 = arith.constant 0 : index
    %1 = vector.load %arg1[%c0_1, %c0_2] : memref<32x1xf32, #tpu.memory_space<vmem>>, vector<32x1xf32>
    %c0_3 = arith.constant 0 : index
    %c0_4 = arith.constant 0 : index
    %2 = vector.load %arg2[%c0_3, %c0_4] : memref<224x32xf32, #tpu.memory_space<vmem>>, vector<224x32xf32>
    %c0_5 = arith.constant 0 : index
    %c0_6 = arith.constant 0 : index
    %3 = vector.load %arg3[%c0_5, %c0_6] : memref<88x64xf32, #tpu.memory_space<vmem>>, vector<88x64xf32>
    %c0_7 = arith.constant 0 : index
    %c0_8 = arith.constant 0 : index
    %c0_9 = arith.constant 0 : index
    %4 = vector.load %arg4[%c0_7, %c0_8, %c0_9] : memref<4x64x192xf32, #tpu.memory_space<vmem>>, vector<4x64x192xf32>
    %c0_10 = arith.constant 0 : index
    %c0_11 = arith.constant 0 : index
    %c0_12 = arith.constant 0 : index
    %5 = vector.load %arg5[%c0_10, %c0_11, %c0_12] : memref<4x1x192xf32, #tpu.memory_space<vmem>>, vector<4x1x192xf32>
    %c0_13 = arith.constant 0 : index
    %c0_14 = arith.constant 0 : index
    %c0_15 = arith.constant 0 : index
    %6 = vector.load %arg6[%c0_13, %c0_14, %c0_15] : memref<4x192x64xf32, #tpu.memory_space<vmem>>, vector<4x192x64xf32>
    %c0_16 = arith.constant 0 : index
    %c0_17 = arith.constant 0 : index
    %c0_18 = arith.constant 0 : index
    %7 = vector.load %arg7[%c0_16, %c0_17, %c0_18] : memref<4x12x64xf32, #tpu.memory_space<vmem>>, vector<4x12x64xf32>
    %8 = vector.extract_strided_slice %3 {offsets = [0, 0], sizes = [80, 64], strides = [1, 1]} : vector<88x64xf32> to vector<80x64xf32>
    %9 = vector.extract_strided_slice %3 {offsets = [80, 0], sizes = [1, 64], strides = [1, 1]} : vector<88x64xf32> to vector<1x64xf32>
    %10 = vector.extract_strided_slice %3 {offsets = [81, 0], sizes = [1, 64], strides = [1, 1]} : vector<88x64xf32> to vector<1x64xf32>
    %11 = vector.extract_strided_slice %3 {offsets = [82, 0], sizes = [1, 64], strides = [1, 1]} : vector<88x64xf32> to vector<1x64xf32>
    %12 = vector.extract_strided_slice %3 {offsets = [83, 0], sizes = [1, 64], strides = [1, 1]} : vector<88x64xf32> to vector<1x64xf32>
    %13 = vector.extract_strided_slice %3 {offsets = [84, 0], sizes = [1, 64], strides = [1, 1]} : vector<88x64xf32> to vector<1x64xf32>
    %14 = vector.extract_strided_slice %3 {offsets = [85, 0], sizes = [1, 64], strides = [1, 1]} : vector<88x64xf32> to vector<1x64xf32>
    %cst = arith.constant dense<0.000000e+00> : vector<32x64xf32>
    %15 = tpu.matmul %0, %8, %cst {dimension_numbers = #tpu.dot_dimension_numbers<[1], [0], [0], [1], [0, 0, 1, 1], [], []>} : vector<32x80xf32>, vector<80x64xf32>, vector<32x64xf32> -> vector<32x64xf32>
    %16 = vector.broadcast %9 : vector<1x64xf32> to vector<32x64xf32>
    %17 = arith.addf %15, %16 : vector<32x64xf32>
    %18 = vector.broadcast %1 : vector<32x1xf32> to vector<32x64xf32>
    %19 = arith.mulf %17, %18 : vector<32x64xf32>
    %cst_19 = arith.constant dense<0.000000e+00> : vector<32xf32>
    %20 = vector.multi_reduction <add>, %19, %cst_19 [1] : vector<32x64xf32> to vector<32xf32>
    %21 = vector.shape_cast %20 : vector<32xf32> to vector<32x1xf32>
    %cst_20 = arith.constant 6.400000e+01 : f32
    %22 = vector.broadcast %cst_20 : f32 to vector<32x1xf32>
    %23 = arith.divf %21, %22 : vector<32x1xf32>
    %24 = vector.broadcast %23 : vector<32x1xf32> to vector<32x64xf32>
    %25 = arith.subf %19, %24 : vector<32x64xf32>
    %26 = arith.mulf %25, %25 : vector<32x64xf32>
    %cst_21 = arith.constant dense<0.000000e+00> : vector<32xf32>
    %27 = vector.multi_reduction <add>, %26, %cst_21 [1] : vector<32x64xf32> to vector<32xf32>
    %28 = vector.shape_cast %27 : vector<32xf32> to vector<32x1xf32>
    %cst_22 = arith.constant 6.400000e+01 : f32
    %29 = vector.broadcast %cst_22 : f32 to vector<32x1xf32>
    %30 = arith.divf %28, %29 : vector<32x1xf32>
    %31 = vector.broadcast %23 : vector<32x1xf32> to vector<32x64xf32>
    %32 = arith.subf %19, %31 : vector<32x64xf32>
    %cst_23 = arith.constant 9.99999974E-6 : f32
    %33 = vector.broadcast %cst_23 : f32 to vector<32x1xf32>
    %34 = arith.addf %30, %33 : vector<32x1xf32>
    %35 = math.rsqrt %34 : vector<32x1xf32>
    %36 = vector.broadcast %35 : vector<32x1xf32> to vector<32x64xf32>
    %37 = arith.mulf %32, %36 : vector<32x64xf32>
    %38 = vector.broadcast %10 : vector<1x64xf32> to vector<32x64xf32>
    %39 = arith.mulf %37, %38 : vector<32x64xf32>
    %40 = vector.broadcast %11 : vector<1x64xf32> to vector<32x64xf32>
    %41 = arith.addf %39, %40 : vector<32x64xf32>
    %42 = vector.broadcast %1 : vector<32x1xf32> to vector<32x64xf32>
    %43 = arith.mulf %41, %42 : vector<32x64xf32>
    %44 = vector.extract_strided_slice %7 {offsets = [0, 0, 0], sizes = [1, 12, 64], strides = [1, 1, 1]} : vector<4x12x64xf32> to vector<1x12x64xf32>
    %45 = vector.shape_cast %44 : vector<1x12x64xf32> to vector<12x64xf32>
    %cst_24 = arith.constant dense<0.000000e+00> : vector<224x64xf32>
    %46 = tpu.matmul %2, %43, %cst_24 {dimension_numbers = #tpu.dot_dimension_numbers<[1], [0], [0], [1], [0, 0, 1, 1], [], []>} : vector<224x32xf32>, vector<32x64xf32>, vector<224x64xf32> -> vector<224x64xf32>
    %47 = vector.extract_strided_slice %46 {offsets = [0, 0], sizes = [32, 64], strides = [1, 1]} : vector<224x64xf32> to vector<32x64xf32>
    %48 = vector.extract_strided_slice %45 {offsets = [0, 0], sizes = [1, 64], strides = [1, 1]} : vector<12x64xf32> to vector<1x64xf32>
    %49 = vector.broadcast %48 : vector<1x64xf32> to vector<32x64xf32>
    %50 = arith.mulf %47, %49 : vector<32x64xf32>
    %51 = vector.extract_strided_slice %46 {offsets = [32, 0], sizes = [32, 64], strides = [1, 1]} : vector<224x64xf32> to vector<32x64xf32>
    %52 = vector.extract_strided_slice %45 {offsets = [1, 0], sizes = [1, 64], strides = [1, 1]} : vector<12x64xf32> to vector<1x64xf32>
    %53 = vector.broadcast %52 : vector<1x64xf32> to vector<32x64xf32>
    %54 = arith.mulf %51, %53 : vector<32x64xf32>
    %55 = arith.addf %50, %54 : vector<32x64xf32>
    %56 = vector.extract_strided_slice %46 {offsets = [64, 0], sizes = [32, 64], strides = [1, 1]} : vector<224x64xf32> to vector<32x64xf32>
    %57 = vector.extract_strided_slice %45 {offsets = [2, 0], sizes = [1, 64], strides = [1, 1]} : vector<12x64xf32> to vector<1x64xf32>
    %58 = vector.broadcast %57 : vector<1x64xf32> to vector<32x64xf32>
    %59 = arith.mulf %56, %58 : vector<32x64xf32>
    %60 = arith.addf %55, %59 : vector<32x64xf32>
    %61 = vector.extract_strided_slice %46 {offsets = [96, 0], sizes = [32, 64], strides = [1, 1]} : vector<224x64xf32> to vector<32x64xf32>
    %62 = vector.extract_strided_slice %45 {offsets = [3, 0], sizes = [1, 64], strides = [1, 1]} : vector<12x64xf32> to vector<1x64xf32>
    %63 = vector.broadcast %62 : vector<1x64xf32> to vector<32x64xf32>
    %64 = arith.mulf %61, %63 : vector<32x64xf32>
    %65 = arith.addf %60, %64 : vector<32x64xf32>
    %66 = vector.extract_strided_slice %46 {offsets = [128, 0], sizes = [32, 64], strides = [1, 1]} : vector<224x64xf32> to vector<32x64xf32>
    %67 = vector.extract_strided_slice %45 {offsets = [4, 0], sizes = [1, 64], strides = [1, 1]} : vector<12x64xf32> to vector<1x64xf32>
    %68 = vector.broadcast %67 : vector<1x64xf32> to vector<32x64xf32>
    %69 = arith.mulf %66, %68 : vector<32x64xf32>
    %70 = arith.addf %65, %69 : vector<32x64xf32>
    %71 = vector.extract_strided_slice %46 {offsets = [160, 0], sizes = [32, 64], strides = [1, 1]} : vector<224x64xf32> to vector<32x64xf32>
    %72 = vector.extract_strided_slice %45 {offsets = [5, 0], sizes = [1, 64], strides = [1, 1]} : vector<12x64xf32> to vector<1x64xf32>
    %73 = vector.broadcast %72 : vector<1x64xf32> to vector<32x64xf32>
    %74 = arith.mulf %71, %73 : vector<32x64xf32>
    %75 = arith.addf %70, %74 : vector<32x64xf32>
    %76 = vector.extract_strided_slice %46 {offsets = [192, 0], sizes = [32, 64], strides = [1, 1]} : vector<224x64xf32> to vector<32x64xf32>
    %77 = vector.extract_strided_slice %45 {offsets = [6, 0], sizes = [1, 64], strides = [1, 1]} : vector<12x64xf32> to vector<1x64xf32>
    %78 = vector.broadcast %77 : vector<1x64xf32> to vector<32x64xf32>
    %79 = arith.mulf %76, %78 : vector<32x64xf32>
    %80 = arith.addf %75, %79 : vector<32x64xf32>
    %81 = vector.extract_strided_slice %45 {offsets = [7, 0], sizes = [1, 64], strides = [1, 1]} : vector<12x64xf32> to vector<1x64xf32>
    %82 = vector.broadcast %81 : vector<1x64xf32> to vector<32x64xf32>
    %83 = arith.addf %80, %82 : vector<32x64xf32>
    %84 = vector.extract_strided_slice %45 {offsets = [8, 0], sizes = [1, 64], strides = [1, 1]} : vector<12x64xf32> to vector<1x64xf32>
    %85 = vector.extract_strided_slice %45 {offsets = [9, 0], sizes = [1, 64], strides = [1, 1]} : vector<12x64xf32> to vector<1x64xf32>
    %cst_25 = arith.constant dense<0.000000e+00> : vector<32xf32>
    %86 = vector.multi_reduction <add>, %83, %cst_25 [1] : vector<32x64xf32> to vector<32xf32>
    %87 = vector.shape_cast %86 : vector<32xf32> to vector<32x1xf32>
    %cst_26 = arith.constant 6.400000e+01 : f32
    %88 = vector.broadcast %cst_26 : f32 to vector<32x1xf32>
    %89 = arith.divf %87, %88 : vector<32x1xf32>
    %90 = vector.broadcast %89 : vector<32x1xf32> to vector<32x64xf32>
    %91 = arith.subf %83, %90 : vector<32x64xf32>
    %92 = arith.mulf %91, %91 : vector<32x64xf32>
    %cst_27 = arith.constant dense<0.000000e+00> : vector<32xf32>
    %93 = vector.multi_reduction <add>, %92, %cst_27 [1] : vector<32x64xf32> to vector<32xf32>
    %94 = vector.shape_cast %93 : vector<32xf32> to vector<32x1xf32>
    %cst_28 = arith.constant 6.400000e+01 : f32
    %95 = vector.broadcast %cst_28 : f32 to vector<32x1xf32>
    %96 = arith.divf %94, %95 : vector<32x1xf32>
    %97 = vector.broadcast %89 : vector<32x1xf32> to vector<32x64xf32>
    %98 = arith.subf %83, %97 : vector<32x64xf32>
    %cst_29 = arith.constant 9.99999974E-6 : f32
    %99 = vector.broadcast %cst_29 : f32 to vector<32x1xf32>
    %100 = arith.addf %96, %99 : vector<32x1xf32>
    %101 = math.rsqrt %100 : vector<32x1xf32>
    %102 = vector.broadcast %101 : vector<32x1xf32> to vector<32x64xf32>
    %103 = arith.mulf %98, %102 : vector<32x64xf32>
    %104 = vector.broadcast %84 : vector<1x64xf32> to vector<32x64xf32>
    %105 = arith.mulf %103, %104 : vector<32x64xf32>
    %106 = vector.broadcast %85 : vector<1x64xf32> to vector<32x64xf32>
    %107 = arith.addf %105, %106 : vector<32x64xf32>
    %108 = vector.extract_strided_slice %4 {offsets = [0, 0, 0], sizes = [1, 64, 192], strides = [1, 1, 1]} : vector<4x64x192xf32> to vector<1x64x192xf32>
    %109 = vector.shape_cast %108 : vector<1x64x192xf32> to vector<64x192xf32>
    %cst_30 = arith.constant dense<0.000000e+00> : vector<32x192xf32>
    %110 = tpu.matmul %107, %109, %cst_30 {dimension_numbers = #tpu.dot_dimension_numbers<[1], [0], [0], [1], [0, 0, 1, 1], [], []>} : vector<32x64xf32>, vector<64x192xf32>, vector<32x192xf32> -> vector<32x192xf32>
    %111 = vector.extract_strided_slice %5 {offsets = [0, 0, 0], sizes = [1, 1, 192], strides = [1, 1, 1]} : vector<4x1x192xf32> to vector<1x1x192xf32>
    %112 = vector.shape_cast %111 : vector<1x1x192xf32> to vector<1x192xf32>
    %113 = vector.broadcast %112 : vector<1x192xf32> to vector<32x192xf32>
    %114 = arith.addf %110, %113 : vector<32x192xf32>
    %cst_31 = arith.constant 5.000000e-01 : f32
    %115 = vector.broadcast %cst_31 : f32 to vector<32x192xf32>
    %116 = arith.mulf %115, %114 : vector<32x192xf32>
    %cst_32 = arith.constant 4.471500e-02 : f32
    %117 = vector.broadcast %cst_32 : f32 to vector<32x192xf32>
    %118 = arith.mulf %117, %114 : vector<32x192xf32>
    %119 = arith.mulf %118, %114 : vector<32x192xf32>
    %120 = arith.mulf %119, %114 : vector<32x192xf32>
    %121 = arith.addf %114, %120 : vector<32x192xf32>
    %cst_33 = arith.constant 0.797884583 : f32
    %122 = vector.broadcast %cst_33 : f32 to vector<32x192xf32>
    %123 = arith.mulf %122, %121 : vector<32x192xf32>
    %124 = math.tanh %123 : vector<32x192xf32>
    %cst_34 = arith.constant 1.000000e+00 : f32
    %125 = vector.broadcast %cst_34 : f32 to vector<32x192xf32>
    %126 = arith.addf %125, %124 : vector<32x192xf32>
    %127 = arith.mulf %116, %126 : vector<32x192xf32>
    %128 = vector.extract_strided_slice %6 {offsets = [0, 0, 0], sizes = [1, 192, 64], strides = [1, 1, 1]} : vector<4x192x64xf32> to vector<1x192x64xf32>
    %129 = vector.shape_cast %128 : vector<1x192x64xf32> to vector<192x64xf32>
    %cst_35 = arith.constant dense<0.000000e+00> : vector<32x64xf32>
    %130 = tpu.matmul %127, %129, %cst_35 {dimension_numbers = #tpu.dot_dimension_numbers<[1], [0], [0], [1], [0, 0, 1, 1], [], []>} : vector<32x192xf32>, vector<192x64xf32>, vector<32x64xf32> -> vector<32x64xf32>
    %131 = vector.extract_strided_slice %45 {offsets = [10, 0], sizes = [1, 64], strides = [1, 1]} : vector<12x64xf32> to vector<1x64xf32>
    %132 = vector.broadcast %131 : vector<1x64xf32> to vector<32x64xf32>
    %133 = arith.addf %130, %132 : vector<32x64xf32>
    %134 = vector.extract_strided_slice %45 {offsets = [11, 0], sizes = [1, 64], strides = [1, 1]} : vector<12x64xf32> to vector<1x64xf32>
    %135 = vector.broadcast %134 : vector<1x64xf32> to vector<32x64xf32>
    %136 = arith.mulf %133, %135 : vector<32x64xf32>
    %137 = arith.addf %43, %136 : vector<32x64xf32>
    %138 = vector.broadcast %1 : vector<32x1xf32> to vector<32x64xf32>
    %139 = arith.mulf %137, %138 : vector<32x64xf32>
    %140 = vector.extract_strided_slice %7 {offsets = [1, 0, 0], sizes = [1, 12, 64], strides = [1, 1, 1]} : vector<4x12x64xf32> to vector<1x12x64xf32>
    %141 = vector.shape_cast %140 : vector<1x12x64xf32> to vector<12x64xf32>
    %cst_36 = arith.constant dense<0.000000e+00> : vector<224x64xf32>
    %142 = tpu.matmul %2, %139, %cst_36 {dimension_numbers = #tpu.dot_dimension_numbers<[1], [0], [0], [1], [0, 0, 1, 1], [], []>} : vector<224x32xf32>, vector<32x64xf32>, vector<224x64xf32> -> vector<224x64xf32>
    %143 = vector.extract_strided_slice %142 {offsets = [0, 0], sizes = [32, 64], strides = [1, 1]} : vector<224x64xf32> to vector<32x64xf32>
    %144 = vector.extract_strided_slice %141 {offsets = [0, 0], sizes = [1, 64], strides = [1, 1]} : vector<12x64xf32> to vector<1x64xf32>
    %145 = vector.broadcast %144 : vector<1x64xf32> to vector<32x64xf32>
    %146 = arith.mulf %143, %145 : vector<32x64xf32>
    %147 = vector.extract_strided_slice %142 {offsets = [32, 0], sizes = [32, 64], strides = [1, 1]} : vector<224x64xf32> to vector<32x64xf32>
    %148 = vector.extract_strided_slice %141 {offsets = [1, 0], sizes = [1, 64], strides = [1, 1]} : vector<12x64xf32> to vector<1x64xf32>
    %149 = vector.broadcast %148 : vector<1x64xf32> to vector<32x64xf32>
    %150 = arith.mulf %147, %149 : vector<32x64xf32>
    %151 = arith.addf %146, %150 : vector<32x64xf32>
    %152 = vector.extract_strided_slice %142 {offsets = [64, 0], sizes = [32, 64], strides = [1, 1]} : vector<224x64xf32> to vector<32x64xf32>
    %153 = vector.extract_strided_slice %141 {offsets = [2, 0], sizes = [1, 64], strides = [1, 1]} : vector<12x64xf32> to vector<1x64xf32>
    %154 = vector.broadcast %153 : vector<1x64xf32> to vector<32x64xf32>
    %155 = arith.mulf %152, %154 : vector<32x64xf32>
    %156 = arith.addf %151, %155 : vector<32x64xf32>
    %157 = vector.extract_strided_slice %142 {offsets = [96, 0], sizes = [32, 64], strides = [1, 1]} : vector<224x64xf32> to vector<32x64xf32>
    %158 = vector.extract_strided_slice %141 {offsets = [3, 0], sizes = [1, 64], strides = [1, 1]} : vector<12x64xf32> to vector<1x64xf32>
    %159 = vector.broadcast %158 : vector<1x64xf32> to vector<32x64xf32>
    %160 = arith.mulf %157, %159 : vector<32x64xf32>
    %161 = arith.addf %156, %160 : vector<32x64xf32>
    %162 = vector.extract_strided_slice %142 {offsets = [128, 0], sizes = [32, 64], strides = [1, 1]} : vector<224x64xf32> to vector<32x64xf32>
    %163 = vector.extract_strided_slice %141 {offsets = [4, 0], sizes = [1, 64], strides = [1, 1]} : vector<12x64xf32> to vector<1x64xf32>
    %164 = vector.broadcast %163 : vector<1x64xf32> to vector<32x64xf32>
    %165 = arith.mulf %162, %164 : vector<32x64xf32>
    %166 = arith.addf %161, %165 : vector<32x64xf32>
    %167 = vector.extract_strided_slice %142 {offsets = [160, 0], sizes = [32, 64], strides = [1, 1]} : vector<224x64xf32> to vector<32x64xf32>
    %168 = vector.extract_strided_slice %141 {offsets = [5, 0], sizes = [1, 64], strides = [1, 1]} : vector<12x64xf32> to vector<1x64xf32>
    %169 = vector.broadcast %168 : vector<1x64xf32> to vector<32x64xf32>
    %170 = arith.mulf %167, %169 : vector<32x64xf32>
    %171 = arith.addf %166, %170 : vector<32x64xf32>
    %172 = vector.extract_strided_slice %142 {offsets = [192, 0], sizes = [32, 64], strides = [1, 1]} : vector<224x64xf32> to vector<32x64xf32>
    %173 = vector.extract_strided_slice %141 {offsets = [6, 0], sizes = [1, 64], strides = [1, 1]} : vector<12x64xf32> to vector<1x64xf32>
    %174 = vector.broadcast %173 : vector<1x64xf32> to vector<32x64xf32>
    %175 = arith.mulf %172, %174 : vector<32x64xf32>
    %176 = arith.addf %171, %175 : vector<32x64xf32>
    %177 = vector.extract_strided_slice %141 {offsets = [7, 0], sizes = [1, 64], strides = [1, 1]} : vector<12x64xf32> to vector<1x64xf32>
    %178 = vector.broadcast %177 : vector<1x64xf32> to vector<32x64xf32>
    %179 = arith.addf %176, %178 : vector<32x64xf32>
    %180 = vector.extract_strided_slice %141 {offsets = [8, 0], sizes = [1, 64], strides = [1, 1]} : vector<12x64xf32> to vector<1x64xf32>
    %181 = vector.extract_strided_slice %141 {offsets = [9, 0], sizes = [1, 64], strides = [1, 1]} : vector<12x64xf32> to vector<1x64xf32>
    %cst_37 = arith.constant dense<0.000000e+00> : vector<32xf32>
    %182 = vector.multi_reduction <add>, %179, %cst_37 [1] : vector<32x64xf32> to vector<32xf32>
    %183 = vector.shape_cast %182 : vector<32xf32> to vector<32x1xf32>
    %cst_38 = arith.constant 6.400000e+01 : f32
    %184 = vector.broadcast %cst_38 : f32 to vector<32x1xf32>
    %185 = arith.divf %183, %184 : vector<32x1xf32>
    %186 = vector.broadcast %185 : vector<32x1xf32> to vector<32x64xf32>
    %187 = arith.subf %179, %186 : vector<32x64xf32>
    %188 = arith.mulf %187, %187 : vector<32x64xf32>
    %cst_39 = arith.constant dense<0.000000e+00> : vector<32xf32>
    %189 = vector.multi_reduction <add>, %188, %cst_39 [1] : vector<32x64xf32> to vector<32xf32>
    %190 = vector.shape_cast %189 : vector<32xf32> to vector<32x1xf32>
    %cst_40 = arith.constant 6.400000e+01 : f32
    %191 = vector.broadcast %cst_40 : f32 to vector<32x1xf32>
    %192 = arith.divf %190, %191 : vector<32x1xf32>
    %193 = vector.broadcast %185 : vector<32x1xf32> to vector<32x64xf32>
    %194 = arith.subf %179, %193 : vector<32x64xf32>
    %cst_41 = arith.constant 9.99999974E-6 : f32
    %195 = vector.broadcast %cst_41 : f32 to vector<32x1xf32>
    %196 = arith.addf %192, %195 : vector<32x1xf32>
    %197 = math.rsqrt %196 : vector<32x1xf32>
    %198 = vector.broadcast %197 : vector<32x1xf32> to vector<32x64xf32>
    %199 = arith.mulf %194, %198 : vector<32x64xf32>
    %200 = vector.broadcast %180 : vector<1x64xf32> to vector<32x64xf32>
    %201 = arith.mulf %199, %200 : vector<32x64xf32>
    %202 = vector.broadcast %181 : vector<1x64xf32> to vector<32x64xf32>
    %203 = arith.addf %201, %202 : vector<32x64xf32>
    %204 = vector.extract_strided_slice %4 {offsets = [1, 0, 0], sizes = [1, 64, 192], strides = [1, 1, 1]} : vector<4x64x192xf32> to vector<1x64x192xf32>
    %205 = vector.shape_cast %204 : vector<1x64x192xf32> to vector<64x192xf32>
    %cst_42 = arith.constant dense<0.000000e+00> : vector<32x192xf32>
    %206 = tpu.matmul %203, %205, %cst_42 {dimension_numbers = #tpu.dot_dimension_numbers<[1], [0], [0], [1], [0, 0, 1, 1], [], []>} : vector<32x64xf32>, vector<64x192xf32>, vector<32x192xf32> -> vector<32x192xf32>
    %207 = vector.extract_strided_slice %5 {offsets = [1, 0, 0], sizes = [1, 1, 192], strides = [1, 1, 1]} : vector<4x1x192xf32> to vector<1x1x192xf32>
    %208 = vector.shape_cast %207 : vector<1x1x192xf32> to vector<1x192xf32>
    %209 = vector.broadcast %208 : vector<1x192xf32> to vector<32x192xf32>
    %210 = arith.addf %206, %209 : vector<32x192xf32>
    %cst_43 = arith.constant 5.000000e-01 : f32
    %211 = vector.broadcast %cst_43 : f32 to vector<32x192xf32>
    %212 = arith.mulf %211, %210 : vector<32x192xf32>
    %cst_44 = arith.constant 4.471500e-02 : f32
    %213 = vector.broadcast %cst_44 : f32 to vector<32x192xf32>
    %214 = arith.mulf %213, %210 : vector<32x192xf32>
    %215 = arith.mulf %214, %210 : vector<32x192xf32>
    %216 = arith.mulf %215, %210 : vector<32x192xf32>
    %217 = arith.addf %210, %216 : vector<32x192xf32>
    %cst_45 = arith.constant 0.797884583 : f32
    %218 = vector.broadcast %cst_45 : f32 to vector<32x192xf32>
    %219 = arith.mulf %218, %217 : vector<32x192xf32>
    %220 = math.tanh %219 : vector<32x192xf32>
    %cst_46 = arith.constant 1.000000e+00 : f32
    %221 = vector.broadcast %cst_46 : f32 to vector<32x192xf32>
    %222 = arith.addf %221, %220 : vector<32x192xf32>
    %223 = arith.mulf %212, %222 : vector<32x192xf32>
    %224 = vector.extract_strided_slice %6 {offsets = [1, 0, 0], sizes = [1, 192, 64], strides = [1, 1, 1]} : vector<4x192x64xf32> to vector<1x192x64xf32>
    %225 = vector.shape_cast %224 : vector<1x192x64xf32> to vector<192x64xf32>
    %cst_47 = arith.constant dense<0.000000e+00> : vector<32x64xf32>
    %226 = tpu.matmul %223, %225, %cst_47 {dimension_numbers = #tpu.dot_dimension_numbers<[1], [0], [0], [1], [0, 0, 1, 1], [], []>} : vector<32x192xf32>, vector<192x64xf32>, vector<32x64xf32> -> vector<32x64xf32>
    %227 = vector.extract_strided_slice %141 {offsets = [10, 0], sizes = [1, 64], strides = [1, 1]} : vector<12x64xf32> to vector<1x64xf32>
    %228 = vector.broadcast %227 : vector<1x64xf32> to vector<32x64xf32>
    %229 = arith.addf %226, %228 : vector<32x64xf32>
    %230 = vector.extract_strided_slice %141 {offsets = [11, 0], sizes = [1, 64], strides = [1, 1]} : vector<12x64xf32> to vector<1x64xf32>
    %231 = vector.broadcast %230 : vector<1x64xf32> to vector<32x64xf32>
    %232 = arith.mulf %229, %231 : vector<32x64xf32>
    %233 = arith.addf %139, %232 : vector<32x64xf32>
    %234 = vector.broadcast %1 : vector<32x1xf32> to vector<32x64xf32>
    %235 = arith.mulf %233, %234 : vector<32x64xf32>
    %236 = vector.extract_strided_slice %7 {offsets = [2, 0, 0], sizes = [1, 12, 64], strides = [1, 1, 1]} : vector<4x12x64xf32> to vector<1x12x64xf32>
    %237 = vector.shape_cast %236 : vector<1x12x64xf32> to vector<12x64xf32>
    %cst_48 = arith.constant dense<0.000000e+00> : vector<224x64xf32>
    %238 = tpu.matmul %2, %235, %cst_48 {dimension_numbers = #tpu.dot_dimension_numbers<[1], [0], [0], [1], [0, 0, 1, 1], [], []>} : vector<224x32xf32>, vector<32x64xf32>, vector<224x64xf32> -> vector<224x64xf32>
    %239 = vector.extract_strided_slice %238 {offsets = [0, 0], sizes = [32, 64], strides = [1, 1]} : vector<224x64xf32> to vector<32x64xf32>
    %240 = vector.extract_strided_slice %237 {offsets = [0, 0], sizes = [1, 64], strides = [1, 1]} : vector<12x64xf32> to vector<1x64xf32>
    %241 = vector.broadcast %240 : vector<1x64xf32> to vector<32x64xf32>
    %242 = arith.mulf %239, %241 : vector<32x64xf32>
    %243 = vector.extract_strided_slice %238 {offsets = [32, 0], sizes = [32, 64], strides = [1, 1]} : vector<224x64xf32> to vector<32x64xf32>
    %244 = vector.extract_strided_slice %237 {offsets = [1, 0], sizes = [1, 64], strides = [1, 1]} : vector<12x64xf32> to vector<1x64xf32>
    %245 = vector.broadcast %244 : vector<1x64xf32> to vector<32x64xf32>
    %246 = arith.mulf %243, %245 : vector<32x64xf32>
    %247 = arith.addf %242, %246 : vector<32x64xf32>
    %248 = vector.extract_strided_slice %238 {offsets = [64, 0], sizes = [32, 64], strides = [1, 1]} : vector<224x64xf32> to vector<32x64xf32>
    %249 = vector.extract_strided_slice %237 {offsets = [2, 0], sizes = [1, 64], strides = [1, 1]} : vector<12x64xf32> to vector<1x64xf32>
    %250 = vector.broadcast %249 : vector<1x64xf32> to vector<32x64xf32>
    %251 = arith.mulf %248, %250 : vector<32x64xf32>
    %252 = arith.addf %247, %251 : vector<32x64xf32>
    %253 = vector.extract_strided_slice %238 {offsets = [96, 0], sizes = [32, 64], strides = [1, 1]} : vector<224x64xf32> to vector<32x64xf32>
    %254 = vector.extract_strided_slice %237 {offsets = [3, 0], sizes = [1, 64], strides = [1, 1]} : vector<12x64xf32> to vector<1x64xf32>
    %255 = vector.broadcast %254 : vector<1x64xf32> to vector<32x64xf32>
    %256 = arith.mulf %253, %255 : vector<32x64xf32>
    %257 = arith.addf %252, %256 : vector<32x64xf32>
    %258 = vector.extract_strided_slice %238 {offsets = [128, 0], sizes = [32, 64], strides = [1, 1]} : vector<224x64xf32> to vector<32x64xf32>
    %259 = vector.extract_strided_slice %237 {offsets = [4, 0], sizes = [1, 64], strides = [1, 1]} : vector<12x64xf32> to vector<1x64xf32>
    %260 = vector.broadcast %259 : vector<1x64xf32> to vector<32x64xf32>
    %261 = arith.mulf %258, %260 : vector<32x64xf32>
    %262 = arith.addf %257, %261 : vector<32x64xf32>
    %263 = vector.extract_strided_slice %238 {offsets = [160, 0], sizes = [32, 64], strides = [1, 1]} : vector<224x64xf32> to vector<32x64xf32>
    %264 = vector.extract_strided_slice %237 {offsets = [5, 0], sizes = [1, 64], strides = [1, 1]} : vector<12x64xf32> to vector<1x64xf32>
    %265 = vector.broadcast %264 : vector<1x64xf32> to vector<32x64xf32>
    %266 = arith.mulf %263, %265 : vector<32x64xf32>
    %267 = arith.addf %262, %266 : vector<32x64xf32>
    %268 = vector.extract_strided_slice %238 {offsets = [192, 0], sizes = [32, 64], strides = [1, 1]} : vector<224x64xf32> to vector<32x64xf32>
    %269 = vector.extract_strided_slice %237 {offsets = [6, 0], sizes = [1, 64], strides = [1, 1]} : vector<12x64xf32> to vector<1x64xf32>
    %270 = vector.broadcast %269 : vector<1x64xf32> to vector<32x64xf32>
    %271 = arith.mulf %268, %270 : vector<32x64xf32>
    %272 = arith.addf %267, %271 : vector<32x64xf32>
    %273 = vector.extract_strided_slice %237 {offsets = [7, 0], sizes = [1, 64], strides = [1, 1]} : vector<12x64xf32> to vector<1x64xf32>
    %274 = vector.broadcast %273 : vector<1x64xf32> to vector<32x64xf32>
    %275 = arith.addf %272, %274 : vector<32x64xf32>
    %276 = vector.extract_strided_slice %237 {offsets = [8, 0], sizes = [1, 64], strides = [1, 1]} : vector<12x64xf32> to vector<1x64xf32>
    %277 = vector.extract_strided_slice %237 {offsets = [9, 0], sizes = [1, 64], strides = [1, 1]} : vector<12x64xf32> to vector<1x64xf32>
    %cst_49 = arith.constant dense<0.000000e+00> : vector<32xf32>
    %278 = vector.multi_reduction <add>, %275, %cst_49 [1] : vector<32x64xf32> to vector<32xf32>
    %279 = vector.shape_cast %278 : vector<32xf32> to vector<32x1xf32>
    %cst_50 = arith.constant 6.400000e+01 : f32
    %280 = vector.broadcast %cst_50 : f32 to vector<32x1xf32>
    %281 = arith.divf %279, %280 : vector<32x1xf32>
    %282 = vector.broadcast %281 : vector<32x1xf32> to vector<32x64xf32>
    %283 = arith.subf %275, %282 : vector<32x64xf32>
    %284 = arith.mulf %283, %283 : vector<32x64xf32>
    %cst_51 = arith.constant dense<0.000000e+00> : vector<32xf32>
    %285 = vector.multi_reduction <add>, %284, %cst_51 [1] : vector<32x64xf32> to vector<32xf32>
    %286 = vector.shape_cast %285 : vector<32xf32> to vector<32x1xf32>
    %cst_52 = arith.constant 6.400000e+01 : f32
    %287 = vector.broadcast %cst_52 : f32 to vector<32x1xf32>
    %288 = arith.divf %286, %287 : vector<32x1xf32>
    %289 = vector.broadcast %281 : vector<32x1xf32> to vector<32x64xf32>
    %290 = arith.subf %275, %289 : vector<32x64xf32>
    %cst_53 = arith.constant 9.99999974E-6 : f32
    %291 = vector.broadcast %cst_53 : f32 to vector<32x1xf32>
    %292 = arith.addf %288, %291 : vector<32x1xf32>
    %293 = math.rsqrt %292 : vector<32x1xf32>
    %294 = vector.broadcast %293 : vector<32x1xf32> to vector<32x64xf32>
    %295 = arith.mulf %290, %294 : vector<32x64xf32>
    %296 = vector.broadcast %276 : vector<1x64xf32> to vector<32x64xf32>
    %297 = arith.mulf %295, %296 : vector<32x64xf32>
    %298 = vector.broadcast %277 : vector<1x64xf32> to vector<32x64xf32>
    %299 = arith.addf %297, %298 : vector<32x64xf32>
    %300 = vector.extract_strided_slice %4 {offsets = [2, 0, 0], sizes = [1, 64, 192], strides = [1, 1, 1]} : vector<4x64x192xf32> to vector<1x64x192xf32>
    %301 = vector.shape_cast %300 : vector<1x64x192xf32> to vector<64x192xf32>
    %cst_54 = arith.constant dense<0.000000e+00> : vector<32x192xf32>
    %302 = tpu.matmul %299, %301, %cst_54 {dimension_numbers = #tpu.dot_dimension_numbers<[1], [0], [0], [1], [0, 0, 1, 1], [], []>} : vector<32x64xf32>, vector<64x192xf32>, vector<32x192xf32> -> vector<32x192xf32>
    %303 = vector.extract_strided_slice %5 {offsets = [2, 0, 0], sizes = [1, 1, 192], strides = [1, 1, 1]} : vector<4x1x192xf32> to vector<1x1x192xf32>
    %304 = vector.shape_cast %303 : vector<1x1x192xf32> to vector<1x192xf32>
    %305 = vector.broadcast %304 : vector<1x192xf32> to vector<32x192xf32>
    %306 = arith.addf %302, %305 : vector<32x192xf32>
    %cst_55 = arith.constant 5.000000e-01 : f32
    %307 = vector.broadcast %cst_55 : f32 to vector<32x192xf32>
    %308 = arith.mulf %307, %306 : vector<32x192xf32>
    %cst_56 = arith.constant 4.471500e-02 : f32
    %309 = vector.broadcast %cst_56 : f32 to vector<32x192xf32>
    %310 = arith.mulf %309, %306 : vector<32x192xf32>
    %311 = arith.mulf %310, %306 : vector<32x192xf32>
    %312 = arith.mulf %311, %306 : vector<32x192xf32>
    %313 = arith.addf %306, %312 : vector<32x192xf32>
    %cst_57 = arith.constant 0.797884583 : f32
    %314 = vector.broadcast %cst_57 : f32 to vector<32x192xf32>
    %315 = arith.mulf %314, %313 : vector<32x192xf32>
    %316 = math.tanh %315 : vector<32x192xf32>
    %cst_58 = arith.constant 1.000000e+00 : f32
    %317 = vector.broadcast %cst_58 : f32 to vector<32x192xf32>
    %318 = arith.addf %317, %316 : vector<32x192xf32>
    %319 = arith.mulf %308, %318 : vector<32x192xf32>
    %320 = vector.extract_strided_slice %6 {offsets = [2, 0, 0], sizes = [1, 192, 64], strides = [1, 1, 1]} : vector<4x192x64xf32> to vector<1x192x64xf32>
    %321 = vector.shape_cast %320 : vector<1x192x64xf32> to vector<192x64xf32>
    %cst_59 = arith.constant dense<0.000000e+00> : vector<32x64xf32>
    %322 = tpu.matmul %319, %321, %cst_59 {dimension_numbers = #tpu.dot_dimension_numbers<[1], [0], [0], [1], [0, 0, 1, 1], [], []>} : vector<32x192xf32>, vector<192x64xf32>, vector<32x64xf32> -> vector<32x64xf32>
    %323 = vector.extract_strided_slice %237 {offsets = [10, 0], sizes = [1, 64], strides = [1, 1]} : vector<12x64xf32> to vector<1x64xf32>
    %324 = vector.broadcast %323 : vector<1x64xf32> to vector<32x64xf32>
    %325 = arith.addf %322, %324 : vector<32x64xf32>
    %326 = vector.extract_strided_slice %237 {offsets = [11, 0], sizes = [1, 64], strides = [1, 1]} : vector<12x64xf32> to vector<1x64xf32>
    %327 = vector.broadcast %326 : vector<1x64xf32> to vector<32x64xf32>
    %328 = arith.mulf %325, %327 : vector<32x64xf32>
    %329 = arith.addf %235, %328 : vector<32x64xf32>
    %330 = vector.broadcast %1 : vector<32x1xf32> to vector<32x64xf32>
    %331 = arith.mulf %329, %330 : vector<32x64xf32>
    %332 = vector.extract_strided_slice %7 {offsets = [3, 0, 0], sizes = [1, 12, 64], strides = [1, 1, 1]} : vector<4x12x64xf32> to vector<1x12x64xf32>
    %333 = vector.shape_cast %332 : vector<1x12x64xf32> to vector<12x64xf32>
    %cst_60 = arith.constant dense<0.000000e+00> : vector<224x64xf32>
    %334 = tpu.matmul %2, %331, %cst_60 {dimension_numbers = #tpu.dot_dimension_numbers<[1], [0], [0], [1], [0, 0, 1, 1], [], []>} : vector<224x32xf32>, vector<32x64xf32>, vector<224x64xf32> -> vector<224x64xf32>
    %335 = vector.extract_strided_slice %334 {offsets = [0, 0], sizes = [32, 64], strides = [1, 1]} : vector<224x64xf32> to vector<32x64xf32>
    %336 = vector.extract_strided_slice %333 {offsets = [0, 0], sizes = [1, 64], strides = [1, 1]} : vector<12x64xf32> to vector<1x64xf32>
    %337 = vector.broadcast %336 : vector<1x64xf32> to vector<32x64xf32>
    %338 = arith.mulf %335, %337 : vector<32x64xf32>
    %339 = vector.extract_strided_slice %334 {offsets = [32, 0], sizes = [32, 64], strides = [1, 1]} : vector<224x64xf32> to vector<32x64xf32>
    %340 = vector.extract_strided_slice %333 {offsets = [1, 0], sizes = [1, 64], strides = [1, 1]} : vector<12x64xf32> to vector<1x64xf32>
    %341 = vector.broadcast %340 : vector<1x64xf32> to vector<32x64xf32>
    %342 = arith.mulf %339, %341 : vector<32x64xf32>
    %343 = arith.addf %338, %342 : vector<32x64xf32>
    %344 = vector.extract_strided_slice %334 {offsets = [64, 0], sizes = [32, 64], strides = [1, 1]} : vector<224x64xf32> to vector<32x64xf32>
    %345 = vector.extract_strided_slice %333 {offsets = [2, 0], sizes = [1, 64], strides = [1, 1]} : vector<12x64xf32> to vector<1x64xf32>
    %346 = vector.broadcast %345 : vector<1x64xf32> to vector<32x64xf32>
    %347 = arith.mulf %344, %346 : vector<32x64xf32>
    %348 = arith.addf %343, %347 : vector<32x64xf32>
    %349 = vector.extract_strided_slice %334 {offsets = [96, 0], sizes = [32, 64], strides = [1, 1]} : vector<224x64xf32> to vector<32x64xf32>
    %350 = vector.extract_strided_slice %333 {offsets = [3, 0], sizes = [1, 64], strides = [1, 1]} : vector<12x64xf32> to vector<1x64xf32>
    %351 = vector.broadcast %350 : vector<1x64xf32> to vector<32x64xf32>
    %352 = arith.mulf %349, %351 : vector<32x64xf32>
    %353 = arith.addf %348, %352 : vector<32x64xf32>
    %354 = vector.extract_strided_slice %334 {offsets = [128, 0], sizes = [32, 64], strides = [1, 1]} : vector<224x64xf32> to vector<32x64xf32>
    %355 = vector.extract_strided_slice %333 {offsets = [4, 0], sizes = [1, 64], strides = [1, 1]} : vector<12x64xf32> to vector<1x64xf32>
    %356 = vector.broadcast %355 : vector<1x64xf32> to vector<32x64xf32>
    %357 = arith.mulf %354, %356 : vector<32x64xf32>
    %358 = arith.addf %353, %357 : vector<32x64xf32>
    %359 = vector.extract_strided_slice %334 {offsets = [160, 0], sizes = [32, 64], strides = [1, 1]} : vector<224x64xf32> to vector<32x64xf32>
    %360 = vector.extract_strided_slice %333 {offsets = [5, 0], sizes = [1, 64], strides = [1, 1]} : vector<12x64xf32> to vector<1x64xf32>
    %361 = vector.broadcast %360 : vector<1x64xf32> to vector<32x64xf32>
    %362 = arith.mulf %359, %361 : vector<32x64xf32>
    %363 = arith.addf %358, %362 : vector<32x64xf32>
    %364 = vector.extract_strided_slice %334 {offsets = [192, 0], sizes = [32, 64], strides = [1, 1]} : vector<224x64xf32> to vector<32x64xf32>
    %365 = vector.extract_strided_slice %333 {offsets = [6, 0], sizes = [1, 64], strides = [1, 1]} : vector<12x64xf32> to vector<1x64xf32>
    %366 = vector.broadcast %365 : vector<1x64xf32> to vector<32x64xf32>
    %367 = arith.mulf %364, %366 : vector<32x64xf32>
    %368 = arith.addf %363, %367 : vector<32x64xf32>
    %369 = vector.extract_strided_slice %333 {offsets = [7, 0], sizes = [1, 64], strides = [1, 1]} : vector<12x64xf32> to vector<1x64xf32>
    %370 = vector.broadcast %369 : vector<1x64xf32> to vector<32x64xf32>
    %371 = arith.addf %368, %370 : vector<32x64xf32>
    %372 = vector.extract_strided_slice %333 {offsets = [8, 0], sizes = [1, 64], strides = [1, 1]} : vector<12x64xf32> to vector<1x64xf32>
    %373 = vector.extract_strided_slice %333 {offsets = [9, 0], sizes = [1, 64], strides = [1, 1]} : vector<12x64xf32> to vector<1x64xf32>
    %cst_61 = arith.constant dense<0.000000e+00> : vector<32xf32>
    %374 = vector.multi_reduction <add>, %371, %cst_61 [1] : vector<32x64xf32> to vector<32xf32>
    %375 = vector.shape_cast %374 : vector<32xf32> to vector<32x1xf32>
    %cst_62 = arith.constant 6.400000e+01 : f32
    %376 = vector.broadcast %cst_62 : f32 to vector<32x1xf32>
    %377 = arith.divf %375, %376 : vector<32x1xf32>
    %378 = vector.broadcast %377 : vector<32x1xf32> to vector<32x64xf32>
    %379 = arith.subf %371, %378 : vector<32x64xf32>
    %380 = arith.mulf %379, %379 : vector<32x64xf32>
    %cst_63 = arith.constant dense<0.000000e+00> : vector<32xf32>
    %381 = vector.multi_reduction <add>, %380, %cst_63 [1] : vector<32x64xf32> to vector<32xf32>
    %382 = vector.shape_cast %381 : vector<32xf32> to vector<32x1xf32>
    %cst_64 = arith.constant 6.400000e+01 : f32
    %383 = vector.broadcast %cst_64 : f32 to vector<32x1xf32>
    %384 = arith.divf %382, %383 : vector<32x1xf32>
    %385 = vector.broadcast %377 : vector<32x1xf32> to vector<32x64xf32>
    %386 = arith.subf %371, %385 : vector<32x64xf32>
    %cst_65 = arith.constant 9.99999974E-6 : f32
    %387 = vector.broadcast %cst_65 : f32 to vector<32x1xf32>
    %388 = arith.addf %384, %387 : vector<32x1xf32>
    %389 = math.rsqrt %388 : vector<32x1xf32>
    %390 = vector.broadcast %389 : vector<32x1xf32> to vector<32x64xf32>
    %391 = arith.mulf %386, %390 : vector<32x64xf32>
    %392 = vector.broadcast %372 : vector<1x64xf32> to vector<32x64xf32>
    %393 = arith.mulf %391, %392 : vector<32x64xf32>
    %394 = vector.broadcast %373 : vector<1x64xf32> to vector<32x64xf32>
    %395 = arith.addf %393, %394 : vector<32x64xf32>
    %396 = vector.extract_strided_slice %4 {offsets = [3, 0, 0], sizes = [1, 64, 192], strides = [1, 1, 1]} : vector<4x64x192xf32> to vector<1x64x192xf32>
    %397 = vector.shape_cast %396 : vector<1x64x192xf32> to vector<64x192xf32>
    %cst_66 = arith.constant dense<0.000000e+00> : vector<32x192xf32>
    %398 = tpu.matmul %395, %397, %cst_66 {dimension_numbers = #tpu.dot_dimension_numbers<[1], [0], [0], [1], [0, 0, 1, 1], [], []>} : vector<32x64xf32>, vector<64x192xf32>, vector<32x192xf32> -> vector<32x192xf32>
    %399 = vector.extract_strided_slice %5 {offsets = [3, 0, 0], sizes = [1, 1, 192], strides = [1, 1, 1]} : vector<4x1x192xf32> to vector<1x1x192xf32>
    %400 = vector.shape_cast %399 : vector<1x1x192xf32> to vector<1x192xf32>
    %401 = vector.broadcast %400 : vector<1x192xf32> to vector<32x192xf32>
    %402 = arith.addf %398, %401 : vector<32x192xf32>
    %cst_67 = arith.constant 5.000000e-01 : f32
    %403 = vector.broadcast %cst_67 : f32 to vector<32x192xf32>
    %404 = arith.mulf %403, %402 : vector<32x192xf32>
    %cst_68 = arith.constant 4.471500e-02 : f32
    %405 = vector.broadcast %cst_68 : f32 to vector<32x192xf32>
    %406 = arith.mulf %405, %402 : vector<32x192xf32>
    %407 = arith.mulf %406, %402 : vector<32x192xf32>
    %408 = arith.mulf %407, %402 : vector<32x192xf32>
    %409 = arith.addf %402, %408 : vector<32x192xf32>
    %cst_69 = arith.constant 0.797884583 : f32
    %410 = vector.broadcast %cst_69 : f32 to vector<32x192xf32>
    %411 = arith.mulf %410, %409 : vector<32x192xf32>
    %412 = math.tanh %411 : vector<32x192xf32>
    %cst_70 = arith.constant 1.000000e+00 : f32
    %413 = vector.broadcast %cst_70 : f32 to vector<32x192xf32>
    %414 = arith.addf %413, %412 : vector<32x192xf32>
    %415 = arith.mulf %404, %414 : vector<32x192xf32>
    %416 = vector.extract_strided_slice %6 {offsets = [3, 0, 0], sizes = [1, 192, 64], strides = [1, 1, 1]} : vector<4x192x64xf32> to vector<1x192x64xf32>
    %417 = vector.shape_cast %416 : vector<1x192x64xf32> to vector<192x64xf32>
    %cst_71 = arith.constant dense<0.000000e+00> : vector<32x64xf32>
    %418 = tpu.matmul %415, %417, %cst_71 {dimension_numbers = #tpu.dot_dimension_numbers<[1], [0], [0], [1], [0, 0, 1, 1], [], []>} : vector<32x192xf32>, vector<192x64xf32>, vector<32x64xf32> -> vector<32x64xf32>
    %419 = vector.extract_strided_slice %333 {offsets = [10, 0], sizes = [1, 64], strides = [1, 1]} : vector<12x64xf32> to vector<1x64xf32>
    %420 = vector.broadcast %419 : vector<1x64xf32> to vector<32x64xf32>
    %421 = arith.addf %418, %420 : vector<32x64xf32>
    %422 = vector.extract_strided_slice %333 {offsets = [11, 0], sizes = [1, 64], strides = [1, 1]} : vector<12x64xf32> to vector<1x64xf32>
    %423 = vector.broadcast %422 : vector<1x64xf32> to vector<32x64xf32>
    %424 = arith.mulf %421, %423 : vector<32x64xf32>
    %425 = arith.addf %331, %424 : vector<32x64xf32>
    %426 = vector.broadcast %1 : vector<32x1xf32> to vector<32x64xf32>
    %427 = arith.mulf %425, %426 : vector<32x64xf32>
    %cst_72 = arith.constant dense<0.000000e+00> : vector<32xf32>
    %428 = vector.multi_reduction <add>, %427, %cst_72 [1] : vector<32x64xf32> to vector<32xf32>
    %429 = vector.shape_cast %428 : vector<32xf32> to vector<32x1xf32>
    %cst_73 = arith.constant 6.400000e+01 : f32
    %430 = vector.broadcast %cst_73 : f32 to vector<32x1xf32>
    %431 = arith.divf %429, %430 : vector<32x1xf32>
    %432 = vector.broadcast %431 : vector<32x1xf32> to vector<32x64xf32>
    %433 = arith.subf %427, %432 : vector<32x64xf32>
    %434 = arith.mulf %433, %433 : vector<32x64xf32>
    %cst_74 = arith.constant dense<0.000000e+00> : vector<32xf32>
    %435 = vector.multi_reduction <add>, %434, %cst_74 [1] : vector<32x64xf32> to vector<32xf32>
    %436 = vector.shape_cast %435 : vector<32xf32> to vector<32x1xf32>
    %cst_75 = arith.constant 6.400000e+01 : f32
    %437 = vector.broadcast %cst_75 : f32 to vector<32x1xf32>
    %438 = arith.divf %436, %437 : vector<32x1xf32>
    %439 = vector.broadcast %431 : vector<32x1xf32> to vector<32x64xf32>
    %440 = arith.subf %427, %439 : vector<32x64xf32>
    %cst_76 = arith.constant 9.99999974E-6 : f32
    %441 = vector.broadcast %cst_76 : f32 to vector<32x1xf32>
    %442 = arith.addf %438, %441 : vector<32x1xf32>
    %443 = math.rsqrt %442 : vector<32x1xf32>
    %444 = vector.broadcast %443 : vector<32x1xf32> to vector<32x64xf32>
    %445 = arith.mulf %440, %444 : vector<32x64xf32>
    %446 = vector.broadcast %12 : vector<1x64xf32> to vector<32x64xf32>
    %447 = arith.mulf %445, %446 : vector<32x64xf32>
    %448 = vector.broadcast %13 : vector<1x64xf32> to vector<32x64xf32>
    %449 = arith.addf %447, %448 : vector<32x64xf32>
    %450 = vector.broadcast %1 : vector<32x1xf32> to vector<32x64xf32>
    %451 = arith.mulf %449, %450 : vector<32x64xf32>
    %452 = vector.broadcast %14 : vector<1x64xf32> to vector<32x64xf32>
    %453 = arith.mulf %451, %452 : vector<32x64xf32>
    %cst_77 = arith.constant dense<0.000000e+00> : vector<32xf32>
    %454 = vector.multi_reduction <add>, %453, %cst_77 [1] : vector<32x64xf32> to vector<32xf32>
    %455 = vector.shape_cast %454 : vector<32xf32> to vector<32x1xf32>
    %c0_78 = arith.constant 0 : index
    %c0_79 = arith.constant 0 : index
    %456 = vector.load %arg8[%c0_78, %c0_79] : memref<1x1xf32, #tpu.memory_space<vmem>>, vector<1x1xf32>
    %457 = vector.broadcast %456 : vector<1x1xf32> to vector<32x1xf32>
    %458 = arith.addf %455, %457 : vector<32x1xf32>
    %459 = arith.mulf %458, %1 : vector<32x1xf32>
    %cst_80 = arith.constant 0.000000e+00 : f32
    %460 = vector.broadcast %cst_80 : f32 to vector<32x1xf32>
    %461 = arith.maximumf %459, %460 : vector<32x1xf32>
    %c0_81 = arith.constant 0 : index
    %c0_82 = arith.constant 0 : index
    %462 = vector.load %arg9[%c0_81, %c0_82] : memref<32x1xf32, #tpu.memory_space<vmem>>, vector<32x1xf32>
    tpu.vector_store %arg9[%c0_81, %c0_82], %461 {strides = array<i32>} : memref<32x1xf32, #tpu.memory_space<vmem>>, vector<32x1xf32>,
    return
  }
}

</mosaic_0001>

<bundles_post_ra>
// kernel: duration_predictor.1
= control target key start
LH: loop header
LB: loop body
LE: loop exit
PB: predicated region body
PF: predicated region fallthrough
CT: control target
= control target key end

     0   :  { %v4238_v3 = vmov 0   ;;  %vm257_vm0 = vcmask 654336   ;;  %v253_v24 = vlaneseq  ;;  %vm379_vm1 = vcmask 523264   ;;  %s6058_s3 = inlined_call_operand.vmem [shape: f32[88,64], index: 3, kind: input, shape index: {}]   ;;  %s6059_s0 = inlined_call_operand.vmem [shape: f32[32,80], index: 0, kind: input, shape index: {}]   ;;  %s6060_s1 = inlined_call_operand.vmem [shape: f32[32,1], index: 1, kind: input, shape index: {}]   ;;  %s6061_s2 = inlined_call_operand.vmem [shape: f32[224,32], index: 2, kind: input, shape index: {}]   ;;  %s6062_s7 = inlined_call_operand.vmem [shape: f32[4,12,64], index: 7, kind: input, shape index: {}]   ;;  %s6063_s4 = inlined_call_operand.vmem [shape: f32[4,64,192], index: 4, kind: input, shape index: {}]   ;;  %s6064_s6 = inlined_call_operand.vmem [shape: f32[4,192,64], index: 6, kind: input, shape index: {}]   ;;  %s6065_s5 = inlined_call_operand.vmem [shape: f32[4,1,192], index: 5, kind: input, shape index: {}]   ;;  %s6066_s8 = inlined_call_operand.<no memory space> [shape: f32[1,1], index: 8, kind: input, shape index: {}]   ;;  %s6067_s9 = inlined_call_operand.vmem [shape: f32[32,1], index: 9, kind: output, shape index: {}]  }
   0x1   :  { %v70_v0 = vld [vmem:[%s6058_s3] sm:$0xff]  ;;  %v71_v1 = vld [vmem:[%s6058_s3 + $0x8] sm:$0xff]  ;;  %v72_v2 = vld [vmem:[%s6058_s3 + $0x10] sm:$0xff]  ;;  %4090 = vset.pattern.permute.xlu0 %v4238_v3  ;;  %4091 = vset.pattern.permute.xlu1 %v4238_v3  ;;  %vm453_vm2 = vcmask 261120   ;;  %vm3297_vm3 = vcmask 7168  }
   0x2   :  { %v3823_v4 = vpack.c.bf16 %v71_v1, %v70_v0  ;;  %v73_v5 = vld [vmem:[%s6058_s3 + $0x18] sm:$0xff]  ;;  %v74_v7 = vld [vmem:[%s6058_s3 + $0x20] sm:$0xff]  ;;  %v75_v8 = vld [vmem:[%s6058_s3 + $0x28] sm:$0xff]  ;;  %v4349_v25 = vshrl.u32 %v253_v24, 7 }
   0x3   :  { %v3827_v6 = vpack.c.bf16 %v73_v5, %v72_v2  ;;  %v34_v9 = vld [vmem:[%s6059_s0] sm:$0xff]  ;;  %v3831_v11 = vpack.c.bf16 %v75_v8, %v74_v7  ;;  %v40_v12 = vld [vmem:[%s6060_s1 + $0x10] sm:$0xff]  ;;  %v77_v14 = vld [vmem:[%s6058_s3 + $0x38] sm:$0xff] }
   0x4   :  { %3824 = vmatprep.subr.bf16.mxu1 %v3823_v4  ;;  %3617 = vmatprep.mubr.msk.f32.mxu1 %vm257_vm0, %v34_v9  ;;  %v38_v10 = vld [vmem:[%s6060_s1] sm:$0xff]  ;;  %v76_v13 = vld [vmem:[%s6058_s3 + $0x30] sm:$0xff]  ;;  %v39_v15 = vld [vmem:[%s6060_s1 + $0x8] sm:$0xff]  ;;  %v4352_v26 = vsub.s32 0, %v4349_v25 }
   0x5   :  { %3826 = vmatpush3.bf16.msra.mxu1 %v3823_v4  ;;  %357 = vperm.xlu0 %4090, %v38_v10   ;;  %v41_v16 = vld [vmem:[%s6060_s1 + $0x18] sm:$0xff]  ;;  %v3835_v17 = vpack.c.bf16 %v77_v14, %v76_v13  ;;  %v78_v18 = vld [vmem:[%s6058_s3 + $0x40] sm:$0xff]  ;;  %v79_v19 = vld [vmem:[%s6058_s3 + $0x48] sm:$0xff] }
   0x6   :  { %3828 = vmatprep.subr.bf16.mxu1 %v3827_v6  ;;  %367 = vperm.xlu1 %4091, %v40_v12   ;;  %v3839_v20 = vpack.c.bf16 %v79_v19, %v78_v18  ;;  %v35_v21 = vld [vmem:[%s6059_s0 + $0x8] sm:$0xff]  ;;  %v36_v22 = vld [vmem:[%s6059_s0 + $0x10] sm:$0xff]  ;;  %v37_v23 = vld [vmem:[%s6059_s0 + $0x18] sm:$0xff]  ;;  %v4393_v18 = vsub.s32 1, %v4349_v25 }
   0x7   :  { %v4359_v28 = vld [vmem:[%s6058_s3 + $0x50] sm:$0xff]  ;;  %v4384_v5 = vld [vmem:[%s6061_s2] sm:$0xff] }
   0x8   :  { %v256_v29 = vrot.slane %v4359_v28, %v4352_v26  ;;  %3631 = vmatprep.mubr.msk.f32.mxu0 %vm453_vm2, %v4384_v5  ;;  %6093 = vst [vmem:[#allocation3_spill] sm:$0xff] %v4393_v18 }
   0x9   :  { %3830 = vmatpush3.bf16.msra.mxu1 %v3827_v6  ;;  %362 = vperm.xlu0 %4090, %v39_v15   ;;  %v46_v6 = vld [vmem:[%s6061_s2 + $0x20] sm:$0xff] }
   0xa   :  { %3832 = vmatprep.subr.bf16.mxu1 %v3831_v11  ;;  %372 = vperm.xlu1 %4091, %v41_v16  }
   0xd   :  { %3834 = vmatpush3.bf16.msra.mxu1 %v3831_v11 }
   0xe   :  { %3836 = vmatprep.subr.bf16.mxu1 %v3835_v17 }
  0x11   :  { %3838 = vmatpush3.bf16.msra.mxu1 %v3835_v17 }
  0x12   :  { %3840 = vmatprep.subr.bf16.mxu1 %v3839_v20 }
  0x15   :  { %3842 = vmatpush3.bf16.msra.mxu1 %v3839_v20  ;;  %v4396_v20 = vsub.s32 2, %v4349_v25 }
  0x18   :  { %3618 = vmatmul.mubr.msk.f32.vlgmr.msra.gmra.mrb[0].mxu1 %vm257_vm0, %v35_v21  ;;  %v436_v21 = vrot.slane %v4359_v28, %v4393_v18 }
  0x19   :  { %3620 = vmatprep.mubr.msk.f32.mxu1 %vm257_vm0, %v36_v22 }
  0x1c   :  { %3621 = vmatmul.mubr.msk.f32.gmra.mrb[2].mxu1 %vm257_vm0, %v37_v23 }
  0x1d   :  { %3637 = vmatprep.mubr.msk.f32.mxu1 %vm453_vm2, %v46_v6  ;;  %v4545_v6 = vld [vmem:[%s6061_s2 + $0xa0] sm:$0xff] }
  0x84   :  { %v4354_v27 = vpop.permute.xlu0 %357 }
  0x85   :  { %v4365_v34 = vpop.permute.xlu1 %367 }
  0x88   :  { %v4363_v31 = vpop.permute.xlu0 %362 }
  0x89   :  { %v4371_v44 = vpop.permute.xlu1 %372 }
  0xeb   :  { %v3619_v30 = vpop.f32.mrb[0].mxu1 }
  0xec   :  { %v342_v32 = vadd.f32 %v3619_v30, %v256_v29  ;;  %v336_v33 = vpop.f32.mrb[1].mxu1 }
  0xed   :  { %v337_v35 = vadd.f32 %v336_v33, %v256_v29 }
  0xee   :  { %v376_v36 = vmul.f32 %v4363_v31, %v342_v32 }
  0xef   :  { %v3622_v37 = vpop.f32.mrb[2].mxu1  ;;  %v375_v38 = vmul.f32 %v4354_v27, %v337_v35 }
  0xf0   :  { %v346_v39 = vpop.f32.mrb[3].mxu1  ;;  %v383_v40 = vsel %vm379_vm1, %v376_v36, 0.0  ;;  %v352_v41 = vadd.f32 %v3622_v37, %v256_v29 }
  0xf1   :  { %v347_v42 = vadd.f32 %v346_v39, %v256_v29  ;;  %384 = vadd.xlane.f32.xlu1 %v383_v40  ;;  %v380_v43 = vsel %vm379_vm1, %v375_v38, 0.0  ;;  %v444_v29 = vrot.slane %v4359_v28, %v4396_v20 }
  0xf2   :  { %381 = vadd.xlane.f32.xlu0 %v380_v43  ;;  %v378_v47 = vmul.f32 %v4371_v44, %v352_v41 }
  0xf3   :  { %v377_v45 = vmul.f32 %v4365_v34, %v347_v42 }
  0xf4   :  { %v389_v48 = vsel %vm379_vm1, %v378_v47, 0.0 }
  0xf5   :  { %v386_v46 = vsel %vm379_vm1, %v377_v45, 0.0 }
  0xf6   :  { %387 = vadd.xlane.f32.xlu0 %v386_v46 }
  0xfa   :  { %390 = vadd.xlane.f32.xlu0 %v389_v48 }
 0x17e   :  { %v385_v49 = vpop.xlane.xlu1 %384 }
 0x17f   :  { %v394_v50 = vmul.f32 0.015625, %v385_v49  ;;  %v382_v51 = vpop.xlane.xlu0 %381 }
 0x180   :  { %v393_v52 = vmul.f32 0.015625, %v382_v51  ;;  %v4421_v51 = vld [vmem:[%s6061_s2 + $0x8] sm:$0xff] }
 0x181   :  { %v398_v53 = vsub.f32 %v376_v36, %v394_v50 }
 0x182   :  { %v397_v54 = vsub.f32 %v375_v38, %v393_v52  ;;  %v4426_v52 = vld [vmem:[%s6061_s2 + $0x28] sm:$0xff] }
 0x183   :  { %v388_v55 = vpop.xlane.xlu0 %387  ;;  %v402_v56 = vmul.f32 %v398_v53, %v398_v53 }
 0x184   :  { %v395_v57 = vmul.f32 0.015625, %v388_v55  ;;  %v401_v58 = vmul.f32 %v397_v54, %v397_v54  ;;  %v4449_v55 = vld [vmem:[%s6061_s2 + $0x18] sm:$0xff] }
 0x185   :  { %v408_v59 = vsel %vm379_vm1, %v402_v56, 0.0  ;;  %v4454_v56 = vld [vmem:[%s6061_s2 + $0x38] sm:$0xff] }
 0x186   :  { %v399_v60 = vsub.f32 %v377_v45, %v395_v57  ;;  %409 = vadd.xlane.f32.xlu0 %v408_v59  ;;  %v405_v61 = vsel %vm379_vm1, %v401_v58, 0.0  ;;  %v4459_v57 = vld [vmem:[%s6061_s2 + $0x40] sm:$0xff]  ;;  %v4470_v58 = vld [vmem:[%s6061_s2 + $0x48] sm:$0xff]  ;;  %v4475_v59 = vld [vmem:[%s6061_s2 + $0x50] sm:$0xff] }
 0x187   :  { %406 = vadd.xlane.f32.xlu1 %v405_v61  ;;  %v391_v62 = vpop.xlane.xlu0 %390  ;;  %v4489_v61 = vld [vmem:[%s6061_s2 + $0x60] sm:$0xff] }
 0x188   :  { %v396_v63 = vmul.f32 0.015625, %v391_v62  ;;  %v403_v0 = vmul.f32 %v399_v60, %v399_v60  ;;  %v4498_v62 = vld [vmem:[%s6061_s2 + $0x68] sm:$0xff] }
 0x18a   :  { %v400_v1 = vsub.f32 %v378_v47, %v396_v63  ;;  %v411_v2 = vsel %vm379_vm1, %v403_v0, 0.0  ;;  %v4503_v63 = vld [vmem:[%s6061_s2 + $0x70] sm:$0xff]  ;;  %v4512_v0 = vld [vmem:[%s6061_s2 + $0x78] sm:$0xff] }
 0x18b   :  { %412 = vadd.xlane.f32.xlu1 %v411_v2  ;;  %v4526_v2 = vld [vmem:[%s6061_s2 + $0x88] sm:$0xff] }
 0x18c   :  { %v404_v3 = vmul.f32 %v400_v1, %v400_v1 }
 0x18e   :  { %v414_v4 = vsel %vm379_vm1, %v404_v3, 0.0  ;;  %v4531_v3 = vld [vmem:[%s6061_s2 + $0x90] sm:$0xff] }
 0x18f   :  { %415 = vadd.xlane.f32.xlu0 %v414_v4  ;;  %v4540_v4 = vld [vmem:[%s6061_s2 + $0x98] sm:$0xff] }
 0x213   :  { %v410_v7 = vpop.xlane.xlu0 %409 }
 0x214   :  { %v418_v8 = vmul.f32 0.015625, %v410_v7  ;;  %v407_v9 = vpop.xlane.xlu1 %406  ;;  %v4554_v7 = vld [vmem:[%s6061_s2 + $0xa8] sm:$0xff] }
 0x215   :  { %v417_v10 = vmul.f32 0.015625, %v407_v9  ;;  %v4568_v9 = vld [vmem:[%s6061_s2 + $0xb8] sm:$0xff] }
 0x216   :  { %v422_v11 = vadd.f32 1e-05, %v418_v8  ;;  %v4559_v8 = vld [vmem:[%s6061_s2 + $0xb0] sm:$0xff] }
 0x217   :  { %v421_v12 = vadd.f32 1e-05, %v417_v10  ;;  %v4573_v10 = vld [vmem:[%s6061_s2 + $0xc0] sm:$0xff] }
 0x218   :  { %4092 = vrsqrt.f32 %v422_v11  ;;  %v413_v13 = vpop.xlane.xlu1 %412  ;;  %v4582_v11 = vld [vmem:[%s6061_s2 + $0xc8] sm:$0xff] }
 0x219   :  { %4094 = vrsqrt.f32 %v421_v12  ;;  %v419_v14 = vmul.f32 0.015625, %v413_v13  ;;  %v4587_v12 = vld [vmem:[%s6061_s2 + $0xd0] sm:$0xff]  ;;  %v4596_v13 = vld [vmem:[%s6061_s2 + $0xd8] sm:$0xff] }
 0x21a   :  { %6094 = vst [vmem:[#allocation4_spill] sm:$0xff] %v4587_v12  ;;  %6095 = vst [vmem:[#allocation5_spill] sm:$0xff] %v4596_v13 }
 0x21b   :  { %v423_v15 = vadd.f32 1e-05, %v419_v14  ;;  %v4603_v14 = vld [vmem:[%s6062_s7] sm:$0xff] }
 0x21c   :  { %v416_v16 = vpop.xlane.xlu0 %415 }
 0x21d   :  { %4096 = vrsqrt.f32 %v423_v15  ;;  %v420_v17 = vmul.f32 0.015625, %v416_v16  ;;  %v746_v15 = vrot.slane %v4603_v14, %v4352_v26  ;;  %v754_v16 = vrot.slane %v4603_v14, %v4393_v18 }
 0x21f   :  { %v424_v19 = vadd.f32 1e-05, %v420_v17 }
 0x221   :  { %4098 = vrsqrt.f32 %v424_v19 }
 0x222   :  { %v4093_v22 = vpop.eup %4092 }
 0x223   :  { %v4095_v23 = vpop.eup %4094  ;;  %v430_v24 = vmul.f32 %v4093_v22, %v398_v53  ;;  %v4431_v53 = vld [vmem:[%s6061_s2 + $0x10] sm:$0xff] }
 0x224   :  { %v429_v30 = vmul.f32 %v4095_v23, %v397_v54  ;;  %v4436_v54 = vld [vmem:[%s6061_s2 + $0x30] sm:$0xff] }
 0x225   :  { %v438_v32 = vmul.f32 %v436_v21, %v430_v24 }
 0x226   :  { %v437_v33 = vmul.f32 %v436_v21, %v429_v30 }
 0x227   :  { %v4097_v35 = vpop.eup %4096  ;;  %v446_v36 = vadd.f32 %v444_v29, %v438_v32 }
 0x228   :  { %v431_v37 = vmul.f32 %v4097_v35, %v399_v60  ;;  %v445_v38 = vadd.f32 %v444_v29, %v437_v33  ;;  %v4484_v60 = vld [vmem:[%s6061_s2 + $0x58] sm:$0xff] }
 0x229   :  { %v4403_v39 = vmul.f32 %v446_v36, %v4363_v31 }
 0x22a   :  { %v4406_v40 = vmul.f32 %v445_v38, %v4354_v27  ;;  %v439_v41 = vmul.f32 %v436_v21, %v431_v37 }
 0x22b   :  { %v4099_v42 = vpop.eup %4098 }
 0x22c   :  { %v432_v43 = vmul.f32 %v4099_v42, %v400_v1  ;;  %v3843_v45 = vpack.c.bf16 %v4403_v39, %v4406_v40  ;;  %v447_v46 = vadd.f32 %v444_v29, %v439_v41  ;;  %v4517_v1 = vld [vmem:[%s6061_s2 + $0x80] sm:$0xff] }
 0x22e   :  { %3844 = vmatprep.subr.bf16.mxu0 %v3843_v45  ;;  %4083 = vmatprep.subr.bf16.mxu1 %v3843_v45  ;;  %v440_v28 = vmul.f32 %v436_v21, %v432_v43  ;;  %v4411_v48 = vmul.f32 %v447_v46, %v4365_v34  ;;  %v766_v43 = vrot.slane %v4603_v14, %v4396_v20 }
 0x22f   :  { %3846 = vmatpush3.bf16.msra.mxu0 %v3843_v45  ;;  %4085 = vmatpush3.bf16.msra.mxu1 %v3843_v45 }
 0x230   :  { %v448_v47 = vadd.f32 %v444_v29, %v440_v28 }
 0x232   :  { %v4414_v49 = vmul.f32 %v448_v47, %v4371_v44 }
 0x234   :  { %v3847_v50 = vpack.c.bf16 %v4414_v49, %v4411_v48 }
 0x236   :  { %3848 = vmatprep.subr.bf16.mxu0 %v3847_v50  ;;  %4084 = vmatprep.subr.bf16.mxu1 %v3847_v50 }
 0x237   :  { %3850 = vmatpush3.bf16.msra.mxu0 %v3847_v50  ;;  %4086 = vmatpush3.bf16.msra.mxu1 %v3847_v50 }
 0x23a   :  { %3632 = vmatmul.mubr.msk.f32.vlgmr.msra.gmra.mrb[0].mxu0 %vm453_vm2, %v4421_v51  ;;  %3638 = vmatmul.mubr.msk.f32.vlgmr.msra.gmra.mrb[4].mxu1 %vm453_vm2, %v4426_v52 }
 0x23b   :  { %3634 = vmatprep.mubr.msk.f32.mxu0 %vm453_vm2, %v4431_v53  ;;  %3640 = vmatprep.mubr.msk.f32.mxu1 %vm453_vm2, %v4436_v54 }
 0x23e   :  { %3635 = vmatmul.mubr.msk.f32.gmra.mrb[2].mxu0 %vm453_vm2, %v4449_v55  ;;  %3641 = vmatmul.mubr.msk.f32.gmra.mrb[6].mxu1 %vm453_vm2, %v4454_v56 }
 0x23f   :  { %3643 = vmatprep.mubr.msk.f32.mxu1 %vm453_vm2, %v4459_v57 }
 0x242   :  { %3644 = vmatmul.mubr.msk.f32.gmra.mrb[8].mxu1 %vm453_vm2, %v4470_v58 }
 0x243   :  { %3646 = vmatprep.mubr.msk.f32.mxu1 %vm453_vm2, %v4475_v59 }
 0x246   :  { %3647 = vmatmul.mubr.msk.f32.gmra.mrb[10].mxu1 %vm453_vm2, %v4484_v60 }
 0x247   :  { %3649 = vmatprep.mubr.msk.f32.mxu1 %vm453_vm2, %v4489_v61 }
 0x24a   :  { %3650 = vmatmul.mubr.msk.f32.gmra.mrb[12].mxu1 %vm453_vm2, %v4498_v62 }
 0x24b   :  { %3652 = vmatprep.mubr.msk.f32.mxu1 %vm453_vm2, %v4503_v63 }
 0x24e   :  { %3653 = vmatmul.mubr.msk.f32.gmra.mrb[14].mxu1 %vm453_vm2, %v4512_v0 }
 0x24f   :  { %3655 = vmatprep.mubr.msk.f32.mxu1 %vm453_vm2, %v4517_v1 }
 0x252   :  { %3656 = vmatmul.mubr.msk.f32.gmra.mrb[16].mxu1 %vm453_vm2, %v4526_v2 }
 0x253   :  { %3658 = vmatprep.mubr.msk.f32.mxu1 %vm453_vm2, %v4531_v3 }
 0x256   :  { %3659 = vmatmul.mubr.msk.f32.gmra.mrb[18].mxu1 %vm453_vm2, %v4540_v4 }
 0x257   :  { %3661 = vmatprep.mubr.msk.f32.mxu1 %vm453_vm2, %v4545_v6 }
 0x25a   :  { %3662 = vmatmul.mubr.msk.f32.gmra.mrb[20].mxu1 %vm453_vm2, %v4554_v7 }
 0x25b   :  { %3664 = vmatprep.mubr.msk.f32.mxu1 %vm453_vm2, %v4559_v8 }
 0x25e   :  { %3665 = vmatmul.mubr.msk.f32.gmra.mrb[22].mxu1 %vm453_vm2, %v4568_v9 }
 0x25f   :  { %3667 = vmatprep.mubr.msk.f32.mxu1 %vm453_vm2, %v4573_v10 }
 0x262   :  { %3668 = vmatmul.mubr.msk.f32.gmra.mrb[24].mxu1 %vm453_vm2, %v4582_v11 }
 0x263   :  { %3670 = vmatprep.mubr.msk.f32.mxu1 %vm453_vm2, %v4587_v12 }
 0x266   :  { %3671 = vmatmul.mubr.msk.f32.gmra.mrb[26].mxu1 %vm453_vm2, %v4596_v13 }
 0x30d   :  { %v3633_v17 = vpop.f32.mrb[0].mxu0  ;;  %v3639_v19 = vpop.f32.mrb[4].mxu1 }
 0x30e   :  { %v748_v21 = vmul.f32 %v3633_v17, %v746_v15  ;;  %v756_v22 = vmul.f32 %v3639_v19, %v754_v16  ;;  %v604_v23 = vpop.f32.mrb[1].mxu0  ;;  %v624_v24 = vpop.f32.mrb[5].mxu1 }
 0x30f   :  { %v747_v29 = vmul.f32 %v746_v15, %v604_v23  ;;  %v755_v30 = vmul.f32 %v754_v16, %v624_v24  ;;  %v4612_v23 = vsub.s32 3, %v4349_v25 }
 0x310   :  { %v760_v32 = vadd.f32 %v756_v22, %v748_v21 }
 0x311   :  { %v759_v33 = vadd.f32 %v755_v30, %v747_v29  ;;  %v3636_v35 = vpop.f32.mrb[2].mxu0  ;;  %v3642_v36 = vpop.f32.mrb[6].mxu1 }
 0x312   :  { %v750_v37 = vmul.f32 %v3636_v35, %v746_v15  ;;  %v758_v38 = vmul.f32 %v3642_v36, %v754_v16  ;;  %v614_v41 = vpop.f32.mrb[3].mxu0  ;;  %v634_v42 = vpop.f32.mrb[7].mxu1  ;;  %v778_v36 = vrot.slane %v4603_v14, %v4612_v23 }
 0x313   :  { %v749_v45 = vmul.f32 %v746_v15, %v614_v41  ;;  %v757_v28 = vmul.f32 %v754_v16, %v634_v42  ;;  %v4617_v42 = vsub.s32 4, %v4349_v25 }
 0x314   :  { %v762_v46 = vadd.f32 %v758_v38, %v750_v37 }
 0x315   :  { %v761_v47 = vadd.f32 %v757_v28, %v749_v45  ;;  %v3645_v50 = vpop.f32.mrb[8].mxu1  ;;  %6096 = vst [vmem:[#allocation6_spill] sm:$0xff] %v4617_v42 }
 0x316   :  { %v768_v17 = vmul.f32 %v3645_v50, %v766_v43  ;;  %v644_v19 = vpop.f32.mrb[9].mxu1 }
 0x317   :  { %v767_v21 = vmul.f32 %v766_v43, %v644_v19  ;;  %v790_v19 = vrot.slane %v4603_v14, %v4617_v42 }
 0x318   :  { %v772_v22 = vadd.f32 %v768_v17, %v760_v32 }
 0x319   :  { %v771_v24 = vadd.f32 %v767_v21, %v759_v33  ;;  %v3648_v29 = vpop.f32.mrb[10].mxu1 }
 0x31a   :  { %v770_v30 = vmul.f32 %v3648_v29, %v766_v43  ;;  %v654_v35 = vpop.f32.mrb[11].mxu1 }
 0x31b   :  { %v769_v13 = vmul.f32 %v766_v43, %v654_v35 }
 0x31c   :  { %v774_v15 = vadd.f32 %v770_v30, %v762_v46  ;;  %v4622_v30 = vsub.s32 5, %v4349_v25 }
 0x31d   :  { %v773_v16 = vadd.f32 %v769_v13, %v761_v47  ;;  %v3651_v37 = vpop.f32.mrb[12].mxu1 }
 0x31e   :  { %v780_v38 = vmul.f32 %v3651_v37, %v778_v36  ;;  %v664_v41 = vpop.f32.mrb[13].mxu1  ;;  %6097 = vst [vmem:[#allocation7_spill] sm:$0xff] %v4622_v30 }
 0x31f   :  { %v779_v45 = vmul.f32 %v778_v36, %v664_v41 }
 0x320   :  { %v784_v28 = vadd.f32 %v780_v38, %v772_v22 }
 0x321   :  { %v783_v50 = vadd.f32 %v779_v45, %v771_v24  ;;  %v3654_v32 = vpop.f32.mrb[14].mxu1  ;;  %v802_v45 = vrot.slane %v4603_v14, %v4622_v30 }
 0x322   :  { %v782_v33 = vmul.f32 %v3654_v32, %v778_v36  ;;  %v674_v17 = vpop.f32.mrb[15].mxu1 }
 0x323   :  { %v781_v21 = vmul.f32 %v778_v36, %v674_v17  ;;  %v4627_v17 = vsub.s32 6, %v4349_v25 }
 0x324   :  { %v786_v29 = vadd.f32 %v782_v33, %v774_v15 }
 0x325   :  { %v785_v43 = vadd.f32 %v781_v21, %v773_v16  ;;  %v3657_v46 = vpop.f32.mrb[16].mxu1  ;;  %6098 = vst [vmem:[#allocation8_spill] sm:$0xff] %v4627_v17 }
 0x326   :  { %v792_v13 = vmul.f32 %v3657_v46, %v790_v19  ;;  %v684_v47 = vpop.f32.mrb[17].mxu1 }
 0x327   :  { %v791_v35 = vmul.f32 %v790_v19, %v684_v47 }
 0x328   :  { %v796_v37 = vadd.f32 %v792_v13, %v784_v28 }
 0x329   :  { %v795_v41 = vadd.f32 %v791_v35, %v783_v50  ;;  %v3660_v22 = vpop.f32.mrb[18].mxu1  ;;  %v814_v35 = vrot.slane %v4603_v14, %v4627_v17 }
 0x32a   :  { %v794_v24 = vmul.f32 %v3660_v22, %v790_v19  ;;  %v694_v38 = vpop.f32.mrb[19].mxu1  ;;  %v4632_v22 = vsub.s32 7, %v4349_v25 }
 0x32b   :  { %v793_v32 = vmul.f32 %v790_v19, %v694_v38 }
 0x32c   :  { %v798_v42 = vadd.f32 %v794_v24, %v786_v29  ;;  %6099 = vst [vmem:[#allocation9_spill] sm:$0xff] %v4632_v22 }
 0x32d   :  { %v797_v36 = vadd.f32 %v793_v32, %v785_v43  ;;  %v3663_v15 = vpop.f32.mrb[20].mxu1 }
 0x32e   :  { %v804_v16 = vmul.f32 %v3663_v15, %v802_v45  ;;  %v704_v33 = vpop.f32.mrb[21].mxu1  ;;  %v826_v15 = vrot.slane %v4603_v14, %v4632_v22 }
 0x32f   :  { %v803_v21 = vmul.f32 %v802_v45, %v704_v33 }
 0x330   :  { %v808_v46 = vadd.f32 %v804_v16, %v796_v37 }
 0x331   :  { %v807_v47 = vadd.f32 %v803_v21, %v795_v41  ;;  %v3666_v28 = vpop.f32.mrb[22].mxu1 }
 0x332   :  { %v806_v50 = vmul.f32 %v3666_v28, %v802_v45  ;;  %v714_v13 = vpop.f32.mrb[23].mxu1 }
 0x333   :  { %v805_v19 = vmul.f32 %v802_v45, %v714_v13 }
 0x334   :  { %v810_v29 = vadd.f32 %v806_v50, %v798_v42 }
 0x335   :  { %v809_v43 = vadd.f32 %v805_v19, %v797_v36  ;;  %v3669_v24 = vpop.f32.mrb[24].mxu1 }
 0x336   :  { %v816_v38 = vmul.f32 %v3669_v24, %v814_v35  ;;  %v724_v32 = vpop.f32.mrb[25].mxu1 }
 0x337   :  { %v815_v37 = vmul.f32 %v814_v35, %v724_v32 }
 0x338   :  { %v820_v41 = vadd.f32 %v816_v38, %v808_v46 }
 0x339   :  { %v819_v16 = vadd.f32 %v815_v37, %v807_v47  ;;  %v3672_v33 = vpop.f32.mrb[26].mxu1 }
 0x33a   :  { %v818_v21 = vmul.f32 %v3672_v33, %v814_v35  ;;  %v734_v28 = vpop.f32.mrb[27].mxu1  ;;  %v828_v30 = vadd.f32 %v826_v15, %v820_v41 }
 0x33b   :  { %v817_v17 = vmul.f32 %v814_v35, %v734_v28  ;;  %v827_v12 = vadd.f32 %v826_v15, %v819_v16 }
 0x33c   :  { %v822_v25 = vadd.f32 %v818_v21, %v810_v29  ;;  %v834_v45 = vsel %vm379_vm1, %v828_v30, 0.0 }
 0x33d   :  { %v821_v42 = vadd.f32 %v817_v17, %v809_v43  ;;  %835 = vadd.xlane.f32.xlu0 %v834_v45  ;;  %v831_v36 = vsel %vm379_vm1, %v827_v12, 0.0 }
 0x33e   :  { %832 = vadd.xlane.f32.xlu1 %v831_v36  ;;  %v830_v50 = vadd.f32 %v826_v15, %v822_v25  ;;  %v84_v36 = vld [vmem:[%s6063_s4 + $0x18] sm:$0xff] }
 0x33f   :  { %v829_v13 = vadd.f32 %v826_v15, %v821_v42  ;;  %v82_v42 = vld [vmem:[%s6063_s4 + $0x8] sm:$0xff] }
 0x340   :  { %v840_v14 = vsel %vm379_vm1, %v830_v50, 0.0 }
 0x341   :  { %841 = vadd.xlane.f32.xlu0 %v840_v14  ;;  %v837_v46 = vsel %vm379_vm1, %v829_v13, 0.0  ;;  %v83_v14 = vld [vmem:[%s6063_s4 + $0x10] sm:$0xff] }
 0x342   :  { %838 = vadd.xlane.f32.xlu1 %v837_v46 }
 0x3ca   :  { %v836_v47 = vpop.xlane.xlu0 %835 }
 0x3cb   :  { %v844_v19 = vmul.f32 0.015625, %v836_v47  ;;  %v833_v35 = vpop.xlane.xlu1 %832  ;;  %v86_v47 = vld [vmem:[%s6063_s4 + $0x28] sm:$0xff] }
 0x3cc   :  { %v843_v24 = vmul.f32 0.015625, %v833_v35 }
 0x3cd   :  { %v4640_v29 = vsub.f32 %v828_v30, %v844_v19  ;;  %v88_v19 = vld [vmem:[%s6063_s4 + $0x38] sm:$0xff] }
 0x3ce   :  { %v4642_v38 = vsub.f32 %v827_v12, %v843_v24  ;;  %v842_v17 = vpop.xlane.xlu0 %841  ;;  %v3855_v35 = vpack.c.bf16 %v88_v19, %v86_v47  ;;  %v85_v24 = vld [vmem:[%s6063_s4 + $0x20] sm:$0xff]  ;;  %v151_v47 = vld [vmem:[%s6064_s6 + $0x10] sm:$0xff] }
 0x3cf   :  { %v846_v43 = vmul.f32 0.015625, %v842_v17  ;;  %v839_v32 = vpop.xlane.xlu1 %838  ;;  %v852_v15 = vmul.f32 %v4640_v29, %v4640_v29  ;;  %v87_v17 = vld [vmem:[%s6063_s4 + $0x30] sm:$0xff] }
 0x3d0   :  { %v845_v37 = vmul.f32 0.015625, %v839_v32  ;;  %v851_v41 = vmul.f32 %v4642_v38, %v4642_v38  ;;  %v90_v32 = vld [vmem:[%s6063_s4 + $0x48] sm:$0xff] }
 0x3d1   :  { %v4648_v16 = vsub.f32 %v830_v50, %v846_v43  ;;  %v858_v33 = vsel %vm379_vm1, %v852_v15, 0.0  ;;  %v3851_v50 = vpack.c.bf16 %v84_v36, %v82_v42  ;;  %v3857_v43 = vpack.c.bf16 %v87_v17, %v85_v24  ;;  %v92_v15 = vld [vmem:[%s6063_s4 + $0x58] sm:$0xff]  ;;  %v95_v42 = vld [vmem:[%s6063_s4 + $0x70] sm:$0xff]  ;;  %v153_v17 = vld [vmem:[%s6064_s6 + $0x20] sm:$0xff] }
 0x3d2   :  { %v4651_v21 = vsub.f32 %v829_v13, %v845_v37  ;;  %859 = vadd.xlane.f32.xlu0 %v858_v33  ;;  %v855_v12 = vsel %vm379_vm1, %v851_v41, 0.0  ;;  %v81_v13 = vld [vmem:[%s6063_s4] sm:$0xff]  ;;  %v3859_v37 = vpack.c.bf16 %v92_v15, %v90_v32  ;;  %v91_v33 = vld [vmem:[%s6063_s4 + $0x50] sm:$0xff] }
 0x3d3   :  { %856 = vadd.xlane.f32.xlu1 %v855_v12  ;;  %v854_v30 = vmul.f32 %v4648_v16, %v4648_v16  ;;  %v3853_v46 = vpack.c.bf16 %v83_v14, %v81_v13  ;;  %3852 = vmatprep.subr.bf16.mxu0 %v3851_v50  ;;  %v89_v41 = vld [vmem:[%s6063_s4 + $0x40] sm:$0xff]  ;;  %v6078_v50 = vmov 0.0   ;;  %v6076_v13 = vmov 0.0|0.0   ;;  %v155_v15 = vld [vmem:[%s6064_s6 + $0x30] sm:$0xff] }
 0x3d4   :  { %v853_v28 = vmul.f32 %v4651_v21, %v4651_v21  ;;  %v3861_v12 = vpack.c.bf16 %v91_v33, %v89_v41  ;;  %986 = vmatprep.mubr.f32.mxu0 %v6078_v50  ;;  %3867 = vmatprep.subr.bf16.mxu1 %v6076_v13  ;;  %v149_v14 = vld [vmem:[%s6064_s6] sm:$0xff] }
 0x3d5   :  { %v864_v25 = vsel %vm379_vm1, %v854_v30, 0.0  ;;  %3854 = vmatpush1.bf16.msra.mxu0 %v3853_v46  ;;  %v94_v30 = vld [vmem:[%s6063_s4 + $0x68] sm:$0xff]  ;;  %v157_v33 = vld [vmem:[%s6064_s6 + $0x40] sm:$0xff] }
 0x3d6   :  { %865 = vadd.xlane.f32.xlu0 %v864_v25  ;;  %v861_v45 = vsel %vm379_vm1, %v853_v28, 0.0  ;;  %3856 = vmatprep.subr.bf16.mxu0 %v3855_v35  ;;  %v96_v28 = vld [vmem:[%s6063_s4 + $0x78] sm:$0xff]  ;;  %v150_v46 = vld [vmem:[%s6064_s6 + $0x8] sm:$0xff] }
 0x3d7   :  { %862 = vadd.xlane.f32.xlu1 %v861_v45  ;;  %v3863_v25 = vpack.c.bf16 %v96_v28, %v94_v30  ;;  %v93_v45 = vld [vmem:[%s6063_s4 + $0x60] sm:$0xff]  ;;  %v3868_v19 = vpack.c.bf16 %v150_v46, %v149_v14  ;;  %v152_v35 = vld [vmem:[%s6064_s6 + $0x18] sm:$0xff] }
 0x3d8   :  { %v3865_v36 = vpack.c.bf16 %v95_v42, %v93_v45  ;;  %v3871_v24 = vpack.c.bf16 %v152_v35, %v151_v47 }
 0x3d9   :  { %3858 = vmatpush1.bf16.msra.mxu0 %v3857_v43  ;;  %3869 = vmatpush1.bf16.msra.mxu1 %v3868_v19  ;;  %v154_v43 = vld [vmem:[%s6064_s6 + $0x28] sm:$0xff] }
 0x3da   :  { %3860 = vmatprep.subr.bf16.mxu0 %v3859_v37  ;;  %3870 = vmatprep.subr.bf16.mxu1 %v6076_v13  ;;  %v3874_v32 = vpack.c.bf16 %v154_v43, %v153_v17  ;;  %v156_v37 = vld [vmem:[%s6064_s6 + $0x38] sm:$0xff]  ;;  %v4748_v43 = vld [vmem:[%s6062_s7 + $0x8] sm:$0xf] }
 0x3db   :  { %v3877_v41 = vpack.c.bf16 %v156_v37, %v155_v15  ;;  %v886_v15 = vrot.slane %v4748_v43, %v4352_v26 }
 0x3dd   :  { %3862 = vmatpush1.bf16.msra.mxu0 %v3861_v12  ;;  %3872 = vmatpush1.bf16.msra.mxu1 %v3871_v24  ;;  %v158_v12 = vld [vmem:[%s6064_s6 + $0x48] sm:$0xff] }
 0x3de   :  { %3864 = vmatprep.subr.bf16.mxu0 %v3863_v25  ;;  %3873 = vmatprep.subr.bf16.mxu1 %v6076_v13  ;;  %v3880_v30 = vpack.c.bf16 %v158_v12, %v157_v33 }
 0x3e1   :  { %3866 = vmatpush1.bf16.msra.mxu0 %v3865_v36  ;;  %3875 = vmatpush1.bf16.msra.mxu1 %v3874_v32 }
 0x3e2   :  { %3876 = vmatprep.subr.bf16.mxu1 %v6076_v13 }
 0x3e5   :  { %3878 = vmatpush1.bf16.msra.mxu1 %v3877_v41  ;;  %v894_v41 = vrot.slane %v4748_v43, %v4393_v18 }
 0x3e6   :  { %3879 = vmatprep.subr.bf16.mxu1 %v6076_v13 }
 0x3e9   :  { %3881 = vmatpush1.bf16.msra.mxu1 %v3880_v30 }
 0x3ea   :  { %3882 = vmatprep.subr.bf16.mxu1 %v6076_v13 }
 0x45f   :  { %v860_v28 = vpop.xlane.xlu0 %859 }
 0x460   :  { %v868_v25 = vmul.f32 0.015625, %v860_v28  ;;  %v857_v45 = vpop.xlane.xlu1 %856 }
 0x461   :  { %v867_v42 = vmul.f32 0.015625, %v857_v45 }
 0x462   :  { %v872_v36 = vadd.f32 1e-05, %v868_v25 }
 0x463   :  { %v871_v14 = vadd.f32 1e-05, %v867_v42  ;;  %v866_v46 = vpop.xlane.xlu0 %865 }
 0x464   :  { %4100 = vrsqrt.f32 %v872_v36  ;;  %v870_v47 = vmul.f32 0.015625, %v866_v46  ;;  %v863_v19 = vpop.xlane.xlu1 %862 }
 0x465   :  { %4102 = vrsqrt.f32 %v871_v14  ;;  %v869_v35 = vmul.f32 0.015625, %v863_v19  ;;  %v160_v19 = vld [vmem:[%s6064_s6 + $0x58] sm:$0xff] }
 0x466   :  { %v874_v24 = vadd.f32 1e-05, %v870_v47 }
 0x467   :  { %v873_v17 = vadd.f32 1e-05, %v869_v35 }
 0x469   :  { %4104 = vrsqrt.f32 %v873_v17 }
 0x46a   :  { %4106 = vrsqrt.f32 %v874_v24  ;;  %v161_v24 = vld [vmem:[%s6064_s6 + $0x60] sm:$0xff] }
 0x46e   :  { %v4101_v32 = vpop.eup %4100 }
 0x46f   :  { %v4103_v37 = vpop.eup %4102  ;;  %v880_v12 = vmul.f32 %v4101_v32, %v4640_v29  ;;  %v163_v32 = vld [vmem:[%s6064_s6 + $0x70] sm:$0xff] }
 0x470   :  { %v879_v33 = vmul.f32 %v4103_v37, %v4642_v38 }
 0x471   :  { %v888_v45 = vmul.f32 %v886_v15, %v880_v12 }
 0x472   :  { %v887_v30 = vmul.f32 %v886_v15, %v879_v33  ;;  %v166_v33 = vld [vmem:[%s6064_s6 + $0x88] sm:$0xff] }
 0x473   :  { %v4105_v28 = vpop.eup %4104  ;;  %v896_v14 = vadd.f32 %v894_v41, %v888_v45  ;;  %v169_v45 = vld [vmem:[%s6064_s6 + $0xa0] sm:$0xff] }
 0x474   :  { %v895_v25 = vadd.f32 %v894_v41, %v887_v30  ;;  %v881_v42 = vmul.f32 %v4105_v28, %v4651_v21  ;;  %v4107_v36 = vpop.eup %4106  ;;  %v167_v30 = vld [vmem:[%s6064_s6 + $0x90] sm:$0xff]  ;;  %v168_v28 = vld [vmem:[%s6064_s6 + $0x98] sm:$0xff] }
 0x475   :  { %v882_v47 = vmul.f32 %v4107_v36, %v4648_v16  ;;  %v159_v16 = vld [vmem:[%s6064_s6 + $0x50] sm:$0xff] }
 0x476   :  { %3338 = vmatmul.mubr.msk.f32.vlgmr.msra.gmra.mrb[4].mxu0 %vm379_vm1, %v895_v25  ;;  %v889_v46 = vmul.f32 %v886_v15, %v881_v42  ;;  %v3883_v35 = vpack.c.bf16 %v160_v19, %v159_v16  ;;  %v3895_v25 = vpack.c.bf16 %v168_v28, %v167_v30  ;;  %v170_v42 = vld [vmem:[%s6064_s6 + $0xa8] sm:$0xff] }
 0x477   :  { %992 = vmatprep.mubr.f32.mxu0 %v6078_v50  ;;  %v890_v38 = vmul.f32 %v886_v15, %v882_v47  ;;  %v164_v15 = vld [vmem:[%s6064_s6 + $0x78] sm:$0xff]  ;;  %v3898_v36 = vpack.c.bf16 %v170_v42, %v169_v45 }
 0x478   :  { %v897_v29 = vadd.f32 %v894_v41, %v889_v46  ;;  %3884 = vmatpush1.bf16.msra.mxu1 %v3883_v35  ;;  %v3889_v37 = vpack.c.bf16 %v164_v15, %v163_v32  ;;  %v172_v46 = vld [vmem:[%s6064_s6 + $0xb8] sm:$0xff] }
 0x479   :  { %v898_v21 = vadd.f32 %v894_v41, %v890_v38  ;;  %3885 = vmatprep.subr.bf16.mxu1 %v6076_v13  ;;  %v165_v41 = vld [vmem:[%s6064_s6 + $0x80] sm:$0xff] }
 0x47a   :  { %3339 = vmatmul.mubr.msk.f32.gmra.mrb[6].mxu0 %vm379_vm1, %v896_v14  ;;  %v3892_v12 = vpack.c.bf16 %v166_v33, %v165_v41  ;;  %v171_v14 = vld [vmem:[%s6064_s6 + $0xb0] sm:$0xff] }
 0x47b   :  { %998 = vmatprep.mubr.f32.mxu0 %v6078_v50  ;;  %v3901_v47 = vpack.c.bf16 %v172_v46, %v171_v14 }
 0x47e   :  { %3340 = vmatmul.mubr.msk.f32.gmra.mrb[8].mxu0 %vm379_vm1, %v897_v29  ;;  %v145_v29 = vld [vmem:[%s6065_s5] sm:$0x3] }
 0x47f   :  { %1004 = vmatprep.mubr.f32.mxu0 %v6078_v50  ;;  %v903_v38 = vrot.slane %v145_v29, %v4352_v26 }
 0x482   :  { %3341 = vmatmul.mubr.msk.f32.gmra.mrb[10].mxu0 %vm379_vm1, %v898_v21  ;;  %v907_v21 = vrot.slane %v145_v29, %v4393_v18 }
 0x483   :  { %3681 = vmatprep.mubr.msk.f32.mxu0 %vm453_vm2, %v4384_v5  ;;  %v162_v5 = vld [vmem:[%s6064_s6 + $0x68] sm:$0xff] }
 0x484   :  { %v3886_v17 = vpack.c.bf16 %v162_v5, %v161_v24 }
 0x486   :  { %3887 = vmatpush1.bf16.msra.mxu1 %v3886_v17 }
 0x487   :  { %3888 = vmatprep.subr.bf16.mxu1 %v6076_v13 }
 0x48a   :  { %3890 = vmatpush1.bf16.msra.mxu1 %v3889_v37 }
 0x48b   :  { %3891 = vmatprep.subr.bf16.mxu1 %v6076_v13 }
 0x48e   :  { %3893 = vmatpush1.bf16.msra.mxu1 %v3892_v12 }
 0x48f   :  { %3894 = vmatprep.subr.bf16.mxu1 %v6076_v13 }
 0x492   :  { %3896 = vmatpush1.bf16.msra.mxu1 %v3895_v25 }
 0x493   :  { %3897 = vmatprep.subr.bf16.mxu1 %v6076_v13 }
 0x496   :  { %3899 = vmatpush1.bf16.msra.mxu1 %v3898_v36 }
 0x497   :  { %3900 = vmatprep.subr.bf16.mxu1 %v6076_v13 }
 0x49a   :  { %3902 = vmatpush1.bf16.msra.mxu1 %v3901_v47 }
 0x549   :  { %v988_v16 = vpop.f32.mrb[4].mxu0 }
 0x54a   :  { %v4820_v19 = vadd.f32 %v988_v16, %v903_v38  ;;  %v990_v35 = vpop.f32.mrb[5].mxu0 }
 0x54b   :  { %v991_v24 = vadd.f32 %v990_v35, %v907_v21 }
 0x54c   :  { %v1019_v5 = vmul.f32 0.044715, %v4820_v19 }
 0x54d   :  { %v1020_v17 = vmul.f32 0.044715, %v991_v24  ;;  %v994_v32 = vpop.f32.mrb[6].mxu0 }
 0x54e   :  { %v1027_v15 = vmul.f32 %v1019_v5, %v4820_v19  ;;  %v4824_v37 = vadd.f32 %v994_v32, %v903_v38  ;;  %v996_v41 = vpop.f32.mrb[7].mxu0 }
 0x54f   :  { %v1028_v33 = vmul.f32 %v1020_v17, %v991_v24  ;;  %v4826_v12 = vadd.f32 %v996_v41, %v907_v21 }
 0x550   :  { %v1035_v30 = vmul.f32 %v1027_v15, %v4820_v19  ;;  %v1021_v28 = vmul.f32 0.044715, %v4824_v37 }
 0x551   :  { %v1036_v25 = vmul.f32 %v1028_v33, %v991_v24  ;;  %v1022_v45 = vmul.f32 0.044715, %v4826_v12  ;;  %v1000_v42 = vpop.f32.mrb[8].mxu0 }
 0x552   :  { %v1043_v36 = vadd.f32 %v1035_v30, %v4820_v19  ;;  %v1029_v14 = vmul.f32 %v1021_v28, %v4824_v37  ;;  %v4833_v46 = vadd.f32 %v1000_v42, %v903_v38  ;;  %v1002_v47 = vpop.f32.mrb[9].mxu0 }
 0x553   :  { %v1044_v29 = vadd.f32 %v1036_v25, %v991_v24  ;;  %v1030_v16 = vmul.f32 %v1022_v45, %v4826_v12  ;;  %v4836_v35 = vadd.f32 %v1002_v47, %v907_v21 }
 0x554   :  { %v1051_v5 = vmul.f32 0.7978846, %v1043_v36  ;;  %v1023_v17 = vmul.f32 0.044715, %v4833_v46  ;;  %v1037_v32 = vmul.f32 %v1029_v14, %v4824_v37 }
 0x555   :  { %v1038_v15 = vmul.f32 %v1030_v16, %v4826_v12  ;;  %v1024_v41 = vmul.f32 0.044715, %v4836_v35  ;;  %v1006_v33 = vpop.f32.mrb[10].mxu0  ;;  %v1052_v30 = vmul.f32 0.7978846, %v1044_v29 }
 0x556   :  { %4108 = vtanh.f32 %v1051_v5  ;;  %v1031_v28 = vmul.f32 %v1023_v17, %v4833_v46  ;;  %v4843_v42 = vadd.f32 %v1006_v33, %v903_v38  ;;  %v1008_v25 = vpop.f32.mrb[11].mxu0  ;;  %v1045_v45 = vadd.f32 %v1037_v32, %v4824_v37 }
 0x557   :  { %v1046_v36 = vadd.f32 %v1038_v15, %v4826_v12  ;;  %v1032_v47 = vmul.f32 %v1024_v41, %v4836_v35  ;;  %v1009_v13 = vadd.f32 %v1008_v25, %v907_v21  ;;  %4110 = vtanh.f32 %v1052_v30 }
 0x558   :  { %v1025_v14 = vmul.f32 0.044715, %v4843_v42  ;;  %v1053_v16 = vmul.f32 0.7978846, %v1045_v45  ;;  %v1039_v50 = vmul.f32 %v1031_v28, %v4833_v46 }
 0x559   :  { %v1040_v29 = vmul.f32 %v1032_v47, %v4836_v35  ;;  %v1026_v5 = vmul.f32 0.044715, %v1009_v13  ;;  %v1054_v17 = vmul.f32 0.7978846, %v1046_v36 }
 0x55a   :  { %v1033_v38 = vmul.f32 %v1025_v14, %v4843_v42  ;;  %4112 = vtanh.f32 %v1053_v16  ;;  %v1047_v32 = vadd.f32 %v1039_v50, %v4833_v46  ;;  %v1012_v50 = vmul.f32 0.5, %v991_v24 }
 0x55b   :  { %v1048_v15 = vadd.f32 %v1040_v29, %v4836_v35  ;;  %v1034_v33 = vmul.f32 %v1026_v5, %v1009_v13  ;;  %4114 = vtanh.f32 %v1054_v17  ;;  %v1011_v29 = vmul.f32 0.5, %v4820_v19 }
 0x55c   :  { %v1055_v21 = vmul.f32 0.7978846, %v1047_v32  ;;  %v1041_v41 = vmul.f32 %v1033_v38, %v4843_v42  ;;  %v1015_v19 = vmul.f32 0.5, %v4833_v46  ;;  %v1086_v46 = vrot.slane %v4748_v43, %v4396_v20 }
 0x55d   :  { %v1042_v30 = vmul.f32 %v1034_v33, %v1009_v13  ;;  %v1056_v25 = vmul.f32 0.7978846, %v1048_v15  ;;  %v1014_v33 = vmul.f32 0.5, %v4826_v12 }
 0x55e   :  { %4116 = vtanh.f32 %v1055_v21  ;;  %v1049_v28 = vadd.f32 %v1041_v41, %v4843_v42  ;;  %v1013_v41 = vmul.f32 0.5, %v4824_v37  ;;  %v1018_v37 = vmul.f32 0.5, %v1009_v13 }
 0x55f   :  { %v1050_v45 = vadd.f32 %v1042_v30, %v1009_v13  ;;  %4118 = vtanh.f32 %v1056_v25 }
 0x560   :  { %v4109_v36 = vpop.eup %4108  ;;  %v1057_v47 = vmul.f32 0.7978846, %v1049_v28 }
 0x561   :  { %v4111_v14 = vpop.eup %4110  ;;  %v1067_v16 = vadd.f32 1.0, %v4109_v36  ;;  %v1058_v22 = vmul.f32 0.7978846, %v1050_v45 }
 0x562   :  { %v1068_v18 = vadd.f32 1.0, %v4111_v14  ;;  %4120 = vtanh.f32 %v1057_v47 }
 0x563   :  { %4122 = vtanh.f32 %v1058_v22  ;;  %v1075_v32 = vmul.f32 %v1067_v16, %v1011_v29  ;;  %v1017_v29 = vmul.f32 0.5, %v4843_v42 }
 0x564   :  { %v4113_v5 = vpop.eup %4112  ;;  %v1076_v17 = vmul.f32 %v1068_v18, %v1012_v50  ;;  %v1016_v18 = vmul.f32 0.5, %v4836_v35  ;;  %v6100_v35 = vmov 0.0  }
 0x565   :  { %v4115_v38 = vpop.eup %4114  ;;  %v1069_v15 = vadd.f32 1.0, %v4113_v5 }
 0x566   :  { %3342 = vmatprep.mubr.msk.f32.mxu1 %vm379_vm1, %v1076_v17  ;;  %v1070_v21 = vadd.f32 1.0, %v4115_v38  ;;  %v1187_v38 = vrot.slane %v4748_v43, %v4612_v23 }
 0x567   :  { %1164 = vmatmul.mubr.f32.vlgmr.msra.gmra.mrb[28].mxu1 %v1075_v32  ;;  %v1077_v28 = vmul.f32 %v1069_v15, %v1013_v41 }
 0x568   :  { %v4117_v30 = vpop.eup %4116  ;;  %v1078_v24 = vmul.f32 %v1070_v21, %v1014_v33 }
 0x569   :  { %v4119_v25 = vpop.eup %4118  ;;  %v1071_v45 = vadd.f32 1.0, %v4117_v30 }
 0x56a   :  { %3343 = vmatprep.mubr.msk.f32.mxu1 %vm379_vm1, %v1078_v24  ;;  %v1072_v22 = vadd.f32 1.0, %v4119_v25 }
 0x56b   :  { %1169 = vmatmul.mubr.f32.gmra.mrb[30].mxu1 %v1077_v28  ;;  %v1079_v14 = vmul.f32 %v1071_v45, %v1015_v19 }
 0x56c   :  { %v4121_v36 = vpop.eup %4120  ;;  %v1080_v47 = vmul.f32 %v1072_v22, %v1016_v18 }
 0x56d   :  { %v4123_v12 = vpop.eup %4122  ;;  %v1073_v16 = vadd.f32 1.0, %v4121_v36 }
 0x56e   :  { %3344 = vmatprep.mubr.msk.f32.mxu1 %vm379_vm1, %v1080_v47  ;;  %v1074_v50 = vadd.f32 1.0, %v4123_v12 }
 0x56f   :  { %1174 = vmatmul.mubr.f32.gmra.mrb[32].mxu1 %v1079_v14  ;;  %v1081_v17 = vmul.f32 %v1073_v16, %v1017_v29 }
 0x570   :  { %v1082_v5 = vmul.f32 %v1074_v50, %v1018_v37 }
 0x572   :  { %3345 = vmatprep.mubr.msk.f32.mxu1 %vm379_vm1, %v1082_v5  ;;  %v6101_v5 = vmov 0.0|0.0  }
 0x573   :  { %1179 = vmatmul.mubr.f32.gmra.mrb[34].mxu1 %v1081_v17 }
 0x574   :  { %1648 = vmatprep.mubr.f32.mxu1 %v6100_v35 }
 0x63a   :  { %v1165_v32 = vpop.f32.mrb[28].mxu1 }
 0x63b   :  { %v1166_v15 = vadd.f32 %v1165_v32, %v1086_v46  ;;  %v1167_v13 = vpop.f32.mrb[29].mxu1 }
 0x63d   :  { %v1188_v33 = vmul.f32 %v1187_v38, %v1166_v15 }
 0x63e   :  { %v1170_v21 = vpop.f32.mrb[30].mxu1 }
 0x63f   :  { %v1171_v41 = vadd.f32 %v1170_v21, %v1086_v46  ;;  %v1172_v42 = vpop.f32.mrb[31].mxu1  ;;  %v1192_v30 = vadd.f32 %v1188_v33, %v4406_v40 }
 0x641   :  { %v1189_v24 = vmul.f32 %v1187_v38, %v1171_v41  ;;  %v4874_v19 = vmul.f32 %v1192_v30, %v4354_v27 }
 0x642   :  { %v1175_v25 = vpop.f32.mrb[32].mxu1 }
 0x643   :  { %v1193_v28 = vadd.f32 %v1189_v24, %v4403_v39  ;;  %v1176_v45 = vadd.f32 %v1175_v25, %v1086_v46  ;;  %v1177_v18 = vpop.f32.mrb[33].mxu1 }
 0x645   :  { %v1190_v22 = vmul.f32 %v1187_v38, %v1176_v45  ;;  %v4877_v43 = vmul.f32 %v1193_v28, %v4363_v31 }
 0x646   :  { %v1180_v36 = vpop.f32.mrb[34].mxu1 }
 0x647   :  { %v1181_v47 = vadd.f32 %v1180_v36, %v1086_v46  ;;  %v1182_v12 = vpop.f32.mrb[35].mxu1  ;;  %v3903_v14 = vpack.c.bf16 %v4877_v43, %v4874_v19  ;;  %v1194_v40 = vadd.f32 %v1190_v22, %v4411_v48  ;;  %v4901_v48 = vld [vmem:[%s6061_s2 + $0x20] sm:$0xff] }
 0x649   :  { %v1191_v16 = vmul.f32 %v1187_v38, %v1181_v47  ;;  %3904 = vmatprep.subr.bf16.mxu0 %v3903_v14  ;;  %v4884_v37 = vmul.f32 %v1194_v40, %v4365_v34 }
 0x64a   :  { %3906 = vmatpush3.bf16.msra.mxu0 %v3903_v14 }
 0x64b   :  { %v1195_v39 = vadd.f32 %v1191_v16, %v4414_v49  ;;  %v6102_v49 = vld [vmem:[#allocation4_spill] sm:$0xff] }
 0x64d   :  { %v4887_v50 = vmul.f32 %v1195_v39, %v4371_v44 }
 0x64f   :  { %v3907_v29 = vpack.c.bf16 %v4887_v50, %v4884_v37 }
 0x651   :  { %3908 = vmatprep.subr.bf16.mxu0 %v3907_v29 }
 0x652   :  { %3910 = vmatpush3.bf16.msra.mxu0 %v3907_v29  ;;  %v6105_v29 = vld [vmem:[#allocation6_spill] sm:$0xff] }
 0x653   :  { %3927 = vmatprep.subr.bf16.mxu0 %v6101_v5 }
 0x655   :  { %3682 = vmatmul.mubr.msk.f32.vlgmr.msra.gmra.mrb[12].mxu0 %vm453_vm2, %v4421_v51  ;;  %v6103_v51 = vld [vmem:[#allocation5_spill] sm:$0xff] }
 0x656   :  { %3684 = vmatprep.mubr.msk.f32.mxu0 %vm453_vm2, %v4431_v53 }
 0x659   :  { %3685 = vmatmul.mubr.msk.f32.gmra.mrb[14].mxu0 %vm453_vm2, %v4449_v55 }
 0x65a   :  { %3687 = vmatprep.mubr.msk.f32.mxu0 %vm453_vm2, %v4901_v48 }
 0x65d   :  { %3688 = vmatmul.mubr.msk.f32.gmra.mrb[16].mxu0 %vm453_vm2, %v4426_v52 }
 0x65e   :  { %3690 = vmatprep.mubr.msk.f32.mxu0 %vm453_vm2, %v4436_v54  ;;  %v4954_v54 = vld [vmem:[%s6062_s7 + $0x10] sm:$0xff] }
 0x65f   :  { %v1440_v24 = vrot.slane %v4954_v54, %v4612_v23 }
 0x661   :  { %3691 = vmatmul.mubr.msk.f32.gmra.mrb[18].mxu0 %vm453_vm2, %v4454_v56  ;;  %v1408_v56 = vrot.slane %v4954_v54, %v4352_v26 }
 0x662   :  { %3693 = vmatprep.mubr.msk.f32.mxu0 %vm453_vm2, %v4459_v57 }
 0x665   :  { %3694 = vmatmul.mubr.msk.f32.gmra.mrb[20].mxu0 %vm453_vm2, %v4470_v58  ;;  %v6104_v58 = vld [vmem:[#allocation3_spill] sm:$0xff] }
 0x666   :  { %3696 = vmatprep.mubr.msk.f32.mxu0 %vm453_vm2, %v4475_v59  ;;  %v1416_v59 = vrot.slane %v4954_v54, %v6104_v58 }
 0x669   :  { %3697 = vmatmul.mubr.msk.f32.gmra.mrb[22].mxu0 %vm453_vm2, %v4484_v60 }
 0x66a   :  { %3699 = vmatprep.mubr.msk.f32.mxu0 %vm453_vm2, %v4489_v61 }
 0x66d   :  { %3700 = vmatmul.mubr.msk.f32.gmra.mrb[24].mxu0 %vm453_vm2, %v4498_v62 }
 0x66e   :  { %3702 = vmatprep.mubr.msk.f32.mxu0 %vm453_vm2, %v4503_v63 }
 0x671   :  { %3703 = vmatmul.mubr.msk.f32.gmra.mrb[26].mxu0 %vm453_vm2, %v4512_v0 }
 0x672   :  { %3705 = vmatprep.mubr.msk.f32.mxu0 %vm453_vm2, %v4517_v1 }
 0x675   :  { %3706 = vmatmul.mubr.msk.f32.gmra.mrb[28].mxu0 %vm453_vm2, %v4526_v2 }
 0x676   :  { %3708 = vmatprep.mubr.msk.f32.mxu0 %vm453_vm2, %v4531_v3 }
 0x679   :  { %3709 = vmatmul.mubr.msk.f32.gmra.mrb[30].mxu0 %vm453_vm2, %v4540_v4 }
 0x67a   :  { %3711 = vmatprep.mubr.msk.f32.mxu0 %vm453_vm2, %v4545_v6 }
 0x67d   :  { %3712 = vmatmul.mubr.msk.f32.gmra.mrb[32].mxu0 %vm453_vm2, %v4554_v7 }
 0x67e   :  { %3714 = vmatprep.mubr.msk.f32.mxu0 %vm453_vm2, %v4559_v8 }
 0x681   :  { %3715 = vmatmul.mubr.msk.f32.gmra.mrb[34].mxu0 %vm453_vm2, %v4568_v9  ;;  %v1428_v9 = vrot.slane %v4954_v54, %v4396_v20 }
 0x682   :  { %3717 = vmatprep.mubr.msk.f32.mxu0 %vm453_vm2, %v4573_v10 }
 0x685   :  { %3718 = vmatmul.mubr.msk.f32.gmra.mrb[36].mxu0 %vm453_vm2, %v4582_v11 }
 0x686   :  { %3720 = vmatprep.mubr.msk.f32.mxu0 %vm453_vm2, %v6102_v49  ;;  %v1452_v49 = vrot.slane %v4954_v54, %v6105_v29 }
 0x689   :  { %3721 = vmatmul.mubr.msk.f32.gmra.mrb[38].mxu0 %vm453_vm2, %v6103_v51 }
 0x728   :  { %v3683_v52 = vpop.f32.mrb[12].mxu0 }
 0x729   :  { %v1266_v53 = vpop.f32.mrb[13].mxu0  ;;  %v1410_v61 = vmul.f32 %v3683_v52, %v1408_v56 }
 0x72a   :  { %v1409_v0 = vmul.f32 %v1408_v56, %v1266_v53 }
 0x72c   :  { %v3686_v55 = vpop.f32.mrb[14].mxu0 }
 0x72d   :  { %v1276_v57 = vpop.f32.mrb[15].mxu0  ;;  %v1412_v6 = vmul.f32 %v3686_v55, %v1408_v56 }
 0x72e   :  { %v1411_v10 = vmul.f32 %v1408_v56, %v1276_v57 }
 0x730   :  { %v3689_v60 = vpop.f32.mrb[16].mxu0 }
 0x731   :  { %v1418_v62 = vmul.f32 %v3689_v60, %v1416_v59  ;;  %v1286_v63 = vpop.f32.mrb[17].mxu0 }
 0x732   :  { %v1417_v1 = vmul.f32 %v1416_v59, %v1286_v63 }
 0x733   :  { %v1422_v2 = vadd.f32 %v1418_v62, %v1410_v61 }
 0x734   :  { %v1421_v3 = vadd.f32 %v1417_v1, %v1409_v0  ;;  %v3692_v4 = vpop.f32.mrb[18].mxu0  ;;  %v6106_v1 = vld [vmem:[#allocation7_spill] sm:$0xff] }
 0x735   :  { %v1420_v7 = vmul.f32 %v3692_v4, %v1416_v59  ;;  %v1296_v8 = vpop.f32.mrb[19].mxu0 }
 0x736   :  { %v1419_v11 = vmul.f32 %v1416_v59, %v1296_v8 }
 0x737   :  { %v1424_v17 = vadd.f32 %v1420_v7, %v1412_v6 }
 0x738   :  { %v1423_v46 = vadd.f32 %v1419_v11, %v1411_v10  ;;  %v3695_v38 = vpop.f32.mrb[20].mxu0 }
 0x739   :  { %v1430_v32 = vmul.f32 %v3695_v38, %v1428_v9  ;;  %v1306_v15 = vpop.f32.mrb[21].mxu0 }
 0x73a   :  { %v1429_v13 = vmul.f32 %v1428_v9, %v1306_v15  ;;  %v6107_v15 = vld [vmem:[#allocation8_spill] sm:$0xff] }
 0x73b   :  { %v1434_v33 = vadd.f32 %v1430_v32, %v1422_v2  ;;  %v1464_v2 = vrot.slane %v4954_v54, %v6106_v1 }
 0x73c   :  { %v1433_v21 = vadd.f32 %v1429_v13, %v1421_v3  ;;  %v3698_v41 = vpop.f32.mrb[22].mxu0  ;;  %v1476_v13 = vrot.slane %v4954_v54, %v6107_v15 }
 0x73d   :  { %v1432_v42 = vmul.f32 %v3698_v41, %v1428_v9  ;;  %v1316_v30 = vpop.f32.mrb[23].mxu0 }
 0x73e   :  { %v1431_v25 = vmul.f32 %v1428_v9, %v1316_v30 }
 0x73f   :  { %v1436_v28 = vadd.f32 %v1432_v42, %v1424_v17 }
 0x740   :  { %v1435_v45 = vadd.f32 %v1431_v25, %v1423_v46  ;;  %v3701_v18 = vpop.f32.mrb[24].mxu0  ;;  %v6108_v25 = vld [vmem:[#allocation9_spill] sm:$0xff] }
 0x741   :  { %v1442_v22 = vmul.f32 %v3701_v18, %v1440_v24  ;;  %v1326_v36 = vpop.f32.mrb[25].mxu0 }
 0x742   :  { %v1441_v47 = vmul.f32 %v1440_v24, %v1326_v36 }
 0x743   :  { %v1446_v12 = vadd.f32 %v1442_v22, %v1434_v33 }
 0x744   :  { %v1445_v14 = vadd.f32 %v1441_v47, %v1433_v21  ;;  %v3704_v40 = vpop.f32.mrb[26].mxu0 }
 0x745   :  { %v1444_v16 = vmul.f32 %v3704_v40, %v1440_v24  ;;  %v1336_v39 = vpop.f32.mrb[27].mxu0 }
 0x746   :  { %v1443_v51 = vmul.f32 %v1440_v24, %v1336_v39 }
 0x747   :  { %v1448_v52 = vadd.f32 %v1444_v16, %v1436_v28  ;;  %v1488_v28 = vrot.slane %v4954_v54, %v6108_v25 }
 0x748   :  { %v1447_v53 = vadd.f32 %v1443_v51, %v1435_v45  ;;  %v3707_v55 = vpop.f32.mrb[28].mxu0 }
 0x749   :  { %v1454_v56 = vmul.f32 %v3707_v55, %v1452_v49  ;;  %v1346_v57 = vpop.f32.mrb[29].mxu0 }
 0x74a   :  { %v1453_v59 = vmul.f32 %v1452_v49, %v1346_v57 }
 0x74b   :  { %v1458_v60 = vadd.f32 %v1454_v56, %v1446_v12 }
 0x74c   :  { %v1457_v61 = vadd.f32 %v1453_v59, %v1445_v14  ;;  %v3710_v62 = vpop.f32.mrb[30].mxu0 }
 0x74d   :  { %v1456_v63 = vmul.f32 %v3710_v62, %v1452_v49  ;;  %v1356_v0 = vpop.f32.mrb[31].mxu0 }
 0x74e   :  { %v1455_v3 = vmul.f32 %v1452_v49, %v1356_v0 }
 0x74f   :  { %v1460_v4 = vadd.f32 %v1456_v63, %v1448_v52 }
 0x750   :  { %v1459_v6 = vadd.f32 %v1455_v3, %v1447_v53  ;;  %v3713_v7 = vpop.f32.mrb[32].mxu0 }
 0x751   :  { %v1466_v8 = vmul.f32 %v3713_v7, %v1464_v2  ;;  %v1366_v9 = vpop.f32.mrb[33].mxu0 }
 0x752   :  { %v1465_v10 = vmul.f32 %v1464_v2, %v1366_v9 }
 0x753   :  { %v1470_v11 = vadd.f32 %v1466_v8, %v1458_v60 }
 0x754   :  { %v1469_v17 = vadd.f32 %v1465_v10, %v1457_v61  ;;  %v3716_v46 = vpop.f32.mrb[34].mxu0 }
 0x755   :  { %v1468_v38 = vmul.f32 %v3716_v46, %v1464_v2  ;;  %v1376_v32 = vpop.f32.mrb[35].mxu0 }
 0x756   :  { %v1467_v33 = vmul.f32 %v1464_v2, %v1376_v32 }
 0x757   :  { %v1472_v21 = vadd.f32 %v1468_v38, %v1460_v4 }
 0x758   :  { %v1471_v41 = vadd.f32 %v1467_v33, %v1459_v6  ;;  %v3719_v42 = vpop.f32.mrb[36].mxu0  ;;  %v100_v33 = vld [vmem:[%s6063_s4 + $0x98] sm:$0xff] }
 0x759   :  { %v1478_v30 = vmul.f32 %v3719_v42, %v1476_v13  ;;  %v1386_v24 = vpop.f32.mrb[37].mxu0  ;;  %v99_v42 = vld [vmem:[%s6063_s4 + $0x90] sm:$0xff] }
 0x75a   :  { %v1477_v45 = vmul.f32 %v1476_v13, %v1386_v24  ;;  %v102_v24 = vld [vmem:[%s6063_s4 + $0xa8] sm:$0xff] }
 0x75b   :  { %v1482_v18 = vadd.f32 %v1478_v30, %v1470_v11 }
 0x75c   :  { %v1481_v22 = vadd.f32 %v1477_v45, %v1469_v17  ;;  %v3722_v36 = vpop.f32.mrb[38].mxu0 }
 0x75d   :  { %v1480_v47 = vmul.f32 %v3722_v36, %v1476_v13  ;;  %v1396_v12 = vpop.f32.mrb[39].mxu0  ;;  %v1490_v14 = vadd.f32 %v1488_v28, %v1482_v18  ;;  %v101_v18 = vld [vmem:[%s6063_s4 + $0xa0] sm:$0xff] }
 0x75e   :  { %v1479_v40 = vmul.f32 %v1476_v13, %v1396_v12  ;;  %v1489_v16 = vadd.f32 %v1488_v28, %v1481_v22  ;;  %v98_v13 = vld [vmem:[%s6063_s4 + $0x88] sm:$0xff]  ;;  %v103_v22 = vld [vmem:[%s6063_s4 + $0xb0] sm:$0xff]  ;;  %v108_v12 = vld [vmem:[%s6063_s4 + $0xd8] sm:$0xff] }
 0x75f   :  { %v1484_v39 = vadd.f32 %v1480_v47, %v1472_v21  ;;  %v1496_v49 = vsel %vm379_vm1, %v1490_v14, 0.0  ;;  %v3911_v21 = vpack.c.bf16 %v100_v33, %v98_v13  ;;  %v3917_v36 = vpack.c.bf16 %v103_v22, %v101_v18  ;;  %v106_v47 = vld [vmem:[%s6063_s4 + $0xc8] sm:$0xff]  ;;  %v5082_v22 = vld [vmem:[%s6062_s7 + $0x18] sm:$0xf] }
 0x760   :  { %v1483_v51 = vadd.f32 %v1479_v40, %v1471_v41  ;;  %1497 = vadd.xlane.f32.xlu0 %v1496_v49  ;;  %v1493_v52 = vsel %vm379_vm1, %v1489_v16, 0.0  ;;  %v97_v41 = vld [vmem:[%s6063_s4 + $0x80] sm:$0xff]  ;;  %v110_v49 = vld [vmem:[%s6063_s4 + $0xe8] sm:$0xff] }
 0x761   :  { %1494 = vadd.xlane.f32.xlu1 %v1493_v52  ;;  %v1492_v53 = vadd.f32 %v1488_v28, %v1484_v39  ;;  %v3913_v30 = vpack.c.bf16 %v99_v42, %v97_v41  ;;  %3912 = vmatprep.subr.bf16.mxu1 %v3911_v21  ;;  %v105_v40 = vld [vmem:[%s6063_s4 + $0xc0] sm:$0xff] }
 0x762   :  { %v1491_v55 = vadd.f32 %v1488_v28, %v1483_v51  ;;  %v104_v28 = vld [vmem:[%s6063_s4 + $0xb8] sm:$0xff] }
 0x763   :  { %v1502_v54 = vsel %vm379_vm1, %v1492_v53, 0.0  ;;  %3914 = vmatpush1.bf16.msra.mxu1 %v3913_v30  ;;  %v3915_v45 = vpack.c.bf16 %v104_v28, %v102_v24  ;;  %v112_v51 = vld [vmem:[%s6063_s4 + $0xf8] sm:$0xff] }
 0x764   :  { %1503 = vadd.xlane.f32.xlu0 %v1502_v54  ;;  %v1499_v56 = vsel %vm379_vm1, %v1491_v55, 0.0  ;;  %v3923_v52 = vpack.c.bf16 %v112_v51, %v110_v49 }
 0x765   :  { %1500 = vadd.xlane.f32.xlu1 %v1499_v56  ;;  %3916 = vmatprep.subr.bf16.mxu1 %v3915_v45  ;;  %v173_v56 = vld [vmem:[%s6064_s6 + $0xc0] sm:$0xff] }
 0x767   :  { %3918 = vmatpush1.bf16.msra.mxu1 %v3917_v36 }
 0x7ed   :  { %v1498_v57 = vpop.xlane.xlu0 %1497 }
 0x7ee   :  { %v1506_v59 = vmul.f32 0.015625, %v1498_v57  ;;  %v1495_v60 = vpop.xlane.xlu1 %1494  ;;  %v174_v57 = vld [vmem:[%s6064_s6 + $0xc8] sm:$0xff] }
 0x7ef   :  { %v1505_v61 = vmul.f32 0.015625, %v1495_v60  ;;  %v3928_v60 = vpack.c.bf16 %v174_v57, %v173_v56 }
 0x7f0   :  { %v4976_v62 = vsub.f32 %v1490_v14, %v1506_v59  ;;  %v3919_v14 = vpack.c.bf16 %v108_v12, %v106_v47  ;;  %v175_v59 = vld [vmem:[%s6064_s6 + $0xd0] sm:$0xff]  ;;  %v1548_v47 = vrot.slane %v5082_v22, %v4352_v26 }
 0x7f1   :  { %v4978_v63 = vsub.f32 %v1489_v16, %v1505_v61  ;;  %v1504_v0 = vpop.xlane.xlu0 %1503  ;;  %v107_v16 = vld [vmem:[%s6063_s4 + $0xd0] sm:$0xff]  ;;  %v176_v61 = vld [vmem:[%s6064_s6 + $0xd8] sm:$0xff]  ;;  %3929 = vmatpush1.bf16.msra.mxu0 %v3928_v60 }
 0x7f2   :  { %v1508_v2 = vmul.f32 0.015625, %v1504_v0  ;;  %v1501_v3 = vpop.xlane.xlu1 %1500  ;;  %v1514_v4 = vmul.f32 %v4976_v62, %v4976_v62  ;;  %v3921_v39 = vpack.c.bf16 %v107_v16, %v105_v40  ;;  %3920 = vmatprep.subr.bf16.mxu1 %v3919_v14  ;;  %v3931_v0 = vpack.c.bf16 %v176_v61, %v175_v59  ;;  %3930 = vmatprep.subr.bf16.mxu0 %v6101_v5  ;;  %v5102_v59 = vld [vmem:[%s6061_s2] sm:$0xff]  ;;  %v184_v60 = vld [vmem:[%s6064_s6 + $0x118] sm:$0xff] }
 0x7f3   :  { %v1507_v6 = vmul.f32 0.015625, %v1501_v3  ;;  %v1513_v7 = vmul.f32 %v4978_v63, %v4978_v63  ;;  %v178_v3 = vld [vmem:[%s6064_s6 + $0xe8] sm:$0xff]  ;;  %v1556_v14 = vrot.slane %v5082_v22, %v6104_v58 }
 0x7f4   :  { %v4984_v8 = vsub.f32 %v1492_v53, %v1508_v2  ;;  %v1520_v9 = vsel %vm379_vm1, %v1514_v4, 0.0  ;;  %3922 = vmatpush1.bf16.msra.mxu1 %v3921_v39  ;;  %v109_v53 = vld [vmem:[%s6063_s4 + $0xe0] sm:$0xff] }
 0x7f5   :  { %v4987_v10 = vsub.f32 %v1491_v55, %v1507_v6  ;;  %1521 = vadd.xlane.f32.xlu0 %v1520_v9  ;;  %v1517_v11 = vsel %vm379_vm1, %v1513_v7, 0.0  ;;  %v111_v55 = vld [vmem:[%s6063_s4 + $0xf0] sm:$0xff]  ;;  %3924 = vmatprep.subr.bf16.mxu1 %v3923_v52  ;;  %v177_v2 = vld [vmem:[%s6064_s6 + $0xe0] sm:$0xff]  ;;  %v180_v7 = vld [vmem:[%s6064_s6 + $0xf8] sm:$0xff] }
 0x7f6   :  { %1518 = vadd.xlane.f32.xlu1 %v1517_v11  ;;  %v1516_v17 = vmul.f32 %v4984_v8, %v4984_v8  ;;  %v3925_v54 = vpack.c.bf16 %v111_v55, %v109_v53  ;;  %3932 = vmatpush1.bf16.msra.mxu0 %v3931_v0  ;;  %v3934_v4 = vpack.c.bf16 %v178_v3, %v177_v2  ;;  %v179_v6 = vld [vmem:[%s6064_s6 + $0xf0] sm:$0xff]  ;;  %v181_v11 = vld [vmem:[%s6064_s6 + $0x100] sm:$0xff]  ;;  %v186_v2 = vld [vmem:[%s6064_s6 + $0x128] sm:$0xff] }
 0x7f7   :  { %v1515_v46 = vmul.f32 %v4987_v10, %v4987_v10  ;;  %3933 = vmatprep.subr.bf16.mxu0 %v6101_v5  ;;  %v3937_v9 = vpack.c.bf16 %v180_v7, %v179_v6  ;;  %v185_v0 = vld [vmem:[%s6064_s6 + $0x120] sm:$0xff]  ;;  %v188_v6 = vld [vmem:[%s6064_s6 + $0x138] sm:$0xff] }
 0x7f8   :  { %v1526_v38 = vsel %vm379_vm1, %v1516_v17, 0.0  ;;  %3926 = vmatpush1.bf16.msra.mxu1 %v3925_v54  ;;  %v182_v17 = vld [vmem:[%s6064_s6 + $0x108] sm:$0xff]  ;;  %v3946_v3 = vpack.c.bf16 %v186_v2, %v185_v0 }
 0x7f9   :  { %1527 = vadd.xlane.f32.xlu0 %v1526_v38  ;;  %v1523_v32 = vsel %vm379_vm1, %v1515_v46, 0.0  ;;  %v3940_v46 = vpack.c.bf16 %v182_v17, %v181_v11  ;;  %v190_v11 = vld [vmem:[%s6064_s6 + $0x148] sm:$0xff] }
 0x7fa   :  { %1524 = vadd.xlane.f32.xlu1 %v1523_v32  ;;  %3935 = vmatpush1.bf16.msra.mxu0 %v3934_v4  ;;  %v187_v4 = vld [vmem:[%s6064_s6 + $0x130] sm:$0xff] }
 0x7fb   :  { %3936 = vmatprep.subr.bf16.mxu0 %v6101_v5  ;;  %v3949_v7 = vpack.c.bf16 %v188_v6, %v187_v4 }
 0x7fe   :  { %3938 = vmatpush1.bf16.msra.mxu0 %v3937_v9  ;;  %v189_v9 = vld [vmem:[%s6064_s6 + $0x140] sm:$0xff] }
 0x7ff   :  { %3939 = vmatprep.subr.bf16.mxu0 %v6101_v5  ;;  %v3952_v17 = vpack.c.bf16 %v190_v11, %v189_v9 }
 0x802   :  { %3941 = vmatpush1.bf16.msra.mxu0 %v3940_v46  ;;  %v191_v46 = vld [vmem:[%s6064_s6 + $0x150] sm:$0xff] }
 0x803   :  { %3942 = vmatprep.subr.bf16.mxu0 %v6101_v5 }
 0x882   :  { %v1522_v38 = vpop.xlane.xlu0 %1521 }
 0x883   :  { %v1530_v32 = vmul.f32 0.015625, %v1522_v38  ;;  %v1519_v13 = vpop.xlane.xlu1 %1518  ;;  %v192_v38 = vld [vmem:[%s6064_s6 + $0x158] sm:$0xff] }
 0x884   :  { %v1529_v33 = vmul.f32 0.015625, %v1519_v13  ;;  %v193_v13 = vld [vmem:[%s6064_s6 + $0x160] sm:$0xff] }
 0x885   :  { %v1534_v21 = vadd.f32 1e-05, %v1530_v32  ;;  %v3955_v32 = vpack.c.bf16 %v192_v38, %v191_v46 }
 0x886   :  { %v1533_v41 = vadd.f32 1e-05, %v1529_v33  ;;  %v1528_v42 = vpop.xlane.xlu0 %1527  ;;  %v194_v33 = vld [vmem:[%s6064_s6 + $0x168] sm:$0xff] }
 0x887   :  { %4124 = vrsqrt.f32 %v1534_v21  ;;  %v1532_v30 = vmul.f32 0.015625, %v1528_v42  ;;  %v1525_v24 = vpop.xlane.xlu1 %1524  ;;  %v3958_v21 = vpack.c.bf16 %v194_v33, %v193_v13  ;;  %v196_v42 = vld [vmem:[%s6064_s6 + $0x178] sm:$0xff] }
 0x888   :  { %4126 = vrsqrt.f32 %v1533_v41  ;;  %v1531_v28 = vmul.f32 0.015625, %v1525_v24  ;;  %v195_v41 = vld [vmem:[%s6064_s6 + $0x170] sm:$0xff]  ;;  %v146_v24 = vld [vmem:[%s6065_s5 + $0x2] sm:$0x3] }
 0x889   :  { %v1536_v45 = vadd.f32 1e-05, %v1532_v30  ;;  %v3961_v30 = vpack.c.bf16 %v196_v42, %v195_v41 }
 0x88a   :  { %v1535_v18 = vadd.f32 1e-05, %v1531_v28  ;;  %v1565_v28 = vrot.slane %v146_v24, %v4352_v26 }
 0x88c   :  { %4128 = vrsqrt.f32 %v1535_v18 }
 0x88d   :  { %4130 = vrsqrt.f32 %v1536_v45  ;;  %v1569_v45 = vrot.slane %v146_v24, %v6104_v58 }
 0x891   :  { %v4125_v36 = vpop.eup %4124 }
 0x892   :  { %v4127_v12 = vpop.eup %4126  ;;  %v1542_v16 = vmul.f32 %v4125_v36, %v4976_v62 }
 0x893   :  { %v1541_v40 = vmul.f32 %v4127_v12, %v4978_v63 }
 0x894   :  { %v1550_v52 = vmul.f32 %v1548_v47, %v1542_v16 }
 0x895   :  { %v1549_v39 = vmul.f32 %v1548_v47, %v1541_v40 }
 0x896   :  { %v4129_v49 = vpop.eup %4128  ;;  %v1558_v54 = vadd.f32 %v1556_v14, %v1550_v52 }
 0x897   :  { %v1557_v51 = vadd.f32 %v1556_v14, %v1549_v39  ;;  %v1543_v53 = vmul.f32 %v4129_v49, %v4987_v10  ;;  %v4131_v55 = vpop.eup %4130 }
 0x898   :  { %v1544_v57 = vmul.f32 %v4131_v55, %v4984_v8  ;;  %v183_v8 = vld [vmem:[%s6064_s6 + $0x110] sm:$0xff] }
 0x899   :  { %3374 = vmatmul.mubr.msk.f32.vlgmr.msra.gmra.mrb[36].mxu1 %vm379_vm1, %v1557_v51  ;;  %v1551_v56 = vmul.f32 %v1548_v47, %v1543_v53  ;;  %v3943_v61 = vpack.c.bf16 %v184_v60, %v183_v8 }
 0x89a   :  { %1654 = vmatprep.mubr.f32.mxu1 %v6100_v35  ;;  %v1552_v63 = vmul.f32 %v1548_v47, %v1544_v57 }
 0x89b   :  { %v1559_v62 = vadd.f32 %v1556_v14, %v1551_v56  ;;  %3944 = vmatpush1.bf16.msra.mxu0 %v3943_v61 }
 0x89c   :  { %v1560_v10 = vadd.f32 %v1556_v14, %v1552_v63  ;;  %3945 = vmatprep.subr.bf16.mxu0 %v6101_v5 }
 0x89d   :  { %3375 = vmatmul.mubr.msk.f32.gmra.mrb[38].mxu1 %vm379_vm1, %v1558_v54 }
 0x89e   :  { %1660 = vmatprep.mubr.f32.mxu1 %v6100_v35 }
 0x89f   :  { %3947 = vmatpush1.bf16.msra.mxu0 %v3946_v3 }
 0x8a0   :  { %3948 = vmatprep.subr.bf16.mxu0 %v6101_v5 }
 0x8a1   :  { %3376 = vmatmul.mubr.msk.f32.gmra.mrb[40].mxu1 %vm379_vm1, %v1559_v62 }
 0x8a2   :  { %1666 = vmatprep.mubr.f32.mxu1 %v6100_v35 }
 0x8a3   :  { %3950 = vmatpush1.bf16.msra.mxu0 %v3949_v7 }
 0x8a4   :  { %3951 = vmatprep.subr.bf16.mxu0 %v6101_v5 }
 0x8a5   :  { %3377 = vmatmul.mubr.msk.f32.gmra.mrb[42].mxu1 %vm379_vm1, %v1560_v10 }
 0x8a6   :  { %3731 = vmatprep.mubr.msk.f32.mxu1 %vm453_vm2, %v5102_v59 }
 0x8a7   :  { %3953 = vmatpush1.bf16.msra.mxu0 %v3952_v17 }
 0x8a8   :  { %3954 = vmatprep.subr.bf16.mxu0 %v6101_v5 }
 0x8ab   :  { %3956 = vmatpush1.bf16.msra.mxu0 %v3955_v32 }
 0x8ac   :  { %3957 = vmatprep.subr.bf16.mxu0 %v6101_v5 }
 0x8af   :  { %3959 = vmatpush1.bf16.msra.mxu0 %v3958_v21 }
 0x8b0   :  { %3960 = vmatprep.subr.bf16.mxu0 %v6101_v5 }
 0x8b3   :  { %3962 = vmatpush1.bf16.msra.mxu0 %v3961_v30 }
 0x96c   :  { %v1650_v18 = vpop.f32.mrb[36].mxu1 }
 0x96d   :  { %v5159_v36 = vadd.f32 %v1650_v18, %v1565_v28  ;;  %v1652_v47 = vpop.f32.mrb[37].mxu1 }
 0x96e   :  { %v1653_v12 = vadd.f32 %v1652_v47, %v1569_v45 }
 0x96f   :  { %v1681_v14 = vmul.f32 0.044715, %v5159_v36 }
 0x970   :  { %v1682_v40 = vmul.f32 0.044715, %v1653_v12  ;;  %v1656_v16 = vpop.f32.mrb[38].mxu1 }
 0x971   :  { %v1689_v39 = vmul.f32 %v1681_v14, %v5159_v36  ;;  %v5163_v49 = vadd.f32 %v1656_v16, %v1565_v28  ;;  %v1658_v51 = vpop.f32.mrb[39].mxu1 }
 0x972   :  { %v1690_v52 = vmul.f32 %v1682_v40, %v1653_v12  ;;  %v5165_v53 = vadd.f32 %v1658_v51, %v1569_v45 }
 0x973   :  { %v1697_v55 = vmul.f32 %v1689_v39, %v5159_v36  ;;  %v1683_v54 = vmul.f32 0.044715, %v5163_v49 }
 0x974   :  { %v1698_v56 = vmul.f32 %v1690_v52, %v1653_v12  ;;  %v1684_v57 = vmul.f32 0.044715, %v5165_v53  ;;  %v1662_v62 = vpop.f32.mrb[40].mxu1 }
 0x975   :  { %v1705_v63 = vadd.f32 %v1697_v55, %v5159_v36  ;;  %v1691_v10 = vmul.f32 %v1683_v54, %v5163_v49  ;;  %v5172_v8 = vadd.f32 %v1662_v62, %v1565_v28  ;;  %v1664_v60 = vpop.f32.mrb[41].mxu1 }
 0x976   :  { %v1706_v61 = vadd.f32 %v1698_v56, %v1653_v12  ;;  %v1692_v0 = vmul.f32 %v1684_v57, %v5165_v53  ;;  %v5175_v2 = vadd.f32 %v1664_v60, %v1569_v45 }
 0x977   :  { %v1713_v3 = vmul.f32 0.7978846, %v1705_v63  ;;  %v1685_v4 = vmul.f32 0.044715, %v5172_v8  ;;  %v1699_v6 = vmul.f32 %v1691_v10, %v5163_v49 }
 0x978   :  { %v1700_v7 = vmul.f32 %v1692_v0, %v5165_v53  ;;  %v1686_v9 = vmul.f32 0.044715, %v5175_v2  ;;  %v1668_v11 = vpop.f32.mrb[42].mxu1  ;;  %v1714_v17 = vmul.f32 0.7978846, %v1706_v61  ;;  %v1674_v61 = vmul.f32 0.5, %v1653_v12 }
 0x979   :  { %4132 = vtanh.f32 %v1713_v3  ;;  %v1693_v46 = vmul.f32 %v1685_v4, %v5172_v8  ;;  %v5182_v38 = vadd.f32 %v1668_v11, %v1565_v28  ;;  %v1670_v32 = vpop.f32.mrb[43].mxu1  ;;  %v1707_v13 = vadd.f32 %v1699_v6, %v5163_v49 }
 0x97a   :  { %v1708_v33 = vadd.f32 %v1700_v7, %v5165_v53  ;;  %v1694_v21 = vmul.f32 %v1686_v9, %v5175_v2  ;;  %v1671_v41 = vadd.f32 %v1670_v32, %v1569_v45  ;;  %4134 = vtanh.f32 %v1714_v17 }
 0x97b   :  { %v1687_v42 = vmul.f32 0.044715, %v5182_v38  ;;  %v1715_v30 = vmul.f32 0.7978846, %v1707_v13  ;;  %v1701_v24 = vmul.f32 %v1693_v46, %v5172_v8  ;;  %v1673_v3 = vmul.f32 0.5, %v5159_v36 }
 0x97c   :  { %v1702_v18 = vmul.f32 %v1694_v21, %v5175_v2  ;;  %v1688_v47 = vmul.f32 0.044715, %v1671_v41  ;;  %v1716_v14 = vmul.f32 0.7978846, %v1708_v33  ;;  %v1676_v17 = vmul.f32 0.5, %v5165_v53 }
 0x97d   :  { %v1695_v28 = vmul.f32 %v1687_v42, %v5182_v38  ;;  %4136 = vtanh.f32 %v1715_v30  ;;  %v1709_v40 = vadd.f32 %v1701_v24, %v5172_v8  ;;  %v1675_v32 = vmul.f32 0.5, %v5163_v49 }
 0x97e   :  { %v1710_v16 = vadd.f32 %v1702_v18, %v5175_v2  ;;  %v1696_v39 = vmul.f32 %v1688_v47, %v1671_v41  ;;  %4138 = vtanh.f32 %v1716_v14  ;;  %v1678_v36 = vmul.f32 0.5, %v5175_v2 }
 0x97f   :  { %v1717_v45 = vmul.f32 0.7978846, %v1709_v40  ;;  %v1703_v51 = vmul.f32 %v1695_v28, %v5182_v38  ;;  %v1677_v24 = vmul.f32 0.5, %v5172_v8  ;;  %v1680_v49 = vmul.f32 0.5, %v1671_v41 }
 0x980   :  { %v1704_v52 = vmul.f32 %v1696_v39, %v1671_v41  ;;  %v1718_v55 = vmul.f32 0.7978846, %v1710_v16  ;;  %v1679_v16 = vmul.f32 0.5, %v5182_v38  ;;  %v1748_v8 = vrot.slane %v5082_v22, %v4396_v20 }
 0x981   :  { %4140 = vtanh.f32 %v1717_v45  ;;  %v1711_v54 = vadd.f32 %v1703_v51, %v5182_v38  ;;  %v1849_v2 = vrot.slane %v5082_v22, %v4612_v23 }
 0x982   :  { %v1712_v56 = vadd.f32 %v1704_v52, %v1671_v41  ;;  %4142 = vtanh.f32 %v1718_v55 }
 0x983   :  { %v4133_v57 = vpop.eup %4132  ;;  %v1719_v62 = vmul.f32 0.7978846, %v1711_v54 }
 0x984   :  { %v4135_v63 = vpop.eup %4134  ;;  %v1729_v10 = vadd.f32 1.0, %v4133_v57  ;;  %v1720_v60 = vmul.f32 0.7978846, %v1712_v56 }
 0x985   :  { %v1730_v0 = vadd.f32 1.0, %v4135_v63  ;;  %4144 = vtanh.f32 %v1719_v62 }
 0x986   :  { %4146 = vtanh.f32 %v1720_v60  ;;  %v1737_v9 = vmul.f32 %v1729_v10, %v1673_v3 }
 0x987   :  { %v4137_v4 = vpop.eup %4136  ;;  %v1738_v6 = vmul.f32 %v1730_v0, %v1674_v61 }
 0x988   :  { %v4139_v7 = vpop.eup %4138  ;;  %v1731_v11 = vadd.f32 1.0, %v4137_v4 }
 0x989   :  { %3378 = vmatprep.mubr.msk.f32.mxu0 %vm379_vm1, %v1738_v6  ;;  %v1732_v46 = vadd.f32 1.0, %v4139_v7 }
 0x98a   :  { %1826 = vmatmul.mubr.f32.vlgmr.msra.gmra.mrb[40].mxu0 %v1737_v9  ;;  %v1739_v21 = vmul.f32 %v1731_v11, %v1675_v32 }
 0x98b   :  { %v4141_v13 = vpop.eup %4140  ;;  %v1740_v12 = vmul.f32 %v1732_v46, %v1676_v17 }
 0x98c   :  { %v4143_v33 = vpop.eup %4142  ;;  %v1733_v42 = vadd.f32 1.0, %v4141_v13  ;;  %v5248_v13 = vld [vmem:[%s6061_s2 + $0x18] sm:$0xff] }
 0x98d   :  { %3379 = vmatprep.mubr.msk.f32.mxu0 %vm379_vm1, %v1740_v12  ;;  %v1734_v30 = vadd.f32 1.0, %v4143_v33  ;;  %v5257_v12 = vld [vmem:[%s6061_s2 + $0x28] sm:$0xff]  ;;  %v5264_v33 = vld [vmem:[%s6061_s2 + $0x30] sm:$0xff] }
 0x98e   :  { %1831 = vmatmul.mubr.f32.gmra.mrb[42].mxu0 %v1739_v21  ;;  %v1741_v14 = vmul.f32 %v1733_v42, %v1677_v24  ;;  %v5278_v21 = vld [vmem:[%s6061_s2 + $0x40] sm:$0xff]  ;;  %v5285_v42 = vld [vmem:[%s6061_s2 + $0x48] sm:$0xff] }
 0x98f   :  { %v4145_v18 = vpop.eup %4144  ;;  %v1742_v47 = vmul.f32 %v1734_v30, %v1678_v36  ;;  %v5292_v36 = vld [vmem:[%s6061_s2 + $0x50] sm:$0xff]  ;;  %v5299_v30 = vld [vmem:[%s6061_s2 + $0x58] sm:$0xff]  ;;  %v5306_v24 = vld [vmem:[%s6061_s2 + $0x60] sm:$0xff] }
 0x990   :  { %v4147_v53 = vpop.eup %4146  ;;  %v1735_v28 = vadd.f32 1.0, %v4145_v18  ;;  %v5313_v18 = vld [vmem:[%s6061_s2 + $0x68] sm:$0xff] }
 0x991   :  { %3380 = vmatprep.mubr.msk.f32.mxu0 %vm379_vm1, %v1742_v47  ;;  %v1736_v40 = vadd.f32 1.0, %v4147_v53  ;;  %v5320_v47 = vld [vmem:[%s6061_s2 + $0x70] sm:$0xff]  ;;  %v5327_v53 = vld [vmem:[%s6061_s2 + $0x78] sm:$0xff] }
 0x992   :  { %1836 = vmatmul.mubr.f32.gmra.mrb[44].mxu0 %v1741_v14  ;;  %v1743_v45 = vmul.f32 %v1735_v28, %v1679_v16  ;;  %v5334_v14 = vld [vmem:[%s6061_s2 + $0x80] sm:$0xff]  ;;  %v5341_v28 = vld [vmem:[%s6061_s2 + $0x88] sm:$0xff] }
 0x993   :  { %v1744_v39 = vmul.f32 %v1736_v40, %v1680_v49  ;;  %v5348_v49 = vld [vmem:[%s6061_s2 + $0x90] sm:$0xff]  ;;  %v5355_v40 = vld [vmem:[%s6061_s2 + $0x98] sm:$0xff]  ;;  %v5362_v16 = vld [vmem:[%s6061_s2 + $0xa0] sm:$0xff] }
 0x994   :  { %6109 = vst [vmem:[#allocation4_spill] sm:$0xff] %v5355_v40  ;;  %6110 = vst [vmem:[#allocation5_spill] sm:$0xff] %v5362_v16 }
 0x995   :  { %3381 = vmatprep.mubr.msk.f32.mxu0 %vm379_vm1, %v1744_v39  ;;  %v5369_v39 = vld [vmem:[%s6061_s2 + $0xa8] sm:$0xff] }
 0x996   :  { %1841 = vmatmul.mubr.f32.gmra.mrb[46].mxu0 %v1743_v45  ;;  %6111 = vst [vmem:[#allocation3_spill] sm:$0xff] %v5369_v39  ;;  %v5376_v45 = vld [vmem:[%s6061_s2 + $0xb0] sm:$0xff] }
 0x997   :  { %2310 = vmatprep.mubr.f32.mxu0 %v6100_v35  ;;  %6112 = vst [vmem:[#allocation6_spill] sm:$0xff] %v5376_v45 }
 0xa5d   :  { %v1827_v51 = vpop.f32.mrb[40].mxu0 }
 0xa5e   :  { %v1828_v52 = vadd.f32 %v1827_v51, %v1748_v8  ;;  %v1829_v41 = vpop.f32.mrb[41].mxu0  ;;  %v5397_v51 = vld [vmem:[%s6061_s2 + $0xc8] sm:$0xff] }
 0xa5f   :  { %6115 = vst [vmem:[#allocation9_spill] sm:$0xff] %v5397_v51  ;;  %v5411_v41 = vld [vmem:[%s6061_s2 + $0xd8] sm:$0xff] }
 0xa60   :  { %v1850_v55 = vmul.f32 %v1849_v2, %v1828_v52  ;;  %v5404_v52 = vld [vmem:[%s6061_s2 + $0xd0] sm:$0xff]  ;;  %6117 = vst [vmem:[#allocation11_spill] sm:$0xff] %v5411_v41 }
 0xa61   :  { %v1832_v54 = vpop.f32.mrb[42].mxu0  ;;  %6116 = vst [vmem:[#allocation10_spill] sm:$0xff] %v5404_v52 }
 0xa62   :  { %v1833_v56 = vadd.f32 %v1832_v54, %v1748_v8  ;;  %v1834_v38 = vpop.f32.mrb[43].mxu0  ;;  %v1854_v57 = vadd.f32 %v1850_v55, %v4874_v19 }
 0xa64   :  { %v1851_v62 = vmul.f32 %v1849_v2, %v1833_v56  ;;  %v5213_v3 = vmul.f32 %v1854_v57, %v4354_v27  ;;  %v5418_v56 = vld [vmem:[%s6062_s7 + $0x20] sm:$0xff] }
 0xa65   :  { %v1837_v63 = vpop.f32.mrb[44].mxu0  ;;  %v2070_v57 = vrot.slane %v5418_v56, %v4352_v26 }
 0xa66   :  { %v1855_v10 = vadd.f32 %v1851_v62, %v4877_v43  ;;  %v1838_v60 = vadd.f32 %v1837_v63, %v1748_v8  ;;  %v1839_v61 = vpop.f32.mrb[45].mxu0  ;;  %v2078_v63 = vrot.slane %v5418_v56, %v6104_v58 }
 0xa68   :  { %v1852_v0 = vmul.f32 %v1849_v2, %v1838_v60  ;;  %v5216_v22 = vmul.f32 %v1855_v10, %v4363_v31 }
 0xa69   :  { %v1842_v4 = vpop.f32.mrb[46].mxu0 }
 0xa6a   :  { %v1843_v6 = vadd.f32 %v1842_v4, %v1748_v8  ;;  %v1844_v7 = vpop.f32.mrb[47].mxu0  ;;  %v3963_v9 = vpack.c.bf16 %v5216_v22, %v5213_v3  ;;  %v1856_v19 = vadd.f32 %v1852_v0, %v4884_v37  ;;  %v5234_v37 = vld [vmem:[%s6061_s2 + $0x8] sm:$0xff]  ;;  %v5383_v8 = vld [vmem:[%s6061_s2 + $0xb8] sm:$0xff] }
 0xa6b   :  { %6113 = vst [vmem:[#allocation7_spill] sm:$0xff] %v5383_v8 }
 0xa6c   :  { %v1853_v11 = vmul.f32 %v1849_v2, %v1843_v6  ;;  %3964 = vmatprep.subr.bf16.mxu1 %v3963_v9  ;;  %v5223_v17 = vmul.f32 %v1856_v19, %v4365_v34  ;;  %v5390_v2 = vld [vmem:[%s6061_s2 + $0xc0] sm:$0xff] }
 0xa6d   :  { %3966 = vmatpush3.bf16.msra.mxu1 %v3963_v9  ;;  %6114 = vst [vmem:[#allocation8_spill] sm:$0xff] %v5390_v2 }
 0xa6e   :  { %v1857_v43 = vadd.f32 %v1853_v11, %v4887_v50  ;;  %v5241_v50 = vld [vmem:[%s6061_s2 + $0x10] sm:$0xff] }
 0xa70   :  { %v5226_v46 = vmul.f32 %v1857_v43, %v4371_v44 }
 0xa72   :  { %v3967_v32 = vpack.c.bf16 %v5226_v46, %v5223_v17 }
 0xa74   :  { %3968 = vmatprep.subr.bf16.mxu1 %v3967_v32 }
 0xa75   :  { %3970 = vmatpush3.bf16.msra.mxu1 %v3967_v32 }
 0xa76   :  { %3987 = vmatprep.subr.bf16.mxu1 %v6101_v5 }
 0xa78   :  { %3732 = vmatmul.mubr.msk.f32.vlgmr.msra.gmra.mrb[44].mxu1 %vm453_vm2, %v5234_v37 }
 0xa79   :  { %3734 = vmatprep.mubr.msk.f32.mxu1 %vm453_vm2, %v5241_v50 }
 0xa7c   :  { %3735 = vmatmul.mubr.msk.f32.gmra.mrb[46].mxu1 %vm453_vm2, %v5248_v13 }
 0xa7d   :  { %3737 = vmatprep.mubr.msk.f32.mxu1 %vm453_vm2, %v4901_v48  ;;  %v5271_v48 = vld [vmem:[%s6061_s2 + $0x38] sm:$0xff] }
 0xa80   :  { %3738 = vmatmul.mubr.msk.f32.gmra.mrb[48].mxu1 %vm453_vm2, %v5257_v12 }
 0xa81   :  { %3740 = vmatprep.mubr.msk.f32.mxu1 %vm453_vm2, %v5264_v33 }
 0xa84   :  { %3741 = vmatmul.mubr.msk.f32.gmra.mrb[50].mxu1 %vm453_vm2, %v5271_v48 }
 0xa85   :  { %3743 = vmatprep.mubr.msk.f32.mxu1 %vm453_vm2, %v5278_v21 }
 0xa88   :  { %3744 = vmatmul.mubr.msk.f32.gmra.mrb[52].mxu1 %vm453_vm2, %v5285_v42 }
 0xa89   :  { %3746 = vmatprep.mubr.msk.f32.mxu1 %vm453_vm2, %v5292_v36 }
 0xa8c   :  { %3747 = vmatmul.mubr.msk.f32.gmra.mrb[54].mxu1 %vm453_vm2, %v5299_v30 }
 0xa8d   :  { %3749 = vmatprep.mubr.msk.f32.mxu1 %vm453_vm2, %v5306_v24 }
 0xa90   :  { %3750 = vmatmul.mubr.msk.f32.gmra.mrb[56].mxu1 %vm453_vm2, %v5313_v18 }
 0xa91   :  { %3752 = vmatprep.mubr.msk.f32.mxu1 %vm453_vm2, %v5320_v47 }
 0xa94   :  { %3753 = vmatmul.mubr.msk.f32.gmra.mrb[58].mxu1 %vm453_vm2, %v5327_v53 }
 0xa95   :  { %3755 = vmatprep.mubr.msk.f32.mxu1 %vm453_vm2, %v5334_v14 }
 0xa98   :  { %3756 = vmatmul.mubr.msk.f32.gmra.mrb[60].mxu1 %vm453_vm2, %v5341_v28 }
 0xa99   :  { %3758 = vmatprep.mubr.msk.f32.mxu1 %vm453_vm2, %v5348_v49 }
 0xa9c   :  { %3759 = vmatmul.mubr.msk.f32.gmra.mrb[62].mxu1 %vm453_vm2, %v5355_v40 }
 0xa9d   :  { %3761 = vmatprep.mubr.msk.f32.mxu1 %vm453_vm2, %v5362_v16 }
 0xaa0   :  { %3762 = vmatmul.mubr.msk.f32.gmra.mrb[64].mxu1 %vm453_vm2, %v5369_v39 }
 0xaa1   :  { %3764 = vmatprep.mubr.msk.f32.mxu1 %vm453_vm2, %v5376_v45 }
 0xaa4   :  { %3765 = vmatmul.mubr.msk.f32.gmra.mrb[66].mxu1 %vm453_vm2, %v5383_v8 }
 0xaa5   :  { %3767 = vmatprep.mubr.msk.f32.mxu1 %vm453_vm2, %v5390_v2 }
 0xaa8   :  { %3768 = vmatmul.mubr.msk.f32.gmra.mrb[68].mxu1 %vm453_vm2, %v5397_v51 }
 0xaa9   :  { %3770 = vmatprep.mubr.msk.f32.mxu1 %vm453_vm2, %v5404_v52 }
 0xaac   :  { %3771 = vmatmul.mubr.msk.f32.gmra.mrb[70].mxu1 %vm453_vm2, %v5411_v41  ;;  %v2090_v41 = vrot.slane %v5418_v56, %v4396_v20 }
 0xb4b   :  { %v3733_v55 = vpop.f32.mrb[44].mxu1 }
 0xb4c   :  { %v1928_v54 = vpop.f32.mrb[45].mxu1  ;;  %v2072_v60 = vmul.f32 %v3733_v55, %v2070_v57 }
 0xb4d   :  { %v2071_v4 = vmul.f32 %v2070_v57, %v1928_v54 }
 0xb4f   :  { %v3736_v38 = vpop.f32.mrb[46].mxu1 }
 0xb50   :  { %v1938_v62 = vpop.f32.mrb[47].mxu1  ;;  %v2074_v11 = vmul.f32 %v3736_v38, %v2070_v57  ;;  %v2102_v38 = vrot.slane %v5418_v56, %v4612_v23 }
 0xb51   :  { %v2073_v52 = vmul.f32 %v2070_v57, %v1938_v62 }
 0xb53   :  { %v3739_v10 = vpop.f32.mrb[48].mxu1 }
 0xb54   :  { %v2080_v61 = vmul.f32 %v3739_v10, %v2078_v63  ;;  %v1948_v0 = vpop.f32.mrb[49].mxu1 }
 0xb55   :  { %v2079_v6 = vmul.f32 %v2078_v63, %v1948_v0 }
 0xb56   :  { %v2084_v7 = vadd.f32 %v2080_v61, %v2072_v60 }
 0xb57   :  { %v2083_v9 = vadd.f32 %v2079_v6, %v2071_v4  ;;  %v3742_v19 = vpop.f32.mrb[50].mxu1 }
 0xb58   :  { %v2082_v43 = vmul.f32 %v3742_v19, %v2078_v63  ;;  %v1958_v32 = vpop.f32.mrb[51].mxu1 }
 0xb59   :  { %v2081_v51 = vmul.f32 %v2078_v63, %v1958_v32 }
 0xb5a   :  { %v2086_v2 = vadd.f32 %v2082_v43, %v2074_v11 }
 0xb5b   :  { %v2085_v8 = vadd.f32 %v2081_v51, %v2073_v52  ;;  %v3745_v45 = vpop.f32.mrb[52].mxu1 }
 0xb5c   :  { %v2092_v39 = vmul.f32 %v3745_v45, %v2090_v41  ;;  %v1968_v55 = vpop.f32.mrb[53].mxu1 }
 0xb5d   :  { %v2091_v10 = vmul.f32 %v2090_v41, %v1968_v55 }
 0xb5e   :  { %v2096_v16 = vadd.f32 %v2092_v39, %v2084_v7  ;;  %v2114_v39 = vrot.slane %v5418_v56, %v6105_v29 }
 0xb5f   :  { %v2095_v54 = vadd.f32 %v2091_v10, %v2083_v9  ;;  %v3748_v0 = vpop.f32.mrb[54].mxu1 }
 0xb60   :  { %v2094_v60 = vmul.f32 %v3748_v0, %v2090_v41  ;;  %v1978_v61 = vpop.f32.mrb[55].mxu1 }
 0xb61   :  { %v2093_v4 = vmul.f32 %v2090_v41, %v1978_v61 }
 0xb62   :  { %v2098_v6 = vadd.f32 %v2094_v60, %v2086_v2 }
 0xb63   :  { %v2097_v19 = vadd.f32 %v2093_v4, %v2085_v8  ;;  %v3751_v40 = vpop.f32.mrb[56].mxu1 }
 0xb64   :  { %v2104_v57 = vmul.f32 %v3751_v40, %v2102_v38  ;;  %v1988_v62 = vpop.f32.mrb[57].mxu1 }
 0xb65   :  { %v2103_v63 = vmul.f32 %v2102_v38, %v1988_v62 }
 0xb66   :  { %v2108_v51 = vadd.f32 %v2104_v57, %v2096_v16  ;;  %v2126_v16 = vrot.slane %v5418_v56, %v6106_v1 }
 0xb67   :  { %v2107_v52 = vadd.f32 %v2103_v63, %v2095_v54  ;;  %v3754_v45 = vpop.f32.mrb[58].mxu1 }
 0xb68   :  { %v2106_v11 = vmul.f32 %v3754_v45, %v2102_v38  ;;  %v1998_v43 = vpop.f32.mrb[59].mxu1 }
 0xb69   :  { %v2105_v7 = vmul.f32 %v2102_v38, %v1998_v43 }
 0xb6a   :  { %v2110_v9 = vadd.f32 %v2106_v11, %v2098_v6 }
 0xb6b   :  { %v2109_v32 = vadd.f32 %v2105_v7, %v2097_v19  ;;  %v3757_v55 = vpop.f32.mrb[60].mxu1 }
 0xb6c   :  { %v2116_v10 = vmul.f32 %v3757_v55, %v2114_v39  ;;  %v2008_v41 = vpop.f32.mrb[61].mxu1 }
 0xb6d   :  { %v2115_v2 = vmul.f32 %v2114_v39, %v2008_v41 }
 0xb6e   :  { %v2120_v8 = vadd.f32 %v2116_v10, %v2108_v51  ;;  %v2138_v51 = vrot.slane %v5418_v56, %v6107_v15 }
 0xb6f   :  { %v2119_v0 = vadd.f32 %v2115_v2, %v2107_v52  ;;  %v3760_v40 = vpop.f32.mrb[62].mxu1 }
 0xb70   :  { %v2118_v60 = vmul.f32 %v3760_v40, %v2114_v39  ;;  %v2018_v61 = vpop.f32.mrb[63].mxu1 }
 0xb71   :  { %v2117_v54 = vmul.f32 %v2114_v39, %v2018_v61 }
 0xb72   :  { %v2122_v4 = vadd.f32 %v2118_v60, %v2110_v9  ;;  %v2150_v9 = vrot.slane %v5418_v56, %v6108_v25 }
 0xb73   :  { %v2121_v57 = vadd.f32 %v2117_v54, %v2109_v32  ;;  %v3763_v62 = vpop.f32.mrb[64].mxu1 }
 0xb74   :  { %v2128_v63 = vmul.f32 %v3763_v62, %v2126_v16  ;;  %v2028_v38 = vpop.f32.mrb[65].mxu1 }
 0xb75   :  { %v2127_v6 = vmul.f32 %v2126_v16, %v2028_v38 }
 0xb76   :  { %v2132_v19 = vadd.f32 %v2128_v63, %v2120_v8 }
 0xb77   :  { %v2131_v45 = vadd.f32 %v2127_v6, %v2119_v0  ;;  %v3766_v11 = vpop.f32.mrb[66].mxu1 }
 0xb78   :  { %v2130_v43 = vmul.f32 %v3766_v11, %v2126_v16  ;;  %v2038_v7 = vpop.f32.mrb[67].mxu1 }
 0xb79   :  { %v2129_v52 = vmul.f32 %v2126_v16, %v2038_v7 }
 0xb7a   :  { %v2134_v55 = vadd.f32 %v2130_v43, %v2122_v4 }
 0xb7b   :  { %v2133_v10 = vadd.f32 %v2129_v52, %v2121_v57  ;;  %v3769_v41 = vpop.f32.mrb[68].mxu1 }
 0xb7c   :  { %v2140_v2 = vmul.f32 %v3769_v41, %v2138_v51  ;;  %v2048_v39 = vpop.f32.mrb[69].mxu1 }
 0xb7d   :  { %v2139_v32 = vmul.f32 %v2138_v51, %v2048_v39 }
 0xb7e   :  { %v2144_v40 = vadd.f32 %v2140_v2, %v2132_v19 }
 0xb7f   :  { %v2143_v60 = vadd.f32 %v2139_v32, %v2131_v45  ;;  %v3772_v8 = vpop.f32.mrb[70].mxu1 }
 0xb80   :  { %v2142_v0 = vmul.f32 %v3772_v8, %v2138_v51  ;;  %v2058_v61 = vpop.f32.mrb[71].mxu1  ;;  %v2152_v54 = vadd.f32 %v2150_v9, %v2144_v40 }
 0xb81   :  { %v2141_v62 = vmul.f32 %v2138_v51, %v2058_v61  ;;  %v2151_v63 = vadd.f32 %v2150_v9, %v2143_v60 }
 0xb82   :  { %v2146_v38 = vadd.f32 %v2142_v0, %v2134_v55  ;;  %v2158_v16 = vsel %vm379_vm1, %v2152_v54, 0.0 }
 0xb83   :  { %v2145_v4 = vadd.f32 %v2141_v62, %v2133_v10  ;;  %2159 = vadd.xlane.f32.xlu0 %v2158_v16  ;;  %v2155_v57 = vsel %vm379_vm1, %v2151_v63, 0.0  ;;  %v116_v16 = vld [vmem:[%s6063_s4 + $0x118] sm:$0xff] }
 0xb84   :  { %2156 = vadd.xlane.f32.xlu1 %v2155_v57  ;;  %v2154_v6 = vadd.f32 %v2150_v9, %v2146_v38  ;;  %v114_v38 = vld [vmem:[%s6063_s4 + $0x108] sm:$0xff]  ;;  %v113_v57 = vld [vmem:[%s6063_s4 + $0x100] sm:$0xff] }
 0xb85   :  { %v2153_v11 = vadd.f32 %v2150_v9, %v2145_v4  ;;  %v3971_v4 = vpack.c.bf16 %v116_v16, %v114_v38  ;;  %v197_v38 = vld [vmem:[%s6064_s6 + $0x180] sm:$0xff]  ;;  %v198_v16 = vld [vmem:[%s6064_s6 + $0x188] sm:$0xff] }
 0xb86   :  { %v2164_v56 = vsel %vm379_vm1, %v2154_v6, 0.0 }
 0xb87   :  { %2165 = vadd.xlane.f32.xlu0 %v2164_v56  ;;  %v2161_v19 = vsel %vm379_vm1, %v2153_v11, 0.0  ;;  %3972 = vmatprep.subr.bf16.mxu0 %v3971_v4  ;;  %v118_v56 = vld [vmem:[%s6063_s4 + $0x128] sm:$0xff]  ;;  %v199_v4 = vld [vmem:[%s6064_s6 + $0x190] sm:$0xff] }
 0xb88   :  { %2162 = vadd.xlane.f32.xlu1 %v2161_v19  ;;  %v120_v19 = vld [vmem:[%s6063_s4 + $0x138] sm:$0xff] }
 0xc10   :  { %v2160_v45 = vpop.xlane.xlu0 %2159 }
 0xc11   :  { %v2168_v43 = vmul.f32 0.015625, %v2160_v45  ;;  %v2157_v7 = vpop.xlane.xlu1 %2156  ;;  %v3975_v45 = vpack.c.bf16 %v120_v19, %v118_v56  ;;  %v201_v56 = vld [vmem:[%s6064_s6 + $0x1a0] sm:$0xff]  ;;  %v202_v19 = vld [vmem:[%s6064_s6 + $0x1a8] sm:$0xff] }
 0xc12   :  { %v2167_v51 = vmul.f32 0.015625, %v2157_v7  ;;  %v119_v7 = vld [vmem:[%s6063_s4 + $0x130] sm:$0xff] }
 0xc13   :  { %v5440_v52 = vsub.f32 %v2152_v54, %v2168_v43  ;;  %v117_v43 = vld [vmem:[%s6063_s4 + $0x120] sm:$0xff] }
 0xc14   :  { %v5442_v55 = vsub.f32 %v2151_v63, %v2167_v51  ;;  %v2166_v10 = vpop.xlane.xlu0 %2165  ;;  %v3977_v51 = vpack.c.bf16 %v119_v7, %v117_v43  ;;  %v203_v43 = vld [vmem:[%s6064_s6 + $0x1b0] sm:$0xff]  ;;  %v204_v7 = vld [vmem:[%s6064_s6 + $0x1b8] sm:$0xff] }
 0xc15   :  { %v2170_v41 = vmul.f32 0.015625, %v2166_v10  ;;  %v2163_v2 = vpop.xlane.xlu1 %2162  ;;  %v2176_v39 = vmul.f32 %v5440_v52, %v5440_v52  ;;  %v122_v10 = vld [vmem:[%s6063_s4 + $0x148] sm:$0xff] }
 0xc16   :  { %v2169_v9 = vmul.f32 0.015625, %v2163_v2  ;;  %v2175_v32 = vmul.f32 %v5442_v55, %v5442_v55 }
 0xc17   :  { %v5448_v40 = vsub.f32 %v2154_v6, %v2170_v41  ;;  %v2182_v60 = vsel %vm379_vm1, %v2176_v39, 0.0  ;;  %v115_v6 = vld [vmem:[%s6063_s4 + $0x110] sm:$0xff]  ;;  %v124_v41 = vld [vmem:[%s6063_s4 + $0x158] sm:$0xff]  ;;  %v121_v39 = vld [vmem:[%s6063_s4 + $0x140] sm:$0xff] }
 0xc18   :  { %v5451_v8 = vsub.f32 %v2153_v11, %v2169_v9  ;;  %2183 = vadd.xlane.f32.xlu0 %v2182_v60  ;;  %v2179_v0 = vsel %vm379_vm1, %v2175_v32, 0.0  ;;  %v3973_v11 = vpack.c.bf16 %v115_v6, %v113_v57  ;;  %v3979_v2 = vpack.c.bf16 %v124_v41, %v122_v10  ;;  %v123_v9 = vld [vmem:[%s6063_s4 + $0x150] sm:$0xff]  ;;  %v126_v60 = vld [vmem:[%s6063_s4 + $0x168] sm:$0xff]  ;;  %v200_v6 = vld [vmem:[%s6064_s6 + $0x198] sm:$0xff] }
 0xc19   :  { %2180 = vadd.xlane.f32.xlu1 %v2179_v0  ;;  %v2178_v61 = vmul.f32 %v5448_v40, %v5448_v40  ;;  %v3981_v32 = vpack.c.bf16 %v123_v9, %v121_v39  ;;  %v128_v0 = vld [vmem:[%s6063_s4 + $0x178] sm:$0xff]  ;;  %v3988_v57 = vpack.c.bf16 %v198_v16, %v197_v38  ;;  %v205_v10 = vld [vmem:[%s6064_s6 + $0x1c0] sm:$0xff]  ;;  %v206_v41 = vld [vmem:[%s6064_s6 + $0x1c8] sm:$0xff] }
 0xc1a   :  { %v2177_v54 = vmul.f32 %v5451_v8, %v5451_v8  ;;  %3974 = vmatpush1.bf16.msra.mxu0 %v3973_v11  ;;  %v3991_v11 = vpack.c.bf16 %v200_v6, %v199_v4 }
 0xc1b   :  { %v2188_v62 = vsel %vm379_vm1, %v2178_v61, 0.0  ;;  %3976 = vmatprep.subr.bf16.mxu0 %v3975_v45  ;;  %v3983_v61 = vpack.c.bf16 %v128_v0, %v126_v60  ;;  %3989 = vmatpush1.bf16.msra.mxu1 %v3988_v57  ;;  %v3994_v45 = vpack.c.bf16 %v202_v19, %v201_v56  ;;  %v5546_v57 = vld [vmem:[%s6062_s7 + $0x28] sm:$0xf] }
 0xc1c   :  { %2189 = vadd.xlane.f32.xlu0 %v2188_v62  ;;  %v2185_v63 = vsel %vm379_vm1, %v2177_v54, 0.0  ;;  %v125_v54 = vld [vmem:[%s6063_s4 + $0x160] sm:$0xff]  ;;  %v127_v62 = vld [vmem:[%s6063_s4 + $0x170] sm:$0xff]  ;;  %3990 = vmatprep.subr.bf16.mxu1 %v6101_v5  ;;  %v2218_v19 = vrot.slane %v5546_v57, %v6104_v58 }
 0xc1d   :  { %2186 = vadd.xlane.f32.xlu1 %v2185_v63  ;;  %v3985_v63 = vpack.c.bf16 %v127_v62, %v125_v54 }
 0xc1e   :  { %3978 = vmatpush1.bf16.msra.mxu0 %v3977_v51  ;;  %v3997_v51 = vpack.c.bf16 %v204_v7, %v203_v43 }
 0xc1f   :  { %3980 = vmatprep.subr.bf16.mxu0 %v3979_v2  ;;  %3992 = vmatpush1.bf16.msra.mxu1 %v3991_v11  ;;  %v4000_v2 = vpack.c.bf16 %v206_v41, %v205_v10  ;;  %v2210_v11 = vrot.slane %v5546_v57, %v4352_v26 }
 0xc20   :  { %3993 = vmatprep.subr.bf16.mxu1 %v6101_v5 }
 0xc22   :  { %3982 = vmatpush1.bf16.msra.mxu0 %v3981_v32 }
 0xc23   :  { %3984 = vmatprep.subr.bf16.mxu0 %v3983_v61  ;;  %3995 = vmatpush1.bf16.msra.mxu1 %v3994_v45 }
 0xc24   :  { %3996 = vmatprep.subr.bf16.mxu1 %v6101_v5 }
 0xc26   :  { %3986 = vmatpush1.bf16.msra.mxu0 %v3985_v63 }
 0xc27   :  { %3998 = vmatpush1.bf16.msra.mxu1 %v3997_v51 }
 0xc28   :  { %3999 = vmatprep.subr.bf16.mxu1 %v6101_v5 }
 0xc2b   :  { %4001 = vmatpush1.bf16.msra.mxu1 %v4000_v2 }
 0xc2c   :  { %4002 = vmatprep.subr.bf16.mxu1 %v6101_v5 }
 0xca5   :  { %v2184_v39 = vpop.xlane.xlu0 %2183 }
 0xca6   :  { %v2192_v9 = vmul.f32 0.015625, %v2184_v39  ;;  %v2181_v32 = vpop.xlane.xlu1 %2180 }
 0xca7   :  { %v2191_v60 = vmul.f32 0.015625, %v2181_v32 }
 0xca8   :  { %v2196_v0 = vadd.f32 1e-05, %v2192_v9 }
 0xca9   :  { %v2195_v61 = vadd.f32 1e-05, %v2191_v60  ;;  %v2190_v54 = vpop.xlane.xlu0 %2189 }
 0xcaa   :  { %4148 = vrsqrt.f32 %v2196_v0  ;;  %v2194_v62 = vmul.f32 0.015625, %v2190_v54  ;;  %v2187_v63 = vpop.xlane.xlu1 %2186  ;;  %v208_v0 = vld [vmem:[%s6064_s6 + $0x1d8] sm:$0xff]  ;;  %v209_v54 = vld [vmem:[%s6064_s6 + $0x1e0] sm:$0xff] }
 0xcab   :  { %4150 = vrsqrt.f32 %v2195_v61  ;;  %v2193_v38 = vmul.f32 0.015625, %v2187_v63  ;;  %v211_v63 = vld [vmem:[%s6064_s6 + $0x1f0] sm:$0xff] }
 0xcac   :  { %v2198_v16 = vadd.f32 1e-05, %v2194_v62 }
 0xcad   :  { %v2197_v4 = vadd.f32 1e-05, %v2193_v38  ;;  %v212_v38 = vld [vmem:[%s6064_s6 + $0x1f8] sm:$0xff] }
 0xcaf   :  { %4152 = vrsqrt.f32 %v2197_v4  ;;  %v213_v4 = vld [vmem:[%s6064_s6 + $0x200] sm:$0xff] }
 0xcb0   :  { %4154 = vrsqrt.f32 %v2198_v16  ;;  %v4009_v16 = vpack.c.bf16 %v212_v38, %v211_v63 }
 0xcb4   :  { %v4149_v6 = vpop.eup %4148 }
 0xcb5   :  { %v4151_v56 = vpop.eup %4150  ;;  %v2204_v43 = vmul.f32 %v4149_v6, %v5440_v52  ;;  %v214_v6 = vld [vmem:[%s6064_s6 + $0x208] sm:$0xff] }
 0xcb6   :  { %v2203_v45 = vmul.f32 %v4151_v56, %v5442_v55  ;;  %v215_v56 = vld [vmem:[%s6064_s6 + $0x210] sm:$0xff] }
 0xcb7   :  { %v2212_v41 = vmul.f32 %v2210_v11, %v2204_v43  ;;  %v217_v43 = vld [vmem:[%s6064_s6 + $0x220] sm:$0xff] }
 0xcb8   :  { %v2211_v7 = vmul.f32 %v2210_v11, %v2203_v45 }
 0xcb9   :  { %v4153_v51 = vpop.eup %4152  ;;  %v2220_v9 = vadd.f32 %v2218_v19, %v2212_v41  ;;  %v220_v41 = vld [vmem:[%s6064_s6 + $0x238] sm:$0xff] }
 0xcba   :  { %v2219_v10 = vadd.f32 %v2218_v19, %v2211_v7  ;;  %v2205_v2 = vmul.f32 %v4153_v51, %v5451_v8  ;;  %v4155_v39 = vpop.eup %4154  ;;  %v218_v7 = vld [vmem:[%s6064_s6 + $0x228] sm:$0xff] }
 0xcbb   :  { %v2206_v60 = vmul.f32 %v4155_v39, %v5448_v40  ;;  %v207_v40 = vld [vmem:[%s6064_s6 + $0x1d0] sm:$0xff]  ;;  %v4018_v51 = vpack.c.bf16 %v218_v7, %v217_v43  ;;  %v147_v39 = vld [vmem:[%s6065_s5 + $0x4] sm:$0x3] }
 0xcbc   :  { %3410 = vmatmul.mubr.msk.f32.vlgmr.msra.gmra.mrb[48].mxu0 %vm379_vm1, %v2219_v10  ;;  %v2213_v32 = vmul.f32 %v2210_v11, %v2205_v2  ;;  %v4003_v61 = vpack.c.bf16 %v208_v0, %v207_v40  ;;  %v219_v10 = vld [vmem:[%s6064_s6 + $0x230] sm:$0xff] }
 0xcbd   :  { %2316 = vmatprep.mubr.f32.mxu0 %v6100_v35  ;;  %v2214_v55 = vmul.f32 %v2210_v11, %v2206_v60  ;;  %v4012_v11 = vpack.c.bf16 %v214_v6, %v213_v4  ;;  %v4021_v2 = vpack.c.bf16 %v220_v41, %v219_v10 }
 0xcbe   :  { %v2221_v52 = vadd.f32 %v2218_v19, %v2213_v32  ;;  %4004 = vmatpush1.bf16.msra.mxu1 %v4003_v61  ;;  %v2231_v32 = vrot.slane %v147_v39, %v6104_v58 }
 0xcbf   :  { %v2222_v8 = vadd.f32 %v2218_v19, %v2214_v55  ;;  %4005 = vmatprep.subr.bf16.mxu1 %v6101_v5  ;;  %v216_v19 = vld [vmem:[%s6064_s6 + $0x218] sm:$0xff] }
 0xcc0   :  { %3411 = vmatmul.mubr.msk.f32.gmra.mrb[50].mxu0 %vm379_vm1, %v2220_v9  ;;  %v4015_v45 = vpack.c.bf16 %v216_v19, %v215_v56  ;;  %v2227_v9 = vrot.slane %v147_v39, %v4352_v26 }
 0xcc1   :  { %2322 = vmatprep.mubr.f32.mxu0 %v6100_v35 }
 0xcc4   :  { %3412 = vmatmul.mubr.msk.f32.gmra.mrb[52].mxu0 %vm379_vm1, %v2221_v52 }
 0xcc5   :  { %2328 = vmatprep.mubr.f32.mxu0 %v6100_v35 }
 0xcc8   :  { %3413 = vmatmul.mubr.msk.f32.gmra.mrb[54].mxu0 %vm379_vm1, %v2222_v8 }
 0xcc9   :  { %3781 = vmatprep.mubr.msk.f32.mxu0 %vm453_vm2, %v5102_v59  ;;  %v210_v59 = vld [vmem:[%s6064_s6 + $0x1e8] sm:$0xff] }
 0xcca   :  { %v4006_v62 = vpack.c.bf16 %v210_v59, %v209_v54 }
 0xccc   :  { %4007 = vmatpush1.bf16.msra.mxu1 %v4006_v62 }
 0xccd   :  { %4008 = vmatprep.subr.bf16.mxu1 %v6101_v5 }
 0xcd0   :  { %4010 = vmatpush1.bf16.msra.mxu1 %v4009_v16 }
 0xcd1   :  { %4011 = vmatprep.subr.bf16.mxu1 %v6101_v5 }
 0xcd4   :  { %4013 = vmatpush1.bf16.msra.mxu1 %v4012_v11 }
 0xcd5   :  { %4014 = vmatprep.subr.bf16.mxu1 %v6101_v5 }
 0xcd8   :  { %4016 = vmatpush1.bf16.msra.mxu1 %v4015_v45 }
 0xcd9   :  { %4017 = vmatprep.subr.bf16.mxu1 %v6101_v5 }
 0xcdc   :  { %4019 = vmatpush1.bf16.msra.mxu1 %v4018_v51 }
 0xcdd   :  { %4020 = vmatprep.subr.bf16.mxu1 %v6101_v5 }
 0xce0   :  { %4022 = vmatpush1.bf16.msra.mxu1 %v4021_v2 }
 0xd8f   :  { %v2312_v60 = vpop.f32.mrb[48].mxu0 }
 0xd90   :  { %v5618_v52 = vadd.f32 %v2312_v60, %v2227_v9  ;;  %v2314_v55 = vpop.f32.mrb[49].mxu0 }
 0xd91   :  { %v2315_v8 = vadd.f32 %v2314_v55, %v2231_v32 }
 0xd92   :  { %v2343_v40 = vmul.f32 0.044715, %v5618_v52 }
 0xd93   :  { %v2344_v0 = vmul.f32 0.044715, %v2315_v8  ;;  %v2318_v61 = vpop.f32.mrb[50].mxu0 }
 0xd94   :  { %v2351_v54 = vmul.f32 %v2343_v40, %v5618_v52  ;;  %v5622_v59 = vadd.f32 %v2318_v61, %v2227_v9  ;;  %v2320_v62 = vpop.f32.mrb[51].mxu0 }
 0xd95   :  { %v2352_v63 = vmul.f32 %v2344_v0, %v2315_v8  ;;  %v5624_v38 = vadd.f32 %v2320_v62, %v2231_v32 }
 0xd96   :  { %v2359_v16 = vmul.f32 %v2351_v54, %v5618_v52  ;;  %v2345_v4 = vmul.f32 0.044715, %v5622_v59 }
 0xd97   :  { %v2360_v6 = vmul.f32 %v2352_v63, %v2315_v8  ;;  %v2346_v11 = vmul.f32 0.044715, %v5624_v38  ;;  %v2324_v56 = vpop.f32.mrb[52].mxu0 }
 0xd98   :  { %v2367_v19 = vadd.f32 %v2359_v16, %v5618_v52  ;;  %v2353_v45 = vmul.f32 %v2345_v4, %v5622_v59  ;;  %v5631_v43 = vadd.f32 %v2324_v56, %v2227_v9  ;;  %v2326_v7 = vpop.f32.mrb[53].mxu0 }
 0xd99   :  { %v2368_v51 = vadd.f32 %v2360_v6, %v2315_v8  ;;  %v2354_v10 = vmul.f32 %v2346_v11, %v5624_v38  ;;  %v5634_v41 = vadd.f32 %v2326_v7, %v2231_v32 }
 0xd9a   :  { %v2375_v2 = vmul.f32 0.7978846, %v2367_v19  ;;  %v2347_v39 = vmul.f32 0.044715, %v5631_v43  ;;  %v2361_v60 = vmul.f32 %v2353_v45, %v5622_v59 }
 0xd9b   :  { %v2362_v55 = vmul.f32 %v2354_v10, %v5624_v38  ;;  %v2348_v40 = vmul.f32 0.044715, %v5634_v41  ;;  %v2330_v0 = vpop.f32.mrb[54].mxu0  ;;  %v2376_v61 = vmul.f32 0.7978846, %v2368_v51 }
 0xd9c   :  { %4156 = vtanh.f32 %v2375_v2  ;;  %v2355_v54 = vmul.f32 %v2347_v39, %v5631_v43  ;;  %v5641_v62 = vadd.f32 %v2330_v0, %v2227_v9  ;;  %v2332_v63 = vpop.f32.mrb[55].mxu0  ;;  %v2369_v16 = vadd.f32 %v2361_v60, %v5622_v59 }
 0xd9d   :  { %v2370_v4 = vadd.f32 %v2362_v55, %v5624_v38  ;;  %v2356_v6 = vmul.f32 %v2348_v40, %v5634_v41  ;;  %v2333_v11 = vadd.f32 %v2332_v63, %v2231_v32  ;;  %4158 = vtanh.f32 %v2376_v61 }
 0xd9e   :  { %v2349_v56 = vmul.f32 0.044715, %v5641_v62  ;;  %v2377_v19 = vmul.f32 0.7978846, %v2369_v16  ;;  %v2363_v45 = vmul.f32 %v2355_v54, %v5631_v43 }
 0xd9f   :  { %v2364_v7 = vmul.f32 %v2356_v6, %v5634_v41  ;;  %v2350_v51 = vmul.f32 0.044715, %v2333_v11  ;;  %v2378_v10 = vmul.f32 0.7978846, %v2370_v4 }
 0xda0   :  { %v2357_v9 = vmul.f32 %v2349_v56, %v5641_v62  ;;  %4160 = vtanh.f32 %v2377_v19  ;;  %v2371_v2 = vadd.f32 %v2363_v45, %v5631_v43  ;;  %v2336_v19 = vmul.f32 0.5, %v2315_v8 }
 0xda1   :  { %v2372_v39 = vadd.f32 %v2364_v7, %v5634_v41  ;;  %v2358_v60 = vmul.f32 %v2350_v51, %v2333_v11  ;;  %4162 = vtanh.f32 %v2378_v10  ;;  %v2335_v7 = vmul.f32 0.5, %v5618_v52 }
 0xda2   :  { %v2379_v32 = vmul.f32 0.7978846, %v2371_v2  ;;  %v2365_v55 = vmul.f32 %v2357_v9, %v5641_v62  ;;  %v2340_v52 = vmul.f32 0.5, %v5634_v41  ;;  %v2511_v41 = vrot.slane %v5546_v57, %v4612_v23 }
 0xda3   :  { %v2366_v40 = vmul.f32 %v2358_v60, %v2333_v11  ;;  %v2380_v0 = vmul.f32 0.7978846, %v2372_v39  ;;  %v2338_v60 = vmul.f32 0.5, %v5624_v38 }
 0xda4   :  { %4164 = vtanh.f32 %v2379_v32  ;;  %v2373_v61 = vadd.f32 %v2365_v55, %v5641_v62  ;;  %v2337_v55 = vmul.f32 0.5, %v5622_v59  ;;  %v2342_v59 = vmul.f32 0.5, %v2333_v11 }
 0xda5   :  { %v2374_v54 = vadd.f32 %v2366_v40, %v2333_v11  ;;  %4166 = vtanh.f32 %v2380_v0 }
 0xda6   :  { %v4157_v63 = vpop.eup %4156  ;;  %v2381_v16 = vmul.f32 0.7978846, %v2373_v61 }
 0xda7   :  { %v4159_v4 = vpop.eup %4158  ;;  %v2391_v6 = vadd.f32 1.0, %v4157_v63  ;;  %v2382_v56 = vmul.f32 0.7978846, %v2374_v54 }
 0xda8   :  { %v2392_v45 = vadd.f32 1.0, %v4159_v4  ;;  %4168 = vtanh.f32 %v2381_v16  ;;  %v2339_v16 = vmul.f32 0.5, %v5631_v43  ;;  %v2410_v43 = vrot.slane %v5546_v57, %v4396_v20 }
 0xda9   :  { %4170 = vtanh.f32 %v2382_v56  ;;  %v2399_v2 = vmul.f32 %v2391_v6, %v2335_v7  ;;  %v2341_v7 = vmul.f32 0.5, %v5641_v62 }
 0xdaa   :  { %v4161_v51 = vpop.eup %4160  ;;  %v2400_v10 = vmul.f32 %v2392_v45, %v2336_v19 }
 0xdab   :  { %v4163_v9 = vpop.eup %4162  ;;  %v2393_v39 = vadd.f32 1.0, %v4161_v51 }
 0xdac   :  { %3414 = vmatprep.mubr.msk.f32.mxu1 %vm379_vm1, %v2400_v10  ;;  %v2394_v32 = vadd.f32 1.0, %v4163_v9 }
 0xdad   :  { %2488 = vmatmul.mubr.f32.vlgmr.msra.gmra.mrb[72].mxu1 %v2399_v2  ;;  %v2401_v61 = vmul.f32 %v2393_v39, %v2337_v55 }
 0xdae   :  { %v4165_v40 = vpop.eup %4164  ;;  %v2402_v8 = vmul.f32 %v2394_v32, %v2338_v60 }
 0xdaf   :  { %v4167_v0 = vpop.eup %4166  ;;  %v2395_v54 = vadd.f32 1.0, %v4165_v40 }
 0xdb0   :  { %3415 = vmatprep.mubr.msk.f32.mxu1 %vm379_vm1, %v2402_v8  ;;  %v2396_v63 = vadd.f32 1.0, %v4167_v0 }
 0xdb1   :  { %2493 = vmatmul.mubr.f32.gmra.mrb[74].mxu1 %v2401_v61  ;;  %v2403_v56 = vmul.f32 %v2395_v54, %v2339_v16 }
 0xdb2   :  { %v4169_v4 = vpop.eup %4168  ;;  %v2404_v6 = vmul.f32 %v2396_v63, %v2340_v52 }
 0xdb3   :  { %v4171_v38 = vpop.eup %4170  ;;  %v2397_v19 = vadd.f32 1.0, %v4169_v4 }
 0xdb4   :  { %3416 = vmatprep.mubr.msk.f32.mxu1 %vm379_vm1, %v2404_v6  ;;  %v2398_v45 = vadd.f32 1.0, %v4171_v38 }
 0xdb5   :  { %2498 = vmatmul.mubr.f32.gmra.mrb[76].mxu1 %v2403_v56  ;;  %v2405_v10 = vmul.f32 %v2397_v19, %v2341_v7 }
 0xdb6   :  { %v2406_v51 = vmul.f32 %v2398_v45, %v2342_v59 }
 0xdb8   :  { %3417 = vmatprep.mubr.msk.f32.mxu1 %vm379_vm1, %v2406_v51 }
 0xdb9   :  { %2503 = vmatmul.mubr.f32.gmra.mrb[78].mxu1 %v2405_v10 }
 0xdba   :  { %2972 = vmatprep.mubr.f32.mxu1 %v6100_v35 }
 0xe80   :  { %v2489_v9 = vpop.f32.mrb[72].mxu1 }
 0xe81   :  { %v2490_v2 = vadd.f32 %v2489_v9, %v2410_v43  ;;  %v2491_v11 = vpop.f32.mrb[73].mxu1 }
 0xe83   :  { %v2512_v39 = vmul.f32 %v2511_v41, %v2490_v2 }
 0xe84   :  { %v2494_v60 = vpop.f32.mrb[74].mxu1 }
 0xe85   :  { %v2495_v32 = vadd.f32 %v2494_v60, %v2410_v43  ;;  %v2496_v62 = vpop.f32.mrb[75].mxu1  ;;  %v2516_v55 = vadd.f32 %v2512_v39, %v5213_v3 }
 0xe87   :  { %v2513_v40 = vmul.f32 %v2511_v41, %v2495_v32  ;;  %v5672_v63 = vmul.f32 %v2516_v55, %v4354_v27 }
 0xe88   :  { %v2499_v8 = vpop.f32.mrb[76].mxu1 }
 0xe89   :  { %v2517_v0 = vadd.f32 %v2513_v40, %v5216_v22  ;;  %v2500_v61 = vadd.f32 %v2499_v8, %v2410_v43  ;;  %v2501_v54 = vpop.f32.mrb[77].mxu1 }
 0xe8b   :  { %v2514_v52 = vmul.f32 %v2511_v41, %v2500_v61  ;;  %v5675_v57 = vmul.f32 %v2517_v0, %v4363_v31 }
 0xe8c   :  { %v2504_v16 = vpop.f32.mrb[78].mxu1 }
 0xe8d   :  { %v2505_v4 = vadd.f32 %v2504_v16, %v2410_v43  ;;  %v2506_v6 = vpop.f32.mrb[79].mxu1  ;;  %v4023_v38 = vpack.c.bf16 %v5675_v57, %v5672_v63  ;;  %v2518_v3 = vadd.f32 %v2514_v52, %v5223_v17  ;;  %v4232_v17 = vld [vmem:[%s6061_s2 + $0x20] sm:$0xff] }
 0xe8f   :  { %v2515_v56 = vmul.f32 %v2511_v41, %v2505_v4  ;;  %4024 = vmatprep.subr.bf16.mxu0 %v4023_v38  ;;  %v5682_v19 = vmul.f32 %v2518_v3, %v4365_v34 }
 0xe90   :  { %4026 = vmatpush3.bf16.msra.mxu0 %v4023_v38 }
 0xe91   :  { %v2519_v22 = vadd.f32 %v2515_v56, %v5226_v46  ;;  %v6118_v46 = vld [vmem:[#allocation4_spill] sm:$0xff] }
 0xe93   :  { %v5685_v59 = vmul.f32 %v2519_v22, %v4371_v44 }
 0xe95   :  { %v4027_v45 = vpack.c.bf16 %v5685_v59, %v5682_v19 }
 0xe97   :  { %4028 = vmatprep.subr.bf16.mxu0 %v4027_v45 }
 0xe98   :  { %4030 = vmatpush3.bf16.msra.mxu0 %v4027_v45 }
 0xe99   :  { %4047 = vmatprep.subr.bf16.mxu0 %v6101_v5 }
 0xe9b   :  { %3782 = vmatmul.mubr.msk.f32.vlgmr.msra.gmra.mrb[56].mxu0 %vm453_vm2, %v5234_v37  ;;  %v6119_v37 = vld [vmem:[#allocation5_spill] sm:$0xff] }
 0xe9c   :  { %3784 = vmatprep.mubr.msk.f32.mxu0 %vm453_vm2, %v5241_v50  ;;  %v6120_v50 = vld [vmem:[#allocation3_spill] sm:$0xff] }
 0xe9f   :  { %3785 = vmatmul.mubr.msk.f32.gmra.mrb[58].mxu0 %vm453_vm2, %v5248_v13  ;;  %v6121_v13 = vld [vmem:[#allocation6_spill] sm:$0xff] }
 0xea0   :  { %3787 = vmatprep.mubr.msk.f32.mxu0 %vm453_vm2, %v4232_v17 }
 0xea3   :  { %3788 = vmatmul.mubr.msk.f32.gmra.mrb[60].mxu0 %vm453_vm2, %v5257_v12  ;;  %v6122_v12 = vld [vmem:[#allocation7_spill] sm:$0xff] }
 0xea4   :  { %3790 = vmatprep.mubr.msk.f32.mxu0 %vm453_vm2, %v5264_v33  ;;  %v6123_v33 = vld [vmem:[#allocation8_spill] sm:$0xff] }
 0xea7   :  { %3791 = vmatmul.mubr.msk.f32.gmra.mrb[62].mxu0 %vm453_vm2, %v5271_v48  ;;  %v6124_v48 = vld [vmem:[#allocation9_spill] sm:$0xff] }
 0xea8   :  { %3793 = vmatprep.mubr.msk.f32.mxu0 %vm453_vm2, %v5278_v21  ;;  %v6125_v21 = vld [vmem:[#allocation10_spill] sm:$0xff] }
 0xeab   :  { %3794 = vmatmul.mubr.msk.f32.gmra.mrb[64].mxu0 %vm453_vm2, %v5285_v42  ;;  %v6126_v42 = vld [vmem:[#allocation11_spill] sm:$0xff] }
 0xeac   :  { %3796 = vmatprep.mubr.msk.f32.mxu0 %vm453_vm2, %v5292_v36 }
 0xeaf   :  { %3797 = vmatmul.mubr.msk.f32.gmra.mrb[66].mxu0 %vm453_vm2, %v5299_v30 }
 0xeb0   :  { %3799 = vmatprep.mubr.msk.f32.mxu0 %vm453_vm2, %v5306_v24  ;;  %v5749_v24 = vld [vmem:[%s6062_s7 + $0x30] sm:$0xff] }
 0xeb1   :  { %v2752_v32 = vrot.slane %v5749_v24, %v4396_v20  ;;  %v2764_v56 = vrot.slane %v5749_v24, %v4612_v23 }
 0xeb3   :  { %3800 = vmatmul.mubr.msk.f32.gmra.mrb[68].mxu0 %vm453_vm2, %v5313_v18 }
 0xeb4   :  { %3802 = vmatprep.mubr.msk.f32.mxu0 %vm453_vm2, %v5320_v47  ;;  %v2732_v47 = vrot.slane %v5749_v24, %v4352_v26 }
 0xeb7   :  { %3803 = vmatmul.mubr.msk.f32.gmra.mrb[70].mxu0 %vm453_vm2, %v5327_v53 }
 0xeb8   :  { %3805 = vmatprep.mubr.msk.f32.mxu0 %vm453_vm2, %v5334_v14  ;;  %v2740_v14 = vrot.slane %v5749_v24, %v6104_v58 }
 0xebb   :  { %3806 = vmatmul.mubr.msk.f32.gmra.mrb[72].mxu0 %vm453_vm2, %v5341_v28 }
 0xebc   :  { %3808 = vmatprep.mubr.msk.f32.mxu0 %vm453_vm2, %v5348_v49 }
 0xebf   :  { %3809 = vmatmul.mubr.msk.f32.gmra.mrb[74].mxu0 %vm453_vm2, %v6118_v46 }
 0xec0   :  { %3811 = vmatprep.mubr.msk.f32.mxu0 %vm453_vm2, %v6119_v37 }
 0xec3   :  { %3812 = vmatmul.mubr.msk.f32.gmra.mrb[76].mxu0 %vm453_vm2, %v6120_v50 }
 0xec4   :  { %3814 = vmatprep.mubr.msk.f32.mxu0 %vm453_vm2, %v6121_v13 }
 0xec7   :  { %3815 = vmatmul.mubr.msk.f32.gmra.mrb[78].mxu0 %vm453_vm2, %v6122_v12 }
 0xec8   :  { %3817 = vmatprep.mubr.msk.f32.mxu0 %vm453_vm2, %v6123_v33 }
 0xecb   :  { %3818 = vmatmul.mubr.msk.f32.gmra.mrb[80].mxu0 %vm453_vm2, %v6124_v48 }
 0xecc   :  { %3820 = vmatprep.mubr.msk.f32.mxu0 %vm453_vm2, %v6125_v21 }
 0xecf   :  { %3821 = vmatmul.mubr.msk.f32.gmra.mrb[82].mxu0 %vm453_vm2, %v6126_v42 }
 0xf6e   :  { %v3783_v36 = vpop.f32.mrb[56].mxu0 }
 0xf6f   :  { %v2590_v30 = vpop.f32.mrb[57].mxu0  ;;  %v2734_v49 = vmul.f32 %v3783_v36, %v2732_v47  ;;  %v2776_v36 = vrot.slane %v5749_v24, %v6105_v29 }
 0xf70   :  { %v2733_v10 = vmul.f32 %v2732_v47, %v2590_v30 }
 0xf72   :  { %v3786_v18 = vpop.f32.mrb[58].mxu0 }
 0xf73   :  { %v2600_v53 = vpop.f32.mrb[59].mxu0  ;;  %v2736_v11 = vmul.f32 %v3786_v18, %v2732_v47 }
 0xf74   :  { %v2735_v62 = vmul.f32 %v2732_v47, %v2600_v53 }
 0xf76   :  { %v3789_v28 = vpop.f32.mrb[60].mxu0 }
 0xf77   :  { %v2742_v7 = vmul.f32 %v3789_v28, %v2740_v14  ;;  %v2610_v51 = vpop.f32.mrb[61].mxu0 }
 0xf78   :  { %v2741_v43 = vmul.f32 %v2740_v14, %v2610_v51 }
 0xf79   :  { %v2746_v41 = vadd.f32 %v2742_v7, %v2734_v49 }
 0xf7a   :  { %v2745_v9 = vadd.f32 %v2741_v43, %v2733_v10  ;;  %v3792_v2 = vpop.f32.mrb[62].mxu0 }
 0xf7b   :  { %v2744_v39 = vmul.f32 %v3792_v2, %v2740_v14  ;;  %v2620_v60 = vpop.f32.mrb[63].mxu0 }
 0xf7c   :  { %v2743_v55 = vmul.f32 %v2740_v14, %v2620_v60 }
 0xf7d   :  { %v2748_v40 = vadd.f32 %v2744_v39, %v2736_v11 }
 0xf7e   :  { %v2747_v8 = vadd.f32 %v2743_v55, %v2735_v62  ;;  %v3795_v0 = vpop.f32.mrb[64].mxu0 }
 0xf7f   :  { %v2754_v61 = vmul.f32 %v3795_v0, %v2752_v32  ;;  %v2630_v54 = vpop.f32.mrb[65].mxu0 }
 0xf80   :  { %v2753_v52 = vmul.f32 %v2752_v32, %v2630_v54 }
 0xf81   :  { %v2758_v16 = vadd.f32 %v2754_v61, %v2746_v41 }
 0xf82   :  { %v2757_v4 = vadd.f32 %v2753_v52, %v2745_v9  ;;  %v3798_v6 = vpop.f32.mrb[66].mxu0  ;;  %v2788_v9 = vrot.slane %v5749_v24, %v6106_v1  ;;  %v2800_v52 = vrot.slane %v5749_v24, %v6107_v15 }
 0xf83   :  { %v2756_v38 = vmul.f32 %v3798_v6, %v2752_v32  ;;  %v2640_v3 = vpop.f32.mrb[67].mxu0 }
 0xf84   :  { %v2755_v22 = vmul.f32 %v2752_v32, %v2640_v3 }
 0xf85   :  { %v2760_v45 = vadd.f32 %v2756_v38, %v2748_v40 }
 0xf86   :  { %v2759_v17 = vadd.f32 %v2755_v22, %v2747_v8  ;;  %v3801_v46 = vpop.f32.mrb[68].mxu0  ;;  %v2812_v22 = vrot.slane %v5749_v24, %v6108_v25 }
 0xf87   :  { %v2766_v37 = vmul.f32 %v3801_v46, %v2764_v56  ;;  %v2650_v50 = vpop.f32.mrb[69].mxu0 }
 0xf88   :  { %v2765_v13 = vmul.f32 %v2764_v56, %v2650_v50 }
 0xf89   :  { %v2770_v12 = vadd.f32 %v2766_v37, %v2758_v16 }
 0xf8a   :  { %v2769_v33 = vadd.f32 %v2765_v13, %v2757_v4  ;;  %v3804_v48 = vpop.f32.mrb[70].mxu0 }
 0xf8b   :  { %v2768_v21 = vmul.f32 %v3804_v48, %v2764_v56  ;;  %v2660_v42 = vpop.f32.mrb[71].mxu0 }
 0xf8c   :  { %v2767_v30 = vmul.f32 %v2764_v56, %v2660_v42 }
 0xf8d   :  { %v2772_v18 = vadd.f32 %v2768_v21, %v2760_v45 }
 0xf8e   :  { %v2771_v47 = vadd.f32 %v2767_v30, %v2759_v17  ;;  %v3807_v53 = vpop.f32.mrb[72].mxu0 }
 0xf8f   :  { %v2778_v14 = vmul.f32 %v3807_v53, %v2776_v36  ;;  %v2670_v28 = vpop.f32.mrb[73].mxu0 }
 0xf90   :  { %v2777_v49 = vmul.f32 %v2776_v36, %v2670_v28 }
 0xf91   :  { %v2782_v7 = vadd.f32 %v2778_v14, %v2770_v12 }
 0xf92   :  { %v2781_v51 = vadd.f32 %v2777_v49, %v2769_v33  ;;  %v3810_v10 = vpop.f32.mrb[74].mxu0 }
 0xf93   :  { %v2780_v43 = vmul.f32 %v3810_v10, %v2776_v36  ;;  %v2680_v41 = vpop.f32.mrb[75].mxu0 }
 0xf94   :  { %v2779_v2 = vmul.f32 %v2776_v36, %v2680_v41 }
 0xf95   :  { %v2784_v11 = vadd.f32 %v2780_v43, %v2772_v18 }
 0xf96   :  { %v2783_v39 = vadd.f32 %v2779_v2, %v2771_v47  ;;  %v3813_v60 = vpop.f32.mrb[76].mxu0 }
 0xf97   :  { %v2790_v32 = vmul.f32 %v3813_v60, %v2788_v9  ;;  %v2690_v62 = vpop.f32.mrb[77].mxu0 }
 0xf98   :  { %v2789_v55 = vmul.f32 %v2788_v9, %v2690_v62 }
 0xf99   :  { %v2794_v40 = vadd.f32 %v2790_v32, %v2782_v7 }
 0xf9a   :  { %v2793_v8 = vadd.f32 %v2789_v55, %v2781_v51  ;;  %v3816_v0 = vpop.f32.mrb[78].mxu0 }
 0xf9b   :  { %v2792_v61 = vmul.f32 %v3816_v0, %v2788_v9  ;;  %v2700_v54 = vpop.f32.mrb[79].mxu0  ;;  %v130_v0 = vld [vmem:[%s6063_s4 + $0x188] sm:$0xff] }
 0xf9c   :  { %v2791_v16 = vmul.f32 %v2788_v9, %v2700_v54 }
 0xf9d   :  { %v2796_v4 = vadd.f32 %v2792_v61, %v2784_v11  ;;  %v132_v61 = vld [vmem:[%s6063_s4 + $0x198] sm:$0xff] }
 0xf9e   :  { %v2795_v6 = vadd.f32 %v2791_v16, %v2783_v39  ;;  %v3819_v38 = vpop.f32.mrb[80].mxu0  ;;  %v4031_v54 = vpack.c.bf16 %v132_v61, %v130_v0  ;;  %v131_v16 = vld [vmem:[%s6063_s4 + $0x190] sm:$0xff] }
 0xf9f   :  { %v2802_v3 = vmul.f32 %v3819_v38, %v2800_v52  ;;  %v2710_v56 = vpop.f32.mrb[81].mxu0  ;;  %v136_v38 = vld [vmem:[%s6063_s4 + $0x1b8] sm:$0xff] }
 0xfa0   :  { %v2801_v45 = vmul.f32 %v2800_v52, %v2710_v56  ;;  %4032 = vmatprep.subr.bf16.mxu1 %v4031_v54  ;;  %v133_v56 = vld [vmem:[%s6063_s4 + $0x1a0] sm:$0xff] }
 0xfa1   :  { %v2806_v17 = vadd.f32 %v2802_v3, %v2794_v40 }
 0xfa2   :  { %v2805_v46 = vadd.f32 %v2801_v45, %v2793_v8  ;;  %v3822_v37 = vpop.f32.mrb[82].mxu0 }
 0xfa3   :  { %v2804_v50 = vmul.f32 %v3822_v37, %v2800_v52  ;;  %v2720_v13 = vpop.f32.mrb[83].mxu0  ;;  %v2814_v12 = vadd.f32 %v2812_v22, %v2806_v17  ;;  %v138_v17 = vld [vmem:[%s6063_s4 + $0x1c8] sm:$0xff] }
 0xfa4   :  { %v2803_v33 = vmul.f32 %v2800_v52, %v2720_v13  ;;  %v2813_v48 = vadd.f32 %v2812_v22, %v2805_v46  ;;  %v129_v52 = vld [vmem:[%s6063_s4 + $0x180] sm:$0xff]  ;;  %v140_v46 = vld [vmem:[%s6063_s4 + $0x1d8] sm:$0xff]  ;;  %v139_v13 = vld [vmem:[%s6063_s4 + $0x1d0] sm:$0xff] }
 0xfa5   :  { %v2808_v21 = vadd.f32 %v2804_v50, %v2796_v4  ;;  %v2820_v15 = vsel %vm379_vm1, %v2814_v12, 0.0  ;;  %v4033_v4 = vpack.c.bf16 %v131_v16, %v129_v52  ;;  %v4039_v37 = vpack.c.bf16 %v140_v46, %v138_v17  ;;  %v137_v50 = vld [vmem:[%s6063_s4 + $0x1c0] sm:$0xff] }
 0xfa6   :  { %v2807_v42 = vadd.f32 %v2803_v33, %v2795_v6  ;;  %2821 = vadd.xlane.f32.xlu0 %v2820_v15  ;;  %v2817_v36 = vsel %vm379_vm1, %v2813_v48, 0.0  ;;  %v134_v6 = vld [vmem:[%s6063_s4 + $0x1a8] sm:$0xff]  ;;  %v141_v15 = vld [vmem:[%s6063_s4 + $0x1e0] sm:$0xff] }
 0xfa7   :  { %2818 = vadd.xlane.f32.xlu1 %v2817_v36  ;;  %v2816_v30 = vadd.f32 %v2812_v22, %v2808_v21  ;;  %4034 = vmatpush1.bf16.msra.mxu1 %v4033_v4  ;;  %v4035_v3 = vpack.c.bf16 %v136_v38, %v134_v6  ;;  %v142_v33 = vld [vmem:[%s6063_s4 + $0x1e8] sm:$0xff]  ;;  %v5877_v38 = vld [vmem:[%s6062_s7 + $0x38] sm:$0xf] }
 0xfa8   :  { %v2815_v18 = vadd.f32 %v2812_v22, %v2807_v42  ;;  %v135_v22 = vld [vmem:[%s6063_s4 + $0x1b0] sm:$0xff] }
 0xfa9   :  { %v2826_v25 = vsel %vm379_vm1, %v2816_v30, 0.0  ;;  %v4037_v45 = vpack.c.bf16 %v135_v22, %v133_v56  ;;  %4036 = vmatprep.subr.bf16.mxu1 %v4035_v3  ;;  %v143_v42 = vld [vmem:[%s6063_s4 + $0x1f0] sm:$0xff]  ;;  %v2872_v56 = vrot.slane %v5877_v38, %v4352_v26 }
 0xfaa   :  { %2827 = vadd.xlane.f32.xlu0 %v2826_v25  ;;  %v2823_v24 = vsel %vm379_vm1, %v2815_v18, 0.0  ;;  %v4045_v36 = vpack.c.bf16 %v143_v42, %v141_v15  ;;  %v223_v25 = vld [vmem:[%s6064_s6 + $0x250] sm:$0xff] }
 0xfab   :  { %2824 = vadd.xlane.f32.xlu1 %v2823_v24  ;;  %4038 = vmatpush1.bf16.msra.mxu1 %v4037_v45  ;;  %v2880_v45 = vrot.slane %v5877_v38, %v6104_v58 }
 0xfac   :  { %4040 = vmatprep.subr.bf16.mxu1 %v4039_v37 }
0x1033   :  { %v2822_v47 = vpop.xlane.xlu0 %2821 }
0x1034   :  { %v2830_v53 = vmul.f32 0.015625, %v2822_v47  ;;  %v2819_v14 = vpop.xlane.xlu1 %2818  ;;  %v224_v47 = vld [vmem:[%s6064_s6 + $0x258] sm:$0xff] }
0x1035   :  { %v2829_v28 = vmul.f32 0.015625, %v2819_v14  ;;  %v225_v14 = vld [vmem:[%s6064_s6 + $0x260] sm:$0xff] }
0x1036   :  { %v5771_v49 = vsub.f32 %v2814_v12, %v2830_v53  ;;  %v4041_v12 = vpack.c.bf16 %v139_v13, %v137_v50  ;;  %v4051_v53 = vpack.c.bf16 %v224_v47, %v223_v25  ;;  %v236_v47 = vld [vmem:[%s6064_s6 + $0x2b8] sm:$0xff] }
0x1037   :  { %v5773_v7 = vsub.f32 %v2813_v48, %v2829_v28  ;;  %v2828_v51 = vpop.xlane.xlu0 %2827  ;;  %v144_v48 = vld [vmem:[%s6063_s4 + $0x1f8] sm:$0xff]  ;;  %v226_v28 = vld [vmem:[%s6064_s6 + $0x268] sm:$0xff] }
0x1038   :  { %v2832_v10 = vmul.f32 0.015625, %v2828_v51  ;;  %v2825_v43 = vpop.xlane.xlu1 %2824  ;;  %v2838_v41 = vmul.f32 %v5771_v49, %v5771_v49  ;;  %4042 = vmatpush1.bf16.msra.mxu1 %v4041_v12  ;;  %v4043_v21 = vpack.c.bf16 %v144_v48, %v142_v33  ;;  %v4054_v51 = vpack.c.bf16 %v226_v28, %v225_v14  ;;  %v237_v14 = vld [vmem:[%s6064_s6 + $0x2c0] sm:$0xff]  ;;  %v238_v28 = vld [vmem:[%s6064_s6 + $0x2c8] sm:$0xff] }
0x1039   :  { %v2831_v9 = vmul.f32 0.015625, %v2825_v43  ;;  %v2837_v2 = vmul.f32 %v5773_v7, %v5773_v7  ;;  %v228_v43 = vld [vmem:[%s6064_s6 + $0x278] sm:$0xff] }
0x103a   :  { %v5779_v11 = vsub.f32 %v2816_v30, %v2832_v10  ;;  %v2844_v39 = vsel %vm379_vm1, %v2838_v41, 0.0  ;;  %4044 = vmatprep.subr.bf16.mxu1 %v4043_v21  ;;  %v221_v30 = vld [vmem:[%s6064_s6 + $0x240] sm:$0xff]  ;;  %v227_v10 = vld [vmem:[%s6064_s6 + $0x270] sm:$0xff] }
0x103b   :  { %v5782_v60 = vsub.f32 %v2815_v18, %v2831_v9  ;;  %2845 = vadd.xlane.f32.xlu0 %v2844_v39  ;;  %v2841_v32 = vsel %vm379_vm1, %v2837_v2, 0.0  ;;  %v222_v18 = vld [vmem:[%s6064_s6 + $0x248] sm:$0xff]  ;;  %v4057_v41 = vpack.c.bf16 %v228_v43, %v227_v10  ;;  %v229_v9 = vld [vmem:[%s6064_s6 + $0x280] sm:$0xff]  ;;  %v239_v10 = vld [vmem:[%s6064_s6 + $0x2d0] sm:$0xff] }
0x103c   :  { %2842 = vadd.xlane.f32.xlu1 %v2841_v32  ;;  %v2840_v62 = vmul.f32 %v5779_v11, %v5779_v11  ;;  %4046 = vmatpush1.bf16.msra.mxu1 %v4045_v36  ;;  %v4048_v24 = vpack.c.bf16 %v222_v18, %v221_v30  ;;  %v230_v2 = vld [vmem:[%s6064_s6 + $0x288] sm:$0xff]  ;;  %v231_v36 = vld [vmem:[%s6064_s6 + $0x290] sm:$0xff]  ;;  %v233_v18 = vld [vmem:[%s6064_s6 + $0x2a0] sm:$0xff] }
0x103d   :  { %v2839_v55 = vmul.f32 %v5782_v60, %v5782_v60  ;;  %v4060_v39 = vpack.c.bf16 %v230_v2, %v229_v9  ;;  %v240_v43 = vld [vmem:[%s6064_s6 + $0x2d8] sm:$0xff]  ;;  %v241_v9 = vld [vmem:[%s6064_s6 + $0x2e0] sm:$0xff]  ;;  %v242_v2 = vld [vmem:[%s6064_s6 + $0x2e8] sm:$0xff] }
0x103e   :  { %v2850_v40 = vsel %vm379_vm1, %v2840_v62, 0.0  ;;  %4049 = vmatpush1.bf16.msra.mxu0 %v4048_v24  ;;  %v235_v24 = vld [vmem:[%s6064_s6 + $0x2b0] sm:$0xff] }
0x103f   :  { %2851 = vadd.xlane.f32.xlu0 %v2850_v40  ;;  %v2847_v8 = vsel %vm379_vm1, %v2839_v55, 0.0  ;;  %4050 = vmatprep.subr.bf16.mxu0 %v6101_v5 }
0x1040   :  { %2848 = vadd.xlane.f32.xlu1 %v2847_v8 }
0x1042   :  { %4052 = vmatpush1.bf16.msra.mxu0 %v4051_v53  ;;  %v4069_v53 = vpack.c.bf16 %v236_v47, %v235_v24 }
0x1043   :  { %4053 = vmatprep.subr.bf16.mxu0 %v6101_v5 }
0x1046   :  { %4055 = vmatpush1.bf16.msra.mxu0 %v4054_v51  ;;  %v4072_v51 = vpack.c.bf16 %v238_v28, %v237_v14 }
0x1047   :  { %4056 = vmatprep.subr.bf16.mxu0 %v6101_v5 }
0x104a   :  { %4058 = vmatpush1.bf16.msra.mxu0 %v4057_v41  ;;  %v4075_v41 = vpack.c.bf16 %v240_v43, %v239_v10 }
0x104b   :  { %4059 = vmatprep.subr.bf16.mxu0 %v6101_v5 }
0x104e   :  { %4061 = vmatpush1.bf16.msra.mxu0 %v4060_v39  ;;  %v4078_v39 = vpack.c.bf16 %v242_v2, %v241_v9 }
0x104f   :  { %4062 = vmatprep.subr.bf16.mxu0 %v6101_v5 }
0x10c8   :  { %v2846_v32 = vpop.xlane.xlu0 %2845 }
0x10c9   :  { %v2854_v62 = vmul.f32 0.015625, %v2846_v32  ;;  %v2843_v55 = vpop.xlane.xlu1 %2842  ;;  %v243_v32 = vld [vmem:[%s6064_s6 + $0x2f0] sm:$0xff] }
0x10ca   :  { %v2853_v40 = vmul.f32 0.015625, %v2843_v55 }
0x10cb   :  { %v2858_v8 = vadd.f32 1e-05, %v2854_v62  ;;  %v244_v62 = vld [vmem:[%s6064_s6 + $0x2f8] sm:$0xff] }
0x10cc   :  { %v2857_v0 = vadd.f32 1e-05, %v2853_v40  ;;  %v2852_v61 = vpop.xlane.xlu0 %2851  ;;  %v4081_v55 = vpack.c.bf16 %v244_v62, %v243_v32  ;;  %v148_v40 = vld [vmem:[%s6065_s5 + $0x6] sm:$0x3] }
0x10cd   :  { %4172 = vrsqrt.f32 %v2858_v8  ;;  %v2856_v54 = vmul.f32 0.015625, %v2852_v61  ;;  %v2849_v52 = vpop.xlane.xlu1 %2848  ;;  %v2889_v8 = vrot.slane %v148_v40, %v4352_v26 }
0x10ce   :  { %4174 = vrsqrt.f32 %v2857_v0  ;;  %v2855_v16 = vmul.f32 0.015625, %v2849_v52  ;;  %v2893_v0 = vrot.slane %v148_v40, %v6104_v58 }
0x10cf   :  { %v2860_v4 = vadd.f32 1e-05, %v2856_v54 }
0x10d0   :  { %v2859_v6 = vadd.f32 1e-05, %v2855_v16 }
0x10d2   :  { %4176 = vrsqrt.f32 %v2859_v6 }
0x10d3   :  { %4178 = vrsqrt.f32 %v2860_v4 }
0x10d7   :  { %v4173_v3 = vpop.eup %4172 }
0x10d8   :  { %v4175_v22 = vpop.eup %4174  ;;  %v2866_v46 = vmul.f32 %v4173_v3, %v5771_v49 }
0x10d9   :  { %v2865_v17 = vmul.f32 %v4175_v22, %v5773_v7 }
0x10da   :  { %v2874_v12 = vmul.f32 %v2872_v56, %v2866_v46 }
0x10db   :  { %v2873_v37 = vmul.f32 %v2872_v56, %v2865_v17 }
0x10dc   :  { %v4177_v50 = vpop.eup %4176  ;;  %v2882_v21 = vadd.f32 %v2880_v45, %v2874_v12 }
0x10dd   :  { %v2881_v13 = vadd.f32 %v2880_v45, %v2873_v37  ;;  %v2867_v33 = vmul.f32 %v4177_v50, %v5782_v60  ;;  %v4179_v48 = vpop.eup %4178 }
0x10de   :  { %v2868_v42 = vmul.f32 %v4179_v48, %v5779_v11  ;;  %v232_v11 = vld [vmem:[%s6064_s6 + $0x298] sm:$0xff] }
0x10df   :  { %3446 = vmatmul.mubr.msk.f32.vlgmr.msra.gmra.mrb[80].mxu1 %vm379_vm1, %v2881_v13  ;;  %v2875_v15 = vmul.f32 %v2872_v56, %v2867_v33  ;;  %v4063_v30 = vpack.c.bf16 %v232_v11, %v231_v36 }
0x10e0   :  { %2978 = vmatprep.mubr.f32.mxu1 %v6100_v35  ;;  %v2876_v7 = vmul.f32 %v2872_v56, %v2868_v42 }
0x10e1   :  { %v2883_v49 = vadd.f32 %v2880_v45, %v2875_v15  ;;  %4064 = vmatpush1.bf16.msra.mxu0 %v4063_v30 }
0x10e2   :  { %v2884_v60 = vadd.f32 %v2880_v45, %v2876_v7  ;;  %4065 = vmatprep.subr.bf16.mxu0 %v6101_v5 }
0x10e3   :  { %3447 = vmatmul.mubr.msk.f32.gmra.mrb[82].mxu1 %vm379_vm1, %v2882_v21 }
0x10e4   :  { %2984 = vmatprep.mubr.f32.mxu1 %v6100_v35 }
0x10e7   :  { %3448 = vmatmul.mubr.msk.f32.gmra.mrb[84].mxu1 %vm379_vm1, %v2883_v49 }
0x10e8   :  { %2990 = vmatprep.mubr.f32.mxu1 %v6100_v35  ;;  %v234_v35 = vld [vmem:[%s6064_s6 + $0x2a8] sm:$0xff] }
0x10e9   :  { %v4066_v25 = vpack.c.bf16 %v234_v35, %v233_v18 }
0x10eb   :  { %3449 = vmatmul.mubr.msk.f32.gmra.mrb[86].mxu1 %vm379_vm1, %v2884_v60  ;;  %4067 = vmatpush1.bf16.msra.mxu0 %v4066_v25 }
0x10ec   :  { %4068 = vmatprep.subr.bf16.mxu0 %v6101_v5 }
0x10ef   :  { %4070 = vmatpush1.bf16.msra.mxu0 %v4069_v53 }
0x10f0   :  { %4071 = vmatprep.subr.bf16.mxu0 %v6101_v5 }
0x10f3   :  { %4073 = vmatpush1.bf16.msra.mxu0 %v4072_v51 }
0x10f4   :  { %4074 = vmatprep.subr.bf16.mxu0 %v6101_v5 }
0x10f7   :  { %4076 = vmatpush1.bf16.msra.mxu0 %v4075_v41 }
0x10f8   :  { %4077 = vmatprep.subr.bf16.mxu0 %v6101_v5 }
0x10fb   :  { %4079 = vmatpush1.bf16.msra.mxu0 %v4078_v39 }
0x10fc   :  { %4080 = vmatprep.subr.bf16.mxu0 %v6101_v5 }
0x10ff   :  { %4082 = vmatpush1.bf16.msra.mxu0 %v4081_v55 }
0x11b2   :  { %v2974_v61 = vpop.f32.mrb[80].mxu1 }
0x11b3   :  { %v5947_v54 = vadd.f32 %v2974_v61, %v2889_v8  ;;  %v2976_v52 = vpop.f32.mrb[81].mxu1 }
0x11b4   :  { %v2977_v16 = vadd.f32 %v2976_v52, %v2893_v0 }
0x11b5   :  { %v3005_v4 = vmul.f32 0.044715, %v5947_v54 }
0x11b6   :  { %v3006_v6 = vmul.f32 0.044715, %v2977_v16  ;;  %v2980_v3 = vpop.f32.mrb[82].mxu1 }
0x11b7   :  { %v3013_v5 = vmul.f32 %v3005_v4, %v5947_v54  ;;  %v5951_v56 = vadd.f32 %v2980_v3, %v2889_v8  ;;  %v2982_v22 = vpop.f32.mrb[83].mxu1 }
0x11b8   :  { %v3014_v45 = vmul.f32 %v3006_v6, %v2977_v16  ;;  %v5953_v17 = vadd.f32 %v2982_v22, %v2893_v0 }
0x11b9   :  { %v3021_v26 = vmul.f32 %v3013_v5, %v5947_v54  ;;  %v3007_v58 = vmul.f32 0.044715, %v5951_v56 }
0x11ba   :  { %v3022_v46 = vmul.f32 %v3014_v45, %v2977_v16  ;;  %v3008_v37 = vmul.f32 0.044715, %v5953_v17  ;;  %v2986_v50 = vpop.f32.mrb[84].mxu1 }
0x11bb   :  { %v3029_v13 = vadd.f32 %v3021_v26, %v5947_v54  ;;  %v3015_v12 = vmul.f32 %v3007_v58, %v5951_v56  ;;  %v5960_v33 = vadd.f32 %v2986_v50, %v2889_v8  ;;  %v2988_v48 = vpop.f32.mrb[85].mxu1  ;;  %v2998_v26 = vmul.f32 0.5, %v2977_v16 }
0x11bc   :  { %v3030_v21 = vadd.f32 %v3022_v46, %v2977_v16  ;;  %v3016_v15 = vmul.f32 %v3008_v37, %v5953_v17  ;;  %v5963_v42 = vadd.f32 %v2988_v48, %v2893_v0  ;;  %v2997_v46 = vmul.f32 0.5, %v5947_v54 }
0x11bd   :  { %v3037_v49 = vmul.f32 0.7978846, %v3029_v13  ;;  %v3009_v7 = vmul.f32 0.044715, %v5960_v33  ;;  %v3023_v60 = vmul.f32 %v3015_v12, %v5951_v56 }
0x11be   :  { %v3024_v36 = vmul.f32 %v3016_v15, %v5953_v17  ;;  %v3010_v11 = vmul.f32 0.044715, %v5963_v42  ;;  %v2992_v30 = vpop.f32.mrb[86].mxu1  ;;  %v3038_v18 = vmul.f32 0.7978846, %v3030_v21  ;;  %v3000_v21 = vmul.f32 0.5, %v5953_v17 }
0x11bf   :  { %4180 = vtanh.f32 %v3037_v49  ;;  %v3017_v35 = vmul.f32 %v3009_v7, %v5960_v33  ;;  %v5970_v25 = vadd.f32 %v2992_v30, %v2889_v8  ;;  %v2994_v24 = vpop.f32.mrb[87].mxu1  ;;  %v3031_v47 = vadd.f32 %v3023_v60, %v5951_v56 }
0x11c0   :  { %v3032_v53 = vadd.f32 %v3024_v36, %v5953_v17  ;;  %v3018_v14 = vmul.f32 %v3010_v11, %v5963_v42  ;;  %v2995_v28 = vadd.f32 %v2994_v24, %v2893_v0  ;;  %4182 = vtanh.f32 %v3038_v18 }
0x11c1   :  { %v3011_v51 = vmul.f32 0.044715, %v5970_v25  ;;  %v3039_v10 = vmul.f32 0.7978846, %v3031_v47  ;;  %v3025_v43 = vmul.f32 %v3017_v35, %v5960_v33  ;;  %v2999_v49 = vmul.f32 0.5, %v5951_v56 }
0x11c2   :  { %v3026_v41 = vmul.f32 %v3018_v14, %v5963_v42  ;;  %v3012_v9 = vmul.f32 0.044715, %v2995_v28  ;;  %v3040_v2 = vmul.f32 0.7978846, %v3032_v53  ;;  %v3002_v54 = vmul.f32 0.5, %v5963_v42 }
0x11c3   :  { %v3019_v39 = vmul.f32 %v3011_v51, %v5970_v25  ;;  %4184 = vtanh.f32 %v3039_v10  ;;  %v3033_v32 = vadd.f32 %v3025_v43, %v5960_v33  ;;  %v3001_v18 = vmul.f32 0.5, %v5960_v33 }
0x11c4   :  { %v3034_v62 = vadd.f32 %v3026_v41, %v5963_v42  ;;  %v3020_v55 = vmul.f32 %v3012_v9, %v2995_v28  ;;  %4186 = vtanh.f32 %v3040_v2  ;;  %v3004_v56 = vmul.f32 0.5, %v2995_v28 }
0x11c5   :  { %v3041_v40 = vmul.f32 0.7978846, %v3033_v32  ;;  %v3027_v8 = vmul.f32 %v3019_v39, %v5970_v25  ;;  %v3003_v51 = vmul.f32 0.5, %v5970_v25  ;;  %v3072_v33 = vrot.slane %v5877_v38, %v4396_v20 }
0x11c6   :  { %v3028_v0 = vmul.f32 %v3020_v55, %v2995_v28  ;;  %v3042_v61 = vmul.f32 0.7978846, %v3034_v62  ;;  %v3173_v42 = vrot.slane %v5877_v38, %v4612_v23 }
0x11c7   :  { %4188 = vtanh.f32 %v3041_v40  ;;  %v3035_v52 = vadd.f32 %v3027_v8, %v5970_v25 }
0x11c8   :  { %v3036_v4 = vadd.f32 %v3028_v0, %v2995_v28  ;;  %4190 = vtanh.f32 %v3042_v61 }
0x11c9   :  { %v4181_v6 = vpop.eup %4180  ;;  %v3043_v3 = vmul.f32 0.7978846, %v3035_v52 }
0x11ca   :  { %v4183_v5 = vpop.eup %4182  ;;  %v3053_v22 = vadd.f32 1.0, %v4181_v6  ;;  %v3044_v45 = vmul.f32 0.7978846, %v3036_v4 }
0x11cb   :  { %v3054_v58 = vadd.f32 1.0, %v4183_v5  ;;  %4192 = vtanh.f32 %v3043_v3 }
0x11cc   :  { %4194 = vtanh.f32 %v3044_v45  ;;  %v3061_v12 = vmul.f32 %v3053_v22, %v2997_v46 }
0x11cd   :  { %v4185_v37 = vpop.eup %4184  ;;  %v3062_v50 = vmul.f32 %v3054_v58, %v2998_v26 }
0x11ce   :  { %v4187_v13 = vpop.eup %4186  ;;  %v3055_v48 = vadd.f32 1.0, %v4185_v37 }
0x11cf   :  { %3450 = vmatprep.mubr.msk.f32.mxu0 %vm379_vm1, %v3062_v50  ;;  %v3056_v15 = vadd.f32 1.0, %v4187_v13 }
0x11d0   :  { %3150 = vmatmul.mubr.f32.vlgmr.msra.gmra.mrb[84].mxu0 %v3061_v12  ;;  %v3063_v36 = vmul.f32 %v3055_v48, %v2999_v49 }
0x11d1   :  { %v4189_v7 = vpop.eup %4188  ;;  %v3064_v16 = vmul.f32 %v3056_v15, %v3000_v21 }
0x11d2   :  { %v4191_v60 = vpop.eup %4190  ;;  %v3057_v11 = vadd.f32 1.0, %v4189_v7 }
0x11d3   :  { %3451 = vmatprep.mubr.msk.f32.mxu0 %vm379_vm1, %v3064_v16  ;;  %v3058_v30 = vadd.f32 1.0, %v4191_v60 }
0x11d4   :  { %3155 = vmatmul.mubr.f32.gmra.mrb[86].mxu0 %v3063_v36  ;;  %v3065_v47 = vmul.f32 %v3057_v11, %v3001_v18 }
0x11d5   :  { %v4193_v35 = vpop.eup %4192  ;;  %v3066_v24 = vmul.f32 %v3058_v30, %v3002_v54 }
0x11d6   :  { %v4195_v17 = vpop.eup %4194  ;;  %v3059_v53 = vadd.f32 1.0, %v4193_v35 }
0x11d7   :  { %3452 = vmatprep.mubr.msk.f32.mxu0 %vm379_vm1, %v3066_v24  ;;  %v3060_v14 = vadd.f32 1.0, %v4195_v17 }
0x11d8   :  { %3160 = vmatmul.mubr.f32.gmra.mrb[88].mxu0 %v3065_v47  ;;  %v3067_v43 = vmul.f32 %v3059_v53, %v3003_v51  ;;  %v14_v47 = vstv %s6066_s8 }
0x11d9   :  { %v3068_v10 = vmul.f32 %v3060_v14, %v3004_v56  ;;  %15 = vst [vmem:[#allocation2] sm:$0x1] %v14_v47 }
0x11db   :  { %3453 = vmatprep.mubr.msk.f32.mxu0 %vm379_vm1, %v3068_v10 }
0x11dc   :  { %3165 = vmatmul.mubr.f32.gmra.mrb[90].mxu0 %v3067_v43 }
0x12a3   :  { %v3151_v41 = vpop.f32.mrb[84].mxu0 }
0x12a4   :  { %v3152_v9 = vadd.f32 %v3151_v41, %v3072_v33  ;;  %v3153_v2 = vpop.f32.mrb[85].mxu0 }
0x12a6   :  { %v3174_v39 = vmul.f32 %v3173_v42, %v3152_v9 }
0x12a7   :  { %v3156_v28 = vpop.f32.mrb[86].mxu0 }
0x12a8   :  { %v3157_v32 = vadd.f32 %v3156_v28, %v3072_v33  ;;  %v3158_v62 = vpop.f32.mrb[87].mxu0  ;;  %v3178_v25 = vadd.f32 %v3174_v39, %v5672_v63  ;;  %v4233_v39 = vld [vmem:[%s6058_s3 + $0x50] sm:$0xff] }
0x12a9   :  { %v3241_v28 = vrot.slane %v4233_v39, %v4612_v23 }
0x12aa   :  { %v3175_v55 = vmul.f32 %v3173_v42, %v3157_v32  ;;  %v3182_v40 = vmul.f32 %v3178_v25, %v4354_v27 }
0x12ab   :  { %v3161_v8 = vpop.f32.mrb[88].mxu0 }
0x12ac   :  { %v3162_v0 = vadd.f32 %v3161_v8, %v3072_v33  ;;  %v3163_v61 = vpop.f32.mrb[89].mxu0  ;;  %v3186_v20 = vsel %vm379_vm1, %v3182_v40, 0.0  ;;  %v3179_v52 = vadd.f32 %v3175_v55, %v5675_v57  ;;  %v3249_v55 = vrot.slane %v4233_v39, %v6105_v29 }
0x12ad   :  { %3187 = vadd.xlane.f32.xlu1 %v3186_v20  ;;  %v3261_v61 = vrot.slane %v4233_v39, %v6106_v1 }
0x12ae   :  { %v3176_v38 = vmul.f32 %v3173_v42, %v3162_v0  ;;  %v3183_v4 = vmul.f32 %v3179_v52, %v4363_v31 }
0x12af   :  { %v3166_v6 = vpop.f32.mrb[90].mxu0 }
0x12b0   :  { %v3167_v3 = vadd.f32 %v3166_v6, %v3072_v33  ;;  %v3168_v5 = vpop.f32.mrb[91].mxu0  ;;  %v3189_v22 = vsel %vm379_vm1, %v3183_v4, 0.0  ;;  %v3180_v63 = vadd.f32 %v3176_v38, %v5682_v19 }
0x12b1   :  { %3190 = vadd.xlane.f32.xlu0 %v3189_v22 }
0x12b2   :  { %v3177_v45 = vmul.f32 %v3173_v42, %v3167_v3  ;;  %v3184_v26 = vmul.f32 %v3180_v63, %v4365_v34 }
0x12b4   :  { %v3192_v58 = vsel %vm379_vm1, %v3184_v26, 0.0  ;;  %v3181_v46 = vadd.f32 %v3177_v45, %v5685_v59 }
0x12b5   :  { %3193 = vadd.xlane.f32.xlu1 %v3192_v58 }
0x12b6   :  { %v3185_v57 = vmul.f32 %v3181_v46, %v4371_v44 }
0x12b8   :  { %v3195_v37 = vsel %vm379_vm1, %v3185_v57, 0.0 }
0x12b9   :  { %3196 = vadd.xlane.f32.xlu0 %v3195_v37 }
0x133a   :  { %v3188_v50 = vpop.xlane.xlu1 %3187 }
0x133b   :  { %v3198_v13 = vmul.f32 0.015625, %v3188_v50 }
0x133d   :  { %v3202_v12 = vsub.f32 %v3182_v40, %v3198_v13 }
0x133e   :  { %v3191_v48 = vpop.xlane.xlu0 %3190 }
0x133f   :  { %v3199_v21 = vmul.f32 0.015625, %v3191_v48  ;;  %v3206_v19 = vmul.f32 %v3202_v12, %v3202_v12  ;;  %v3454_v48 = vld [vmem:[#allocation2] ss:$0 sm:$0xff] }
0x1341   :  { %v3203_v15 = vsub.f32 %v3183_v4, %v3199_v21  ;;  %v3210_v49 = vsel %vm379_vm1, %v3206_v19, 0.0 }
0x1342   :  { %3211 = vadd.xlane.f32.xlu1 %v3210_v49  ;;  %v3194_v7 = vpop.xlane.xlu1 %3193 }
0x1343   :  { %v3200_v16 = vmul.f32 0.015625, %v3194_v7  ;;  %v3207_v60 = vmul.f32 %v3203_v15, %v3203_v15 }
0x1345   :  { %v3204_v59 = vsub.f32 %v3184_v26, %v3200_v16  ;;  %v3213_v36 = vsel %vm379_vm1, %v3207_v60, 0.0 }
0x1346   :  { %3214 = vadd.xlane.f32.xlu0 %v3213_v36  ;;  %v3197_v11 = vpop.xlane.xlu0 %3196 }
0x1347   :  { %v3201_v54 = vmul.f32 0.015625, %v3197_v11  ;;  %v3208_v30 = vmul.f32 %v3204_v59, %v3204_v59 }
0x1349   :  { %v3205_v18 = vsub.f32 %v3185_v57, %v3201_v54  ;;  %v3216_v35 = vsel %vm379_vm1, %v3208_v30, 0.0  ;;  %v4236_v54 = vld [vmem:[%s6060_s1 + $0x10] sm:$0xff] }
0x134a   :  { %3217 = vadd.xlane.f32.xlu1 %v3216_v35 }
0x134b   :  { %v3209_v24 = vmul.f32 %v3205_v18, %v3205_v18 }
0x134d   :  { %v3219_v17 = vsel %vm379_vm1, %v3209_v24, 0.0 }
0x134e   :  { %3220 = vadd.xlane.f32.xlu0 %v3219_v17  ;;  %v4237_v17 = vld [vmem:[%s6060_s1 + $0x18] sm:$0xff] }
0x13cf   :  { %v3212_v53 = vpop.xlane.xlu1 %3211 }
0x13d0   :  { %v3222_v56 = vmul.f32 0.015625, %v3212_v53 }
0x13d2   :  { %v3226_v14 = vadd.f32 1e-05, %v3222_v56 }
0x13d3   :  { %v3215_v51 = vpop.xlane.xlu0 %3214 }
0x13d4   :  { %4196 = vrsqrt.f32 %v3226_v14  ;;  %v3223_v10 = vmul.f32 0.015625, %v3215_v51 }
0x13d6   :  { %v3227_v43 = vadd.f32 1e-05, %v3223_v10 }
0x13d7   :  { %v3218_v33 = vpop.xlane.xlu1 %3217 }
0x13d8   :  { %4198 = vrsqrt.f32 %v3227_v43  ;;  %v3224_v42 = vmul.f32 0.015625, %v3218_v33 }
0x13da   :  { %v3228_v41 = vadd.f32 1e-05, %v3224_v42 }
0x13db   :  { %v3221_v9 = vpop.xlane.xlu0 %3220 }
0x13dc   :  { %4200 = vrsqrt.f32 %v3228_v41  ;;  %v3225_v2 = vmul.f32 0.015625, %v3221_v9 }
0x13de   :  { %v4197_v32 = vpop.eup %4196  ;;  %v3229_v62 = vadd.f32 1e-05, %v3225_v2 }
0x13df   :  { %v3234_v25 = vmul.f32 %v4197_v32, %v3202_v12 }
0x13e0   :  { %4202 = vrsqrt.f32 %v3229_v62 }
0x13e1   :  { %v3242_v40 = vmul.f32 %v3241_v28, %v3234_v25 }
0x13e2   :  { %v4199_v8 = vpop.eup %4198 }
0x13e3   :  { %v3250_v0 = vadd.f32 %v3249_v55, %v3242_v40  ;;  %v3235_v20 = vmul.f32 %v4199_v8, %v3203_v15 }
0x13e5   :  { %v3254_v52 = vmul.f32 %v3250_v0, %v4354_v27  ;;  %v3243_v38 = vmul.f32 %v3241_v28, %v3235_v20 }
0x13e6   :  { %v4201_v4 = vpop.eup %4200 }
0x13e7   :  { %v3262_v6 = vmul.f32 %v3261_v61, %v3254_v52  ;;  %v3251_v3 = vadd.f32 %v3249_v55, %v3243_v38  ;;  %v3236_v5 = vmul.f32 %v4201_v4, %v3204_v59 }
0x13e9   :  { %v3266_v23 = vsel %vm379_vm1, %v3262_v6, 0.0  ;;  %v3255_v22 = vmul.f32 %v3251_v3, %v4363_v31  ;;  %v3244_v63 = vmul.f32 %v3241_v28, %v3236_v5 }
0x13ea   :  { %v4203_v29 = vpop.eup %4202  ;;  %3267 = vadd.xlane.f32.xlu1 %v3266_v23 }
0x13eb   :  { %v3263_v45 = vmul.f32 %v3261_v61, %v3255_v22  ;;  %v3252_v26 = vadd.f32 %v3249_v55, %v3244_v63  ;;  %v3237_v58 = vmul.f32 %v4203_v29, %v3205_v18 }
0x13ed   :  { %v3269_v1 = vsel %vm379_vm1, %v3263_v45, 0.0  ;;  %v3256_v46 = vmul.f32 %v3252_v26, %v4365_v34  ;;  %v3245_v27 = vmul.f32 %v3241_v28, %v3237_v58  ;;  %v4234_v34 = vld [vmem:[%s6060_s1] sm:$0xff] }
0x13ee   :  { %3270 = vadd.xlane.f32.xlu0 %v3269_v1 }
0x13ef   :  { %v3264_v57 = vmul.f32 %v3261_v61, %v3256_v46  ;;  %v3253_v37 = vadd.f32 %v3249_v55, %v3245_v27 }
0x13f1   :  { %v3272_v50 = vsel %vm379_vm1, %v3264_v57, 0.0  ;;  %v3257_v13 = vmul.f32 %v3253_v37, %v4371_v44  ;;  %v4235_v44 = vld [vmem:[%s6060_s1 + $0x8] sm:$0xff] }
0x13f2   :  { %3273 = vadd.xlane.f32.xlu1 %v3272_v50 }
0x13f3   :  { %v3265_v31 = vmul.f32 %v3261_v61, %v3257_v13 }
0x13f5   :  { %v3275_v12 = vsel %vm379_vm1, %v3265_v31, 0.0 }
0x13f6   :  { %3276 = vadd.xlane.f32.xlu0 %v3275_v12 }
0x1477   :  { %v3268_v21 = vpop.xlane.xlu1 %3267 }
0x1478   :  { %v3285_v19 = vadd.f32 %v3454_v48, %v3268_v21 }
0x147a   :  { %v3289_v15 = vmul.f32 %v4234_v34, %v3285_v19 }
0x147b   :  { %v3271_v49 = vpop.xlane.xlu0 %3270 }
0x147c   :  { %v3293_v7 = vmax.f32 %v3289_v15, 0.0  ;;  %v3286_v16 = vadd.f32 %v3454_v48, %v3271_v49 }
0x147e   :  { %3298 = vst.msk [vmem:[%s6067_s9] sm:$0xff] %vm3297_vm3, %v3293_v7  ;;  %v3290_v60 = vmul.f32 %v4235_v44, %v3286_v16 }
0x147f   :  { %v3274_v59 = vpop.xlane.xlu1 %3273 }
0x1480   :  { %v3294_v36 = vmax.f32 %v3290_v60, 0.0  ;;  %v3287_v11 = vadd.f32 %v3454_v48, %v3274_v59 }
0x1482   :  { %3299 = vst.msk [vmem:[%s6067_s9 + $0x8] sm:$0xff] %vm3297_vm3, %v3294_v36  ;;  %v3291_v30 = vmul.f32 %v4236_v54, %v3287_v11 }
0x1483   :  { %v3277_v18 = vpop.xlane.xlu0 %3276 }
0x1484   :  { %v3295_v35 = vmax.f32 %v3291_v30, 0.0  ;;  %v3288_v24 = vadd.f32 %v3454_v48, %v3277_v18 }
0x1486   :  { %3300 = vst.msk [vmem:[%s6067_s9 + $0x10] sm:$0xff] %vm3297_vm3, %v3295_v35  ;;  %v3292_v47 = vmul.f32 %v4237_v17, %v3288_v24 }
0x1488   :  { %v3296_v53 = vmax.f32 %v3292_v47, 0.0 }
0x148a   :  { %3301 = vst.msk [vmem:[%s6067_s9 + $0x18] sm:$0xff] %vm3297_vm3, %v3296_v53 }

</bundles_post_ra>
